<compile_context>
chip_gen: v7x
topology: tpu7x:2x2x1
jax: 0.10.0
libtpu: 0.0.40
codegen_flags: <defaults>
</compile_context>

<pallas_src>
import functools

import jax
import jax.numpy as jnp
from jax.experimental import pallas as pl
from jax.experimental.pallas import tpu as pltpu


# --------------------------------------------------------------------------
# Kernel 1: encoder + fused decoder-Linear1
# --------------------------------------------------------------------------
def _encode_kernel(x_ref, we1_ref, be1_ref, we2_ref, be2_ref,
                   wfuse_ref, bfuse_ref,
                   rep_ref, d1_ref, acc_ref):
    k = pl.program_id(1)

    @pl.when(k == 0)
    def _():
        acc_ref[...] = jnp.zeros_like(acc_ref)

    # (tm, tg) @ (tg, H) accumulated in f32 across the gene (K) axis.
    acc_ref[...] += jnp.dot(x_ref[...], we1_ref[...],
                            preferred_element_type=jnp.float32)

    @pl.when(k == pl.num_programs(1) - 1)
    def _():
        h1 = jnp.maximum(acc_ref[...] + be1_ref[...], 0.0)
        h1b = h1.astype(jnp.bfloat16)
        # rep (lane-dense, emb padded to 128) and d1 are independent matmuls.
        rep_ref[...] = (jnp.dot(h1b, we2_ref[...],
                                preferred_element_type=jnp.float32)
                        + be2_ref[...])
        d1_ref[...] = (jnp.dot(h1b, wfuse_ref[...],
                               preferred_element_type=jnp.float32)
                       + bfuse_ref[...])


# --------------------------------------------------------------------------
# Kernel 2: BatchNorm affine (precomputed scale/shift) + ReLU + decoder-Linear2
# --------------------------------------------------------------------------
def _decode_kernel(d1_ref, scale_ref, shift_ref, wd2_ref, bd2_ref, recon_ref):
    h = jnp.maximum(d1_ref[...] * scale_ref[...] + shift_ref[...], 0.0)
    recon_ref[...] = (jnp.dot(h.astype(jnp.bfloat16), wd2_ref[...],
                              preferred_element_type=jnp.float32)
                      + bd2_ref[...])


def _round_up(x, m):
    return ((x + m - 1) // m) * m


def _pad2(a, rows, cols):
    pr, pc = rows - a.shape[0], cols - a.shape[1]
    if pr or pc:
        a = jnp.pad(a, ((0, pr), (0, pc)))
    return a


def sczgcl_mse_forward(x, params, *, tm=256, tg=1024):
    """Fused forward pass.  x: (B, num_gene) float32.  Returns (recon, rep)."""
    f32, bf16 = jnp.float32, jnp.bfloat16
    B, G = x.shape
    H = params["we1"].shape[1]          # hidden = 256
    E = params["we2"].shape[1]          # emb_dim = 64
    Ep = _round_up(E, 128)              # lane-dense rep slab

    tm = min(tm, _round_up(B, 128))
    Bp = _round_up(B, tm)
    tg = min(tg, _round_up(G, 128))
    Gp = _round_up(G, tg)
    nb, nk = Bp // tm, Gp // tg

    # ---- parameter preprocessing: pad, algebraic fusion, bf16 cast ----
    we1 = _pad2(params["we1"].astype(f32), Gp, H)
    be1 = params["be1"].astype(f32)
    we2 = params["we2"].astype(f32)                       # (H, E)
    be2 = params["be2"].astype(f32)                       # (1, E)
    wd1 = params["wd1"].astype(f32)                       # (E, H)
    bd1 = params["bd1"].astype(f32)
    wd2 = _pad2(params["wd2"].astype(f32), H, Gp)
    bd2 = _pad2(params["bd2"].astype(f32), 1, Gp)
    gamma = params["gamma"].astype(f32)
    beta = params["beta"].astype(f32)

    # Fuse the rep -> d1 chain: d1 = h1 @ (W_e2 @ W_d1) + (b_e2 @ W_d1 + b_d1).
    wfuse = jnp.dot(we2, wd1, preferred_element_type=f32)     # (H, H)
    bfuse = jnp.dot(be2, wd1, preferred_element_type=f32) + bd1

    we2p = _pad2(we2, H, Ep)
    be2p = _pad2(be2, 1, Ep)

    xb = _pad2(x.astype(f32), Bp, Gp).astype(bf16)
    we1b, we2b = we1.astype(bf16), we2p.astype(bf16)
    wfuseb, wd2b = wfuse.astype(bf16), wd2.astype(bf16)

    # ---- kernel 1: encoder + decoder-Linear1 ----
    cost1 = pl.CostEstimate(
        flops=2 * Bp * Gp * H + 2 * Bp * H * Ep + 2 * Bp * H * H,
        transcendentals=0,
        bytes_accessed=(Bp * Gp * 2 + Gp * H * 2 + H * Ep * 2 + H * H * 2
                        + Bp * (Ep + H) * 4 + (3 * H + Ep) * 4))
    rep_pad, d1 = pl.pallas_call(
        _encode_kernel,
        out_shape=(jax.ShapeDtypeStruct((Bp, Ep), f32),
                   jax.ShapeDtypeStruct((Bp, H), f32)),
        grid_spec=pltpu.PrefetchScalarGridSpec(
            num_scalar_prefetch=0,
            grid=(nb, nk),
            in_specs=[
                pl.BlockSpec((tm, tg), lambda i, k: (i, k)),   # x tile
                pl.BlockSpec((tg, H), lambda i, k: (k, 0)),    # W_e1 K-tile
                pl.BlockSpec((1, H), lambda i, k: (0, 0)),     # b_e1 (resident)
                pl.BlockSpec((H, Ep), lambda i, k: (0, 0)),    # W_e2 (resident)
                pl.BlockSpec((1, Ep), lambda i, k: (0, 0)),    # b_e2 (resident)
                pl.BlockSpec((H, H), lambda i, k: (0, 0)),     # W_fuse (resident)
                pl.BlockSpec((1, H), lambda i, k: (0, 0)),     # b_fuse (resident)
            ],
            out_specs=(pl.BlockSpec((tm, Ep), lambda i, k: (i, 0)),
                       pl.BlockSpec((tm, H), lambda i, k: (i, 0))),
            scratch_shapes=[pltpu.VMEM((tm, H), f32)]),
        compiler_params=pltpu.CompilerParams(
            dimension_semantics=("parallel", "arbitrary"),
            vmem_limit_bytes=48 * 1024 * 1024),
        cost_estimate=cost1,
    )(xb, we1b, be1, we2b, be2p, wfuseb, bfuse)

    # ---- BatchNorm1d full-batch statistics (exact, training mode) ----
    # Tiny (B, 256) reduction done in XLA between the two pallas_calls so the
    # batch grid axis can stay "parallel" (no cross-tile stat accumulation).
    d1v = d1[:B]
    mean = jnp.mean(d1v, axis=0, keepdims=True)
    var = jnp.mean(jnp.square(d1v - mean), axis=0, keepdims=True)  # biased var
    inv_std = jax.lax.rsqrt(var + 1e-5)
    scale = gamma * inv_std
    shift = beta - mean * scale

    # ---- kernel 2: BN affine + ReLU + decoder-Linear2 ----
    cost2 = pl.CostEstimate(
        flops=2 * Bp * H * Gp,
        transcendentals=0,
        bytes_accessed=Bp * H * 4 + H * Gp * 2 + Bp * Gp * 4 + Gp * 4 + 2 * H * 4)
    recon = pl.pallas_call(
        _decode_kernel,
        out_shape=jax.ShapeDtypeStruct((Bp, Gp), f32),
        grid_spec=pltpu.PrefetchScalarGridSpec(
            num_scalar_prefetch=0,
            grid=(nb, Gp // tg),
            in_specs=[
                pl.BlockSpec((tm, H), lambda i, j: (i, 0)),    # d1 batch tile
                pl.BlockSpec((1, H), lambda i, j: (0, 0)),     # BN scale
                pl.BlockSpec((1, H), lambda i, j: (0, 0)),     # BN shift
                pl.BlockSpec((H, tg), lambda i, j: (0, j)),    # W_d2 N-tile
                pl.BlockSpec((1, tg), lambda i, j: (0, j)),    # b_d2 N-tile
            ],
            out_specs=pl.BlockSpec((tm, tg), lambda i, j: (i, j))),
        compiler_params=pltpu.CompilerParams(
            dimension_semantics=("parallel", "parallel"),
            vmem_limit_bytes=48 * 1024 * 1024),
        cost_estimate=cost2,
    )(d1, scale, shift, wd2b, bd2)

    return recon[:B, :G], rep_pad[:B, :E]


# --------------------------------------------------------------------------
# Parameter construction (deterministic, PyTorch-Linear-style init)
# --------------------------------------------------------------------------
def _linear_init(key, fan_in, fan_out):
    kw, kb = jax.random.split(key)
    bound = 1.0 / jnp.sqrt(jnp.float32(fan_in))
    w = jax.random.uniform(kw, (fan_in, fan_out), jnp.float32, -bound, bound)
    b = jax.random.uniform(kb, (1, fan_out), jnp.float32, -bound, bound)
    return w, b


def make_params(key, num_gene, layer_sizes=(256, 64)):
    h0, emb = layer_sizes
    keys = jax.random.split(key, 4)
    we1, be1 = _linear_init(keys[0], num_gene, h0)     # encoder layer 1
    we2, be2 = _linear_init(keys[1], h0, emb)          # encoder layer 2 (emb)
    wd1, bd1 = _linear_init(keys[2], emb, h0)          # decoder Linear(64->256)
    wd2, bd2 = _linear_init(keys[3], h0, num_gene)     # decoder Linear(256->G)
    gamma = jnp.ones((1, h0), jnp.float32)             # BatchNorm1d weight
    beta = jnp.zeros((1, h0), jnp.float32)             # BatchNorm1d bias
    return dict(we1=we1, be1=be1, we2=we2, be2=be2,
                wd1=wd1, bd1=bd1, gamma=gamma, beta=beta,
                wd2=wd2, bd2=bd2)


def _reference(x, params):
    """Pure-JAX reference mirroring the kernel's bf16/f32 math."""
    f32, bf16 = jnp.float32, jnp.bfloat16
    cast = lambda a: a.astype(bf16).astype(f32)
    h1 = jnp.maximum(cast(x) @ cast(params["we1"]) + params["be1"], 0.0)
    h1 = cast(h1)
    rep = h1 @ cast(params["we2"]) + params["be2"]
    wfuse = params["we2"] @ params["wd1"]
    bfuse = params["be2"] @ params["wd1"] + params["bd1"]
    d1 = h1 @ cast(wfuse) + bfuse
    mean = jnp.mean(d1, axis=0, keepdims=True)
    var = jnp.mean((d1 - mean) ** 2, axis=0, keepdims=True)
    h = jnp.maximum((d1 - mean) * jax.lax.rsqrt(var + 1e-5)
                    * params["gamma"] + params["beta"], 0.0)
    recon = cast(h) @ cast(params["wd2"]) + params["bd2"]
    return recon, rep


if __name__ == "__main__":
    key = jax.random.PRNGKey(0)
    k_x, k_p = jax.random.split(key)

    B = 384          # exercises batch tiling + padding (tm=256 -> 2 tiles)
    num_gene = 768   # exercises gene K/N tiling (tg -> 768, lane-aligned)
    layer_sizes = (256, 64)

    x = jax.random.normal(k_x, (B, num_gene), jnp.float32)
    params = make_params(k_p, num_gene, layer_sizes)

    fwd = jax.jit(functools.partial(sczgcl_mse_forward))
    recon, rep = fwd(x, params)
    jax.block_until_ready((recon, rep))

    assert recon.shape == (B, num_gene) and rep.shape == (B, layer_sizes[-1])
    assert bool(jnp.all(jnp.isfinite(recon))) and bool(jnp.all(jnp.isfinite(rep)))

    recon_ref, rep_ref = _reference(x, params)
    assert bool(jnp.allclose(rep, rep_ref, atol=1e-2, rtol=1e-2)), "rep mismatch"
    assert bool(jnp.allclose(recon, recon_ref, atol=1e-2, rtol=1e-2)), "recon mismatch"

    print("KERNEL_OK")
</pallas_src>

<mosaic_0001>
module attributes {stable_mosaic.version = 11 : i64} {
  func.func @_encode_kernel(%arg0: i32, %arg1: i32, %arg2: memref<256x768xbf16, #tpu.memory_space<vmem>>, %arg3: memref<768x256xbf16, #tpu.memory_space<vmem>>, %arg4: memref<1x256xf32, #tpu.memory_space<vmem>>, %arg5: memref<256x128xbf16, #tpu.memory_space<vmem>>, %arg6: memref<1x128xf32, #tpu.memory_space<vmem>>, %arg7: memref<256x256xbf16, #tpu.memory_space<vmem>>, %arg8: memref<1x256xf32, #tpu.memory_space<vmem>>, %arg9: memref<256x128xf32, #tpu.memory_space<vmem>>, %arg10: memref<256x256xf32, #tpu.memory_space<vmem>>, %arg11: memref<256x256xf32, #tpu.memory_space<vmem>>) attributes {dimension_semantics = [#tpu.dimension_semantics<parallel>, #tpu.dimension_semantics<arbitrary>], iteration_bounds = array<i64: 2, 1>, scalar_prefetch = 0 : i64, scratch_operands = 1 : i64, tpu.core_type = #tpu.core_type<tc>, window_params = [{transform_indices = @transform_0, window_bounds = array<i64: 256, 768>}, {transform_indices = @transform_1, window_bounds = array<i64: 768, 256>}, {pipeline_mode = #tpu.pipeline_mode<synchronous>, transform_indices = @transform_2, window_bounds = array<i64: 1, 256>}, {pipeline_mode = #tpu.pipeline_mode<synchronous>, transform_indices = @transform_3, window_bounds = array<i64: 256, 128>}, {pipeline_mode = #tpu.pipeline_mode<synchronous>, transform_indices = @transform_4, window_bounds = array<i64: 1, 128>}, {pipeline_mode = #tpu.pipeline_mode<synchronous>, transform_indices = @transform_5, window_bounds = array<i64: 256, 256>}, {pipeline_mode = #tpu.pipeline_mode<synchronous>, transform_indices = @transform_6, window_bounds = array<i64: 1, 256>}, {transform_indices = @transform_7, window_bounds = array<i64: 256, 128>}, {transform_indices = @transform_8, window_bounds = array<i64: 256, 256>}]} {
    %c0_i32 = arith.constant 0 : i32
    %0 = arith.cmpi eq, %arg1, %c0_i32 : i32
    %1 = arith.extui %0 : i1 to i32
    %c0_i32_0 = arith.constant 0 : i32
    %2 = arith.cmpi ne, %1, %c0_i32_0 : i32
    scf.if %2 {
      %cst_10 = arith.constant 0.000000e+00 : f32
      %12 = vector.broadcast %cst_10 : f32 to vector<256x256xf32>
      %c0_11 = arith.constant 0 : index
      %c0_12 = arith.constant 0 : index
      %13 = vector.load %arg11[%c0_11, %c0_12] : memref<256x256xf32, #tpu.memory_space<vmem>>, vector<256x256xf32>
      tpu.vector_store %arg11[%c0_11, %c0_12], %12 {strides = array<i32>} : memref<256x256xf32, #tpu.memory_space<vmem>>, vector<256x256xf32>,
    } else {
    }
    %c0 = arith.constant 0 : index
    %c0_1 = arith.constant 0 : index
    %3 = vector.load %arg11[%c0, %c0_1] : memref<256x256xf32, #tpu.memory_space<vmem>>, vector<256x256xf32>
    %c0_2 = arith.constant 0 : index
    %c0_3 = arith.constant 0 : index
    %4 = vector.load %arg2[%c0_2, %c0_3] : memref<256x768xbf16, #tpu.memory_space<vmem>>, vector<256x768xbf16>
    %c0_4 = arith.constant 0 : index
    %c0_5 = arith.constant 0 : index
    %5 = vector.load %arg3[%c0_4, %c0_5] : memref<768x256xbf16, #tpu.memory_space<vmem>>, vector<768x256xbf16>
    %cst = arith.constant dense<0.000000e+00> : vector<256x256xf32>
    %6 = tpu.matmul %4, %5, %cst {dimension_numbers = #tpu.dot_dimension_numbers<[1], [0], [0], [1], [0, 0, 1, 1], [], []>} : vector<256x768xbf16>, vector<768x256xbf16>, vector<256x256xf32> -> vector<256x256xf32>
    %7 = arith.addf %3, %6 : vector<256x256xf32>
    %c0_6 = arith.constant 0 : index
    %c0_7 = arith.constant 0 : index
    %8 = vector.load %arg11[%c0_6, %c0_7] : memref<256x256xf32, #tpu.memory_space<vmem>>, vector<256x256xf32>
    tpu.vector_store %arg11[%c0_6, %c0_7], %7 {strides = array<i32>} : memref<256x256xf32, #tpu.memory_space<vmem>>, vector<256x256xf32>,
    %c0_i32_8 = arith.constant 0 : i32
    %9 = arith.cmpi eq, %arg1, %c0_i32_8 : i32
    %10 = arith.extui %9 : i1 to i32
    %c0_i32_9 = arith.constant 0 : i32
    %11 = arith.cmpi ne, %10, %c0_i32_9 : i32
    scf.if %11 {
      %c0_10 = arith.constant 0 : index
      %c0_11 = arith.constant 0 : index
      %12 = vector.load %arg11[%c0_10, %c0_11] : memref<256x256xf32, #tpu.memory_space<vmem>>, vector<256x256xf32>
      %c0_12 = arith.constant 0 : index
      %c0_13 = arith.constant 0 : index
      %13 = vector.load %arg4[%c0_12, %c0_13] : memref<1x256xf32, #tpu.memory_space<vmem>>, vector<1x256xf32>
      %14 = vector.broadcast %13 : vector<1x256xf32> to vector<256x256xf32>
      %15 = arith.addf %12, %14 : vector<256x256xf32>
      %cst_14 = arith.constant 0.000000e+00 : f32
      %16 = vector.broadcast %cst_14 : f32 to vector<256x256xf32>
      %17 = arith.maximumf %15, %16 : vector<256x256xf32>
      %18 = arith.truncf %17 : vector<256x256xf32> to vector<256x256xbf16>
      %c0_15 = arith.constant 0 : index
      %c0_16 = arith.constant 0 : index
      %19 = vector.load %arg5[%c0_15, %c0_16] : memref<256x128xbf16, #tpu.memory_space<vmem>>, vector<256x128xbf16>
      %cst_17 = arith.constant dense<0.000000e+00> : vector<256x128xf32>
      %20 = tpu.matmul %18, %19, %cst_17 {dimension_numbers = #tpu.dot_dimension_numbers<[1], [0], [0], [1], [0, 0, 1, 1], [], []>} : vector<256x256xbf16>, vector<256x128xbf16>, vector<256x128xf32> -> vector<256x128xf32>
      %c0_18 = arith.constant 0 : index
      %c0_19 = arith.constant 0 : index
      %21 = vector.load %arg6[%c0_18, %c0_19] : memref<1x128xf32, #tpu.memory_space<vmem>>, vector<1x128xf32>
      %22 = vector.broadcast %21 : vector<1x128xf32> to vector<256x128xf32>
      %23 = arith.addf %20, %22 : vector<256x128xf32>
      %c0_20 = arith.constant 0 : index
      %c0_21 = arith.constant 0 : index
      %24 = vector.load %arg9[%c0_20, %c0_21] : memref<256x128xf32, #tpu.memory_space<vmem>>, vector<256x128xf32>
      tpu.vector_store %arg9[%c0_20, %c0_21], %23 {strides = array<i32>} : memref<256x128xf32, #tpu.memory_space<vmem>>, vector<256x128xf32>,
      %c0_22 = arith.constant 0 : index
      %c0_23 = arith.constant 0 : index
      %25 = vector.load %arg7[%c0_22, %c0_23] : memref<256x256xbf16, #tpu.memory_space<vmem>>, vector<256x256xbf16>
      %cst_24 = arith.constant dense<0.000000e+00> : vector<256x256xf32>
      %26 = tpu.matmul %18, %25, %cst_24 {dimension_numbers = #tpu.dot_dimension_numbers<[1], [0], [0], [1], [0, 0, 1, 1], [], []>} : vector<256x256xbf16>, vector<256x256xbf16>, vector<256x256xf32> -> vector<256x256xf32>
      %c0_25 = arith.constant 0 : index
      %c0_26 = arith.constant 0 : index
      %27 = vector.load %arg8[%c0_25, %c0_26] : memref<1x256xf32, #tpu.memory_space<vmem>>, vector<1x256xf32>
      %28 = vector.broadcast %27 : vector<1x256xf32> to vector<256x256xf32>
      %29 = arith.addf %26, %28 : vector<256x256xf32>
      %c0_27 = arith.constant 0 : index
      %c0_28 = arith.constant 0 : index
      %30 = vector.load %arg10[%c0_27, %c0_28] : memref<256x256xf32, #tpu.memory_space<vmem>>, vector<256x256xf32>
      tpu.vector_store %arg10[%c0_27, %c0_28], %29 {strides = array<i32>} : memref<256x256xf32, #tpu.memory_space<vmem>>, vector<256x256xf32>,
    } else {
    }
    return
  }
  func.func @transform_0(%arg0: i32, %arg1: i32) -> (i32, i32) {
    %c0_i32 = arith.constant 0 : i32
    return %arg0, %arg1 : i32, i32
  }
  func.func @transform_1(%arg0: i32, %arg1: i32) -> (i32, i32) {
    %c0_i32 = arith.constant 0 : i32
    %c0_i32_0 = arith.constant 0 : i32
    return %arg1, %c0_i32 : i32, i32
  }
  func.func @transform_2(%arg0: i32, %arg1: i32) -> (i32, i32) {
    %c0_i32 = arith.constant 0 : i32
    %c0_i32_0 = arith.constant 0 : i32
    %c0_i32_1 = arith.constant 0 : i32
    return %c0_i32, %c0_i32_0 : i32, i32
  }
  func.func @transform_3(%arg0: i32, %arg1: i32) -> (i32, i32) {
    %c0_i32 = arith.constant 0 : i32
    %c0_i32_0 = arith.constant 0 : i32
    %c0_i32_1 = arith.constant 0 : i32
    return %c0_i32, %c0_i32_0 : i32, i32
  }
  func.func @transform_4(%arg0: i32, %arg1: i32) -> (i32, i32) {
    %c0_i32 = arith.constant 0 : i32
    %c0_i32_0 = arith.constant 0 : i32
    %c0_i32_1 = arith.constant 0 : i32
    return %c0_i32, %c0_i32_0 : i32, i32
  }
  func.func @transform_5(%arg0: i32, %arg1: i32) -> (i32, i32) {
    %c0_i32 = arith.constant 0 : i32
    %c0_i32_0 = arith.constant 0 : i32
    %c0_i32_1 = arith.constant 0 : i32
    return %c0_i32, %c0_i32_0 : i32, i32
  }
  func.func @transform_6(%arg0: i32, %arg1: i32) -> (i32, i32) {
    %c0_i32 = arith.constant 0 : i32
    %c0_i32_0 = arith.constant 0 : i32
    %c0_i32_1 = arith.constant 0 : i32
    return %c0_i32, %c0_i32_0 : i32, i32
  }
  func.func @transform_7(%arg0: i32, %arg1: i32) -> (i32, i32) {
    %c0_i32 = arith.constant 0 : i32
    %c0_i32_0 = arith.constant 0 : i32
    return %arg0, %c0_i32 : i32, i32
  }
  func.func @transform_8(%arg0: i32, %arg1: i32) -> (i32, i32) {
    %c0_i32 = arith.constant 0 : i32
    %c0_i32_0 = arith.constant 0 : i32
    return %arg0, %c0_i32 : i32, i32
  }
}

module attributes {stable_mosaic.version = 11 : i64} {
  func.func @_decode_kernel(%arg0: i32, %arg1: i32, %arg2: memref<256x256xf32, #tpu.memory_space<vmem>>, %arg3: memref<1x256xf32, #tpu.memory_space<vmem>>, %arg4: memref<1x256xf32, #tpu.memory_space<vmem>>, %arg5: memref<256x768xbf16, #tpu.memory_space<vmem>>, %arg6: memref<1x768xf32, #tpu.memory_space<vmem>>, %arg7: memref<256x768xf32, #tpu.memory_space<vmem>>) attributes {dimension_semantics = [#tpu.dimension_semantics<parallel>, #tpu.dimension_semantics<parallel>], iteration_bounds = array<i64: 2, 1>, scalar_prefetch = 0 : i64, scratch_operands = 0 : i64, tpu.core_type = #tpu.core_type<tc>, window_params = [{transform_indices = @transform_0, window_bounds = array<i64: 256, 256>}, {pipeline_mode = #tpu.pipeline_mode<synchronous>, transform_indices = @transform_1, window_bounds = array<i64: 1, 256>}, {pipeline_mode = #tpu.pipeline_mode<synchronous>, transform_indices = @transform_2, window_bounds = array<i64: 1, 256>}, {transform_indices = @transform_3, window_bounds = array<i64: 256, 768>}, {transform_indices = @transform_4, window_bounds = array<i64: 1, 768>}, {transform_indices = @transform_5, window_bounds = array<i64: 256, 768>}]} {
    %c0 = arith.constant 0 : index
    %c0_0 = arith.constant 0 : index
    %0 = vector.load %arg2[%c0, %c0_0] : memref<256x256xf32, #tpu.memory_space<vmem>>, vector<256x256xf32>
    %c0_1 = arith.constant 0 : index
    %c0_2 = arith.constant 0 : index
    %1 = vector.load %arg3[%c0_1, %c0_2] : memref<1x256xf32, #tpu.memory_space<vmem>>, vector<1x256xf32>
    %2 = vector.broadcast %1 : vector<1x256xf32> to vector<256x256xf32>
    %3 = arith.mulf %0, %2 : vector<256x256xf32>
    %c0_3 = arith.constant 0 : index
    %c0_4 = arith.constant 0 : index
    %4 = vector.load %arg4[%c0_3, %c0_4] : memref<1x256xf32, #tpu.memory_space<vmem>>, vector<1x256xf32>
    %5 = vector.broadcast %4 : vector<1x256xf32> to vector<256x256xf32>
    %6 = arith.addf %3, %5 : vector<256x256xf32>
    %cst = arith.constant 0.000000e+00 : f32
    %7 = vector.broadcast %cst : f32 to vector<256x256xf32>
    %8 = arith.maximumf %6, %7 : vector<256x256xf32>
    %9 = arith.truncf %8 : vector<256x256xf32> to vector<256x256xbf16>
    %c0_5 = arith.constant 0 : index
    %c0_6 = arith.constant 0 : index
    %10 = vector.load %arg5[%c0_5, %c0_6] : memref<256x768xbf16, #tpu.memory_space<vmem>>, vector<256x768xbf16>
    %cst_7 = arith.constant dense<0.000000e+00> : vector<256x768xf32>
    %11 = tpu.matmul %9, %10, %cst_7 {dimension_numbers = #tpu.dot_dimension_numbers<[1], [0], [0], [1], [0, 0, 1, 1], [], []>} : vector<256x256xbf16>, vector<256x768xbf16>, vector<256x768xf32> -> vector<256x768xf32>
    %c0_8 = arith.constant 0 : index
    %c0_9 = arith.constant 0 : index
    %12 = vector.load %arg6[%c0_8, %c0_9] : memref<1x768xf32, #tpu.memory_space<vmem>>, vector<1x768xf32>
    %13 = vector.broadcast %12 : vector<1x768xf32> to vector<256x768xf32>
    %14 = arith.addf %11, %13 : vector<256x768xf32>
    %c0_10 = arith.constant 0 : index
    %c0_11 = arith.constant 0 : index
    %15 = vector.load %arg7[%c0_10, %c0_11] : memref<256x768xf32, #tpu.memory_space<vmem>>, vector<256x768xf32>
    tpu.vector_store %arg7[%c0_10, %c0_11], %14 {strides = array<i32>} : memref<256x768xf32, #tpu.memory_space<vmem>>, vector<256x768xf32>,
    return
  }
  func.func @transform_0(%arg0: i32, %arg1: i32) -> (i32, i32) {
    %c0_i32 = arith.constant 0 : i32
    %c0_i32_0 = arith.constant 0 : i32
    return %arg0, %c0_i32 : i32, i32
  }
  func.func @transform_1(%arg0: i32, %arg1: i32) -> (i32, i32) {
    %c0_i32 = arith.constant 0 : i32
    %c0_i32_0 = arith.constant 0 : i32
    %c0_i32_1 = arith.constant 0 : i32
    return %c0_i32, %c0_i32_0 : i32, i32
  }
  func.func @transform_2(%arg0: i32, %arg1: i32) -> (i32, i32) {
    %c0_i32 = arith.constant 0 : i32
    %c0_i32_0 = arith.constant 0 : i32
    %c0_i32_1 = arith.constant 0 : i32
    return %c0_i32, %c0_i32_0 : i32, i32
  }
  func.func @transform_3(%arg0: i32, %arg1: i32) -> (i32, i32) {
    %c0_i32 = arith.constant 0 : i32
    %c0_i32_0 = arith.constant 0 : i32
    return %c0_i32, %arg1 : i32, i32
  }
  func.func @transform_4(%arg0: i32, %arg1: i32) -> (i32, i32) {
    %c0_i32 = arith.constant 0 : i32
    %c0_i32_0 = arith.constant 0 : i32
    return %c0_i32, %arg1 : i32, i32
  }
  func.func @transform_5(%arg0: i32, %arg1: i32) -> (i32, i32) {
    %c0_i32 = arith.constant 0 : i32
    return %arg0, %arg1 : i32, i32
  }
}

</mosaic_0001>

<bundles_post_ra>
// kernel: sczgcl_mse_forward.3
= control target key start
LH: loop header
LB: loop body
LE: loop exit
PB: predicated region body
PF: predicated region fallthrough
CT: control target
= control target key end

     0   :  { %s2465_s18 = smov 0   ;;  %s2467_s19 = smov 0   ;;  %s3630_s0 = inlined_call_operand.vmem [shape: f32[512,256], index: 0, kind: input, shape index: {}]   ;;  %s3631_s1 = inlined_call_operand.vmem [shape: f32[1,256], index: 1, kind: input, shape index: {}]   ;;  %s3632_s2 = inlined_call_operand.vmem [shape: f32[1,256], index: 2, kind: input, shape index: {}]   ;;  %s3633_s3 = inlined_call_operand.vmem [shape: bf16[256,768], index: 3, kind: input, shape index: {}]   ;;  %s3634_s4 = inlined_call_operand.vmem [shape: f32[1,768], index: 4, kind: input, shape index: {}]   ;;  %s3635_s5 = inlined_call_operand.vmem [shape: f32[512,768], index: 5, kind: output, shape index: {}]  }
   0x1   :  { %s2469_s20 = smov 0  }
   0x2 LB: > { %s27_s21 = sadd.s32 1, %s2429_s19  ;;  %p2105_p0 = scmp.ge.s32.totalorder %s2433_s20, 1  ;;  %s2433_s20 = sphi %s2469_s20, %s15_s20   ;;  %s2429_s19 = sphi %s2467_s19, %s3637_s19   ;;  %s2425_s18 = sphi %s2465_s18, %s3636_s18  }
   0x3   : > { %p29_p1 = scmp.ge.s32.totalorder %s27_s21, 2  ;;  %p224_p2 = scmp.lt.s32.totalorder %s2433_s20, 3 }
   0x5   : > { %s3639_s21 = smov (%p29_p1, %s27_s21), 0  ;;  %p225_p3 = pnand %p2105_p0, %p224_p2 }
   0x6   : > { %v2267_v0 = vld [vmem:[%s3633_s3 + $0x4] ss:$24 sps:$4 sm:$0xff] (!%p225_p3)   ;;  %v2269_v1 = vld [vmem:[%s3633_s3] ss:$24 sps:$4 sm:$0xff] (!%p225_p3)   ;;  %v2270_v2 = vld [vmem:[%s3633_s3 + $0x34] ss:$24 sps:$4 sm:$0xff] (!%p225_p3)   ;;  %v363_v8 = vlaneseq (!%p225_p3) }
   0x7   : > { %228 = sbr.rel (%p225_p3) target bundleno = 473 (0x1d9), region = 40  ;;  %1217 = vmatprep.subr.bf16.mxu0 (!%p225_p3), %v2267_v0  ;;  %2210 = vmatprep.subr.bf16.mxu1 (!%p225_p3), %v2267_v0  ;;  %v2272_v3 = vld [vmem:[%s3633_s3 + $0x30] ss:$24 sps:$4 sm:$0xff] (!%p225_p3)   ;;  %v2273_v4 = vld [vmem:[%s3633_s3 + $0x64] ss:$24 sps:$4 sm:$0xff] (!%p225_p3)   ;;  %s2106_s7 = sshll.u32 (!%p225_p3), %s2425_s18, 5 }
   0x8   : > { %1218 = vmatpush1.bf16.msra.mxu0 (!%p225_p3), %v2269_v1  ;;  %2226 = vmatpush1.bf16.msra.mxu1 (!%p225_p3), %v2269_v1  ;;  %v2275_v5 = vld [vmem:[%s3633_s3 + $0x60] ss:$24 sps:$4 sm:$0xff] (!%p225_p3)   ;;  %p268_p4 = scmp.lt.s32.totalorder (!%p225_p3), %s2106_s7, 63  ;;  %v2276_v6 = vld [vmem:[%s3633_s3 + $0x94] ss:$24 sps:$4 sm:$0xff] (!%p225_p3)   ;;  %v2519_v11 = vshrl.u32 (!%p225_p3), %v363_v8, 7 }
   0x9   : > { %1219 = vmatprep.subr.bf16.mxu0 (!%p225_p3), %v2270_v2  ;;  %2211 = vmatprep.subr.bf16.mxu1 (!%p225_p3), %v2270_v2  ;;  %v2278_v7 = vld [vmem:[%s3633_s3 + $0x90] ss:$24 sps:$4 sm:$0xff] (!%p225_p3)   ;;  %v2279_v9 = vld [vmem:[%s3633_s3 + $0xc4] ss:$24 sps:$4 sm:$0xff] (!%p225_p3)   ;;  %v2281_v10 = vld [vmem:[%s3633_s3 + $0xc0] ss:$24 sps:$4 sm:$0xff] (!%p225_p3)  }
   0xa   : > { %v2282_v12 = vld [vmem:[%s3633_s3 + $0xf4] ss:$24 sps:$4 sm:$0xff] (!%p225_p3)   ;;  %v2284_v13 = vld [vmem:[%s3633_s3 + $0xf0] ss:$24 sps:$4 sm:$0xff] (!%p225_p3)   ;;  %v2533_v14 = vsub.s32 (!%p225_p3), 1, %v2519_v11  ;;  %v2580_v42 = vsub.s32 (!%p225_p3), 0, %v2519_v11 }
   0xb   : > { %v2285_v15 = vld [vmem:[%s3633_s3 + $0x124] ss:$24 sps:$4 sm:$0xff] (!%p225_p3)   ;;  %v361_v18 = vld [vmem:[%s3631_s1] sm:$0x3] (!%p225_p3)  ;;  %v2288_v25 = vld [vmem:[%s3633_s3 + $0x154] ss:$24 sps:$4 sm:$0xff] (!%p225_p3)  }
   0xc   : > { %1220 = vmatpush1.bf16.msra.mxu0 (!%p225_p3), %v2272_v3  ;;  %2227 = vmatpush1.bf16.msra.mxu1 (!%p225_p3), %v2272_v3  ;;  %v437_v19 = vld [vmem:[%s3632_s2] sm:$0x3] (!%p225_p3)  ;;  %v2551_v22 = vrot.slane (!%p225_p3), %v361_v18, %v2533_v14  ;;  %v2290_v30 = vld [vmem:[%s3633_s3 + $0x150] ss:$24 sps:$4 sm:$0xff] (!%p225_p3)   ;;  %v2291_v34 = vld [vmem:[%s3633_s3 + $0x184] ss:$24 sps:$4 sm:$0xff] (!%p225_p3)   ;;  %v2597_v48 = vrot.slane (!%p225_p3), %v361_v18, %v2580_v42 }
   0xd   : > { %1221 = vmatprep.subr.bf16.mxu0 (!%p225_p3), %v2273_v4  ;;  %2212 = vmatprep.subr.bf16.mxu1 (!%p225_p3), %v2273_v4  ;;  %v2287_v21 = vld [vmem:[%s3633_s3 + $0x120] ss:$24 sps:$4 sm:$0xff] (!%p225_p3)   ;;  %v2554_v23 = vrot.slane (!%p225_p3), %v437_v19, %v2533_v14  ;;  %v2294_v43 = vld [vmem:[%s3633_s3 + $0x1b4] ss:$24 sps:$4 sm:$0xff] (!%p225_p3)   ;;  %v2296_v45 = vld [vmem:[%s3633_s3 + $0x1b0] ss:$24 sps:$4 sm:$0xff] (!%p225_p3)   ;;  %v2606_v53 = vrot.slane (!%p225_p3), %v437_v19, %v2580_v42 }
   0xe   : > { %s3641_s7 = smov (!%p268_p4, %s2106_s7), 63  ;;  %v2293_v40 = vld [vmem:[%s3633_s3 + $0x180] ss:$24 sps:$4 sm:$0xff]   ;;  %v2297_v46 = vld [vmem:[%s3633_s3 + $0x1e4] ss:$24 sps:$4 sm:$0xff]  }
   0xf   : > { %s2209_s18 = sshll.u32 %s3641_s7, 4  ;;  %v2299_v50 = vld [vmem:[%s3633_s3 + $0x1e0] ss:$24 sps:$4 sm:$0xff]   ;;  %v2300_v54 = vld [vmem:[%s3633_s3 + $0x214] ss:$24 sps:$4 sm:$0xff]   ;;  %s2242_s17 = smul.u32 48, %s3641_s7 }
  0x10   : > { %1222 = vmatpush1.bf16.msra.mxu0 %v2275_v5  ;;  %2228 = vmatpush1.bf16.msra.mxu1 %v2275_v5  ;;  %s2527_s26 = scalar_lea.vmem %s3630_s0, %s2209_s18  ;;  %v2302_v55 = vld [vmem:[%s3633_s3 + $0x210] ss:$24 sps:$4 sm:$0xff]   ;;  %v2303_v57 = vld [vmem:[%s3633_s3 + $0x244] ss:$24 sps:$4 sm:$0xff]  }
  0x11   : > { %1223 = vmatprep.subr.bf16.mxu0 %v2276_v6  ;;  %2213 = vmatprep.subr.bf16.mxu1 %v2276_v6  ;;  %v298_v16 = vld [vmem:[%s2527_s26 + $0x8] sm:$0xff]  ;;  %v300_v17 = vld [vmem:[%s2527_s26 + $0x18] sm:$0xff]  ;;  %v297_v47 = vld [vmem:[%s2527_s26] sm:$0xff]  ;;  %s3219_s23 = scalar_lea.vmem %s3635_s5, %s2242_s17 }
  0x12   : > { %v330_v20 = vld [vmem:[%s2527_s26 + $0x108] sm:$0xff]  ;;  %v332_v24 = vld [vmem:[%s2527_s26 + $0x118] sm:$0xff]  ;;  %v374_v26 = vmul.f32 %v2551_v22, %v298_v16  ;;  %v376_v27 = vmul.f32 %v2551_v22, %v300_v17  ;;  %v299_v49 = vld [vmem:[%s2527_s26 + $0x10] sm:$0xff]  ;;  %v373_v51 = vmul.f32 %v2597_v48, %v297_v47 }
  0x13   : > { %v406_v28 = vmul.f32 %v2551_v22, %v330_v20  ;;  %v408_v29 = vmul.f32 %v2551_v22, %v332_v24  ;;  %v375_v52 = vmul.f32 %v2597_v48, %v299_v49  ;;  %v329_v56 = vld [vmem:[%s2527_s26 + $0x100] sm:$0xff]  ;;  %v331_v58 = vld [vmem:[%s2527_s26 + $0x110] sm:$0xff]  ;;  %v302_v59 = vld [vmem:[%s2527_s26 + $0x28] sm:$0xff] }
  0x14   : > { %1224 = vmatpush1.bf16.msra.mxu0 %v2278_v7  ;;  %2229 = vmatpush1.bf16.msra.mxu1 %v2278_v7  ;;  %v450_v31 = vadd.f32 %v2554_v23, %v374_v26  ;;  %v452_v32 = vadd.f32 %v2554_v23, %v376_v27  ;;  %v449_v60 = vadd.f32 %v2606_v53, %v373_v51  ;;  %v304_v62 = vld [vmem:[%s2527_s26 + $0x38] sm:$0xff]  ;;  %v334_v0 = vld [vmem:[%s2527_s26 + $0x128] sm:$0xff]  ;;  %v301_v2 = vld [vmem:[%s2527_s26 + $0x20] sm:$0xff] }
  0x15   : > { %1225 = vmatprep.subr.bf16.mxu0 %v2279_v9  ;;  %2214 = vmatprep.subr.bf16.mxu1 %v2279_v9  ;;  %v482_v33 = vadd.f32 %v2554_v23, %v406_v28  ;;  %v484_v35 = vadd.f32 %v2554_v23, %v408_v29  ;;  %v451_v61 = vadd.f32 %v2606_v53, %v375_v52  ;;  %v336_v1 = vld [vmem:[%s2527_s26 + $0x138] sm:$0xff]  ;;  %v303_v4 = vld [vmem:[%s2527_s26 + $0x30] sm:$0xff]  ;;  %v333_v5 = vld [vmem:[%s2527_s26 + $0x120] sm:$0xff] }
  0x16   : > { %v514_v36 = vmax.f32 %v450_v31, 0.0  ;;  %v516_v37 = vmax.f32 %v452_v32, 0.0  ;;  %v405_v63 = vmul.f32 %v2597_v48, %v329_v56  ;;  %v407_v3 = vmul.f32 %v2597_v48, %v331_v58  ;;  %v2305_v6 = vld [vmem:[%s3633_s3 + $0x240] ss:$24 sps:$4 sm:$0xff]   ;;  %v306_v17 = vld [vmem:[%s2527_s26 + $0x48] sm:$0xff] }
  0x17   : > { %v546_v38 = vmax.f32 %v482_v33, 0.0  ;;  %v548_v39 = vmax.f32 %v484_v35, 0.0  ;;  %v513_v7 = vmax.f32 %v449_v60, 0.0  ;;  %v515_v8 = vmax.f32 %v451_v61, 0.0  ;;  %v2308_v18 = vld [vmem:[%s3633_s3 + $0x270] ss:$24 sps:$4 sm:$0xff]  }
  0x18   : > { %1226 = vmatpush1.bf16.msra.mxu0 %v2281_v10  ;;  %2230 = vmatpush1.bf16.msra.mxu1 %v2281_v10  ;;  %v2577_v41 = vpack.c.bf16 %v516_v37, %v514_v36  ;;  %v378_v9 = vmul.f32 %v2551_v22, %v302_v59  ;;  %v335_v10 = vld [vmem:[%s2527_s26 + $0x130] sm:$0xff]  ;;  %v410_v16 = vmul.f32 %v2551_v22, %v334_v0  ;;  %v2309_v26 = vld [vmem:[%s3633_s3 + $0x2a4] ss:$24 sps:$4 sm:$0xff]   ;;  %v338_v29 = vld [vmem:[%s2527_s26 + $0x148] sm:$0xff] }
  0x19   : > { %1227 = vmatprep.subr.bf16.mxu0 %v2282_v12  ;;  %2215 = vmatprep.subr.bf16.mxu1 %v2282_v12  ;;  %v2585_v44 = vpack.c.bf16 %v548_v39, %v546_v38  ;;  %v2306_v12 = vld [vmem:[%s3633_s3 + $0x274] ss:$24 sps:$4 sm:$0xff]   ;;  %v412_v19 = vmul.f32 %v2551_v22, %v336_v1  ;;  %v377_v20 = vmul.f32 %v2597_v48, %v301_v2  ;;  %v340_v33 = vld [vmem:[%s2527_s26 + $0x158] sm:$0xff]  ;;  %v305_v38 = vld [vmem:[%s2527_s26 + $0x40] sm:$0xff] }
  0x1a   : > { %1249 = vmatprep.mubr.bf16.mxu0 %v2577_v41  ;;  %v409_v24 = vmul.f32 %v2597_v48, %v333_v5  ;;  %v2656_v27 = vadd.f32 %v2606_v53, %v407_v3  ;;  %v411_v28 = vmul.f32 %v2597_v48, %v335_v10  ;;  %v2663_v31 = vadd.f32 %v2554_v23, %v378_v9  ;;  %v307_v39 = vld [vmem:[%s2527_s26 + $0x50] sm:$0xff]  ;;  %v310_v1 = vld [vmem:[%s2527_s26 + $0x68] sm:$0xff] }
  0x1b   : > { %1329 = vmatprep.mubr.bf16.mxu1 %v2585_v44  ;;  %v382_v32 = vmul.f32 %v2551_v22, %v306_v17  ;;  %v486_v36 = vadd.f32 %v2554_v23, %v410_v16  ;;  %v414_v51 = vmul.f32 %v2551_v22, %v338_v29  ;;  %v416_v52 = vmul.f32 %v2551_v22, %v340_v33  ;;  %v339_v59 = vld [vmem:[%s2527_s26 + $0x150] sm:$0xff]  ;;  %v2315_v29 = vld [vmem:[%s3633_s3 + $0x8] ss:$24 sps:$4 sm:$0xff]  }
  0x1c   : > { %1228 = vmatpush1.bf16.msra.mxu0 %v2284_v13  ;;  %2231 = vmatpush1.bf16.msra.mxu1 %v2284_v13  ;;  %v2639_v13 = vadd.f32 %v2606_v53, %v405_v63  ;;  %v485_v47 = vadd.f32 %v2606_v53, %v409_v24  ;;  %v547_v49 = vmax.f32 %v2656_v27, 0.0  ;;  %v383_v58 = vmul.f32 %v2597_v48, %v307_v39  ;;  %v2312_v60 = vld [vmem:[%s3633_s3 + $0x2d4] ss:$24 sps:$4 sm:$0xff]  }
  0x1d   : > { %1229 = vmatprep.subr.bf16.mxu0 %v2285_v15  ;;  %2216 = vmatprep.subr.bf16.mxu1 %v2285_v15  ;;  %v380_v15 = vmul.f32 %v2551_v22, %v304_v62  ;;  %v458_v56 = vadd.f32 %v2554_v23, %v382_v32  ;;  %v550_v62 = vmax.f32 %v486_v36, 0.0  ;;  %v490_v9 = vadd.f32 %v2554_v23, %v414_v51  ;;  %v2326_v36 = vld [vmem:[%s3633_s3 + $0x44] ss:$24 sps:$4 sm:$0xff]  }
  0x1e   : > { %v549_v5 = vmax.f32 %v485_v47, 0.0  ;;  %v492_v10 = vadd.f32 %v2554_v23, %v416_v52 }
  0x1f   : > { %v456_v35 = vadd.f32 %v2554_v23, %v380_v15  ;;  %v2314_v15 = vld [vmem:[%s3633_s3 + $0x2d0] ss:$24 sps:$4 sm:$0xff]   ;;  %v522_v16 = vmax.f32 %v458_v56, 0.0 }
  0x20   : > { %1230 = vmatpush1.bf16.msra.mxu0 %v2287_v21  ;;  %2232 = vmatpush1.bf16.msra.mxu1 %v2287_v21  ;;  %v379_v21 = vmul.f32 %v2597_v48, %v303_v4  ;;  %v556_v39 = vmax.f32 %v492_v10, 0.0  ;;  %v318_v56 = vld [vmem:[%s2527_s26 + $0xa8] sm:$0xff] }
  0x21   : > { %1231 = vmatprep.subr.bf16.mxu0 %v2288_v25  ;;  %2217 = vmatprep.subr.bf16.mxu1 %v2288_v25  ;;  %v308_v25 = vld [vmem:[%s2527_s26 + $0x58] sm:$0xff]  ;;  %v520_v61 = vmax.f32 %v456_v35, 0.0 }
  0x22   : > { %v384_v37 = vmul.f32 %v2551_v22, %v308_v25 }
  0x24   : > { %1232 = vmatpush1.bf16.msra.mxu0 %v2290_v30  ;;  %2233 = vmatpush1.bf16.msra.mxu1 %v2290_v30  ;;  %v2660_v30 = vpack.c.bf16 %v515_v8, %v513_v7  ;;  %v460_v63 = vadd.f32 %v2554_v23, %v384_v37  ;;  %v342_v7 = vld [vmem:[%s2527_s26 + $0x168] sm:$0xff] }
  0x25   : > { %1233 = vmatprep.subr.bf16.mxu0 %v2291_v34  ;;  %2218 = vmatprep.subr.bf16.mxu1 %v2291_v34  ;;  %v545_v34 = vmax.f32 %v2639_v13, 0.0  ;;  %v344_v13 = vld [vmem:[%s2527_s26 + $0x178] sm:$0xff]  ;;  %v418_v27 = vmul.f32 %v2551_v22, %v342_v7  ;;  %v2329_v7 = vld [vmem:[%s3633_s3 + $0x6c] ss:$24 sps:$4 sm:$0xff]  }
  0x26   : > { %v524_v24 = vmax.f32 %v460_v63, 0.0  ;;  %v420_v35 = vmul.f32 %v2551_v22, %v344_v13  ;;  %v352_v63 = vld [vmem:[%s2527_s26 + $0x1b8] sm:$0xff] }
  0x28   : > { %1234 = vmatpush1.bf16.msra.mxu0 %v2293_v40  ;;  %2234 = vmatpush1.bf16.msra.mxu1 %v2293_v40  ;;  %v337_v40 = vld [vmem:[%s2527_s26 + $0x140] sm:$0xff]  ;;  %v2754_v51 = vpack.c.bf16 %v524_v24, %v522_v16  ;;  %v343_v16 = vld [vmem:[%s2527_s26 + $0x170] sm:$0xff] }
  0x29   : > { %1235 = vmatprep.subr.bf16.mxu0 %v2294_v43  ;;  %2219 = vmatprep.subr.bf16.mxu1 %v2294_v43  ;;  %v488_v43 = vadd.f32 %v2554_v23, %v412_v19  ;;  %v413_v0 = vmul.f32 %v2597_v48, %v337_v40  ;;  %v386_v19 = vmul.f32 %v2551_v22, %v310_v1  ;;  %v2321_v1 = vld [vmem:[%s3633_s3 + $0x38] ss:$24 sps:$4 sm:$0xff]  }
  0x2b   : > { %v552_v2 = vmax.f32 %v488_v43, 0.0  ;;  %v2719_v25 = vadd.f32 %v2606_v53, %v413_v0  ;;  %v2750_v47 = vadd.f32 %v2554_v23, %v386_v19 }
  0x2c   : > { %1236 = vmatpush1.bf16.msra.mxu0 %v2296_v45  ;;  %2235 = vmatpush1.bf16.msra.mxu1 %v2296_v45  ;;  %v453_v45 = vadd.f32 %v2606_v53, %v377_v20  ;;  %v2317_v20 = vld [vmem:[%s3633_s3 + $0xc] ss:$24 sps:$4 sm:$0xff]  }
  0x2d   : > { %1237 = vmatprep.subr.bf16.mxu0 %v2297_v46  ;;  %2220 = vmatprep.subr.bf16.mxu1 %v2297_v46  ;;  %v455_v46 = vadd.f32 %v2606_v53, %v379_v21  ;;  %v2320_v21 = vld [vmem:[%s3633_s3 + $0x14] ss:$24 sps:$4 sm:$0xff]   ;;  %v2733_v33 = vpack.c.bf16 %v552_v2, %v550_v62  ;;  %v553_v52 = vmax.f32 %v2719_v25, 0.0  ;;  %v2324_v2 = vld [vmem:[%s3633_s3 + $0x40] ss:$24 sps:$4 sm:$0xff]  }
  0x2e   : > { %v517_v3 = vmax.f32 %v453_v45, 0.0 }
  0x2f   : > { %v519_v4 = vmax.f32 %v455_v46, 0.0 }
  0x30   : > { %1238 = vmatpush1.bf16.msra.mxu0 %v2299_v50  ;;  %2236 = vmatpush1.bf16.msra.mxu1 %v2299_v50  ;;  %v487_v50 = vadd.f32 %v2606_v53, %v411_v28  ;;  %v2723_v28 = vpack.c.bf16 %v547_v49, %v545_v34  ;;  %v2323_v34 = vld [vmem:[%s3633_s3 + $0x3c] ss:$24 sps:$4 sm:$0xff]   ;;  %v309_v49 = vld [vmem:[%s2527_s26 + $0x60] sm:$0xff] }
  0x31   : > { %1239 = vmatprep.subr.bf16.mxu0 %v2300_v54  ;;  %2221 = vmatprep.subr.bf16.mxu1 %v2300_v54  ;;  %v2311_v54 = vld [vmem:[%s3633_s3 + $0x2a0] ss:$24 sps:$4 sm:$0xff]   ;;  %v2742_v37 = vpack.c.bf16 %v519_v4, %v517_v3 }
  0x32   : > { %v551_v8 = vmax.f32 %v487_v50, 0.0  ;;  %v311_v50 = vld [vmem:[%s2527_s26 + $0x70] sm:$0xff] }
  0x33   : > { %v387_v10 = vmul.f32 %v2597_v48, %v311_v50  ;;  %v316_v50 = vld [vmem:[%s2527_s26 + $0x98] sm:$0xff] }
  0x34   : > { %1240 = vmatpush1.bf16.msra.mxu0 %v2302_v55  ;;  %2237 = vmatpush1.bf16.msra.mxu1 %v2302_v55  ;;  %v518_v55 = vmax.f32 %v2663_v31, 0.0  ;;  %v2318_v31 = vld [vmem:[%s3633_s3 + $0x10] ss:$24 sps:$4 sm:$0xff]   ;;  %v2745_v43 = vpack.c.bf16 %v551_v8, %v549_v5  ;;  %v385_v5 = vmul.f32 %v2597_v48, %v309_v49  ;;  %v2332_v8 = vld [vmem:[%s3633_s3 + $0x74] ss:$24 sps:$4 sm:$0xff]   ;;  %v419_v49 = vmul.f32 %v2597_v48, %v343_v16 }
  0x35   : > { %1241 = vmatprep.subr.bf16.mxu0 %v2303_v57  ;;  %2222 = vmatprep.subr.bf16.mxu1 %v2303_v57  ;;  %v381_v57 = vmul.f32 %v2597_v48, %v305_v38  ;;  %v554_v38 = vmax.f32 %v490_v9, 0.0  ;;  %v526_v9 = vmax.f32 %v2750_v47, 0.0  ;;  %v315_v16 = vld [vmem:[%s2527_s26 + $0x90] sm:$0xff] }
  0x36   : > { %v2731_v32 = vpack.c.bf16 %v520_v61, %v518_v55  ;;  %v2759_v55 = vadd.f32 %v2554_v23, %v418_v27  ;;  %v394_v61 = vmul.f32 %v2551_v22, %v318_v56  ;;  %v2333_v56 = vld [vmem:[%s3633_s3 + $0x98] ss:$24 sps:$4 sm:$0xff]  }
  0x37   : > { %v2706_v17 = vadd.f32 %v2606_v53, %v381_v57  ;;  %v320_v57 = vld [vmem:[%s2527_s26 + $0xb8] sm:$0xff]  ;;  %v2778_v3 = vpack.c.bf16 %v556_v39, %v554_v38  ;;  %v2816_v39 = vadd.f32 %v2606_v53, %v385_v5 }
  0x38   : > { %1242 = vmatpush1.bf16.msra.mxu0 %v2305_v6  ;;  %2238 = vmatpush1.bf16.msra.mxu1 %v2305_v6  ;;  %v312_v6 = vld [vmem:[%s2527_s26 + $0x78] sm:$0xff]  ;;  %v396_v62 = vmul.f32 %v2551_v22, %v320_v57  ;;  %v558_v24 = vmax.f32 %v2759_v55, 0.0 }
  0x39   : > { %1243 = vmatprep.subr.bf16.mxu0 %v2306_v12  ;;  %2223 = vmatprep.subr.bf16.mxu1 %v2306_v12  ;;  %v415_v12 = vmul.f32 %v2597_v48, %v339_v59  ;;  %v521_v45 = vmax.f32 %v2706_v17, 0.0  ;;  %v496_v59 = vadd.f32 %v2554_v23, %v420_v35  ;;  %v2338_v38 = vld [vmem:[%s3633_s3 + $0xa4] ss:$24 sps:$4 sm:$0xff]   ;;  %v2336_v57 = vld [vmem:[%s3633_s3 + $0xa0] ss:$24 sps:$4 sm:$0xff]  }
  0x3a   : > { %v472_v13 = vadd.f32 %v2554_v23, %v396_v62  ;;  %v324_v55 = vld [vmem:[%s2527_s26 + $0xd8] sm:$0xff] }
  0x3b   : > { %v491_v40 = vadd.f32 %v2606_v53, %v415_v12  ;;  %v470_v12 = vadd.f32 %v2554_v23, %v394_v61  ;;  %v560_v25 = vmax.f32 %v496_v59, 0.0  ;;  %v400_v62 = vmul.f32 %v2551_v22, %v324_v55  ;;  %v348_v5 = vld [vmem:[%s2527_s26 + $0x198] sm:$0xff] }
  0x3c   : > { %1244 = vmatpush1.bf16.msra.mxu0 %v2308_v18  ;;  %2239 = vmatpush1.bf16.msra.mxu1 %v2308_v18  ;;  %v2709_v18 = vadd.f32 %v2606_v53, %v383_v58  ;;  %v350_v58 = vld [vmem:[%s2527_s26 + $0x1a8] sm:$0xff]  ;;  %v536_v27 = vmax.f32 %v472_v13, 0.0  ;;  %v525_v13 = vmax.f32 %v2816_v39, 0.0  ;;  %v2362_v39 = vld [vmem:[%s3633_s3 + $0x164] ss:$24 sps:$4 sm:$0xff]  }
  0x3d   : > { %1245 = vmatprep.subr.bf16.mxu0 %v2309_v26  ;;  %2224 = vmatprep.subr.bf16.mxu1 %v2309_v26  ;;  %v388_v26 = vmul.f32 %v2551_v22, %v312_v6  ;;  %v426_v0 = vmul.f32 %v2551_v22, %v350_v58  ;;  %v555_v4 = vmax.f32 %v491_v40, 0.0  ;;  %v428_v6 = vmul.f32 %v2551_v22, %v352_v63  ;;  %v354_v63 = vld [vmem:[%s2527_s26 + $0x1c8] sm:$0xff] }
  0x3e   : > { %v523_v46 = vmax.f32 %v2709_v18, 0.0  ;;  %v2819_v40 = vadd.f32 %v2606_v53, %v387_v10  ;;  %v2838_v58 = vpack.c.bf16 %v560_v25, %v558_v24  ;;  %v345_v24 = vld [vmem:[%s2527_s26 + $0x180] sm:$0xff] }
  0x3f   : > { %v502_v18 = vadd.f32 %v2554_v23, %v426_v0  ;;  %v504_v19 = vadd.f32 %v2554_v23, %v428_v6  ;;  %v2810_v35 = vpack.c.bf16 %v555_v4, %v553_v52  ;;  %v356_v0 = vld [vmem:[%s2527_s26 + $0x1d8] sm:$0xff]  ;;  %v430_v6 = vmul.f32 %v2551_v22, %v354_v63  ;;  %v326_v63 = vld [vmem:[%s2527_s26 + $0xe8] sm:$0xff] }
  0x40   : > { %1246 = vmatpush1.bf16.msra.mxu0 %v2311_v54  ;;  %2240 = vmatpush1.bf16.msra.mxu1 %v2311_v54  ;;  %v464_v54 = vadd.f32 %v2554_v23, %v388_v26  ;;  %v534_v26 = vmax.f32 %v470_v12, 0.0  ;;  %v476_v12 = vadd.f32 %v2554_v23, %v400_v62 }
  0x41   : > { %1247 = vmatprep.subr.bf16.mxu0 %v2312_v60  ;;  %2225 = vmatprep.subr.bf16.mxu1 %v2312_v60  ;;  %v341_v60 = vld [vmem:[%s2527_s26 + $0x160] sm:$0xff] }
  0x42   : > { %v417_v17 = vmul.f32 %v2597_v48, %v341_v60  ;;  %v346_v60 = vld [vmem:[%s2527_s26 + $0x188] sm:$0xff] }
  0x44   : > { %1248 = vmatpush1.bf16.msra.mxu0 %v2314_v15  ;;  %2241 = vmatpush1.bf16.msra.mxu1 %v2314_v15  ;;  %v528_v15 = vmax.f32 %v464_v54, 0.0  ;;  %v322_v54 = vld [vmem:[%s2527_s26 + $0xc8] sm:$0xff]  ;;  %v2841_v59 = vadd.f32 %v2606_v53, %v417_v17  ;;  %v506_v17 = vadd.f32 %v2554_v23, %v430_v6 }
  0x45   : > { %1410 = vmatprep.subr.bf16.mxu1 %v2317_v20  ;;  %1603 = vmatprep.subr.bf16.mxu0 %v2320_v21  ;;  %v2327_v20 = vld [vmem:[%s3633_s3 + $0x68] ss:$24 sps:$4 sm:$0xff]   ;;  %v398_v61 = vmul.f32 %v2551_v22, %v322_v54  ;;  %v391_v54 = vmul.f32 %v2597_v48, %v315_v16 }
  0x46   : > { %v2330_v21 = vld [vmem:[%s3633_s3 + $0x70] ss:$24 sps:$4 sm:$0xff]   ;;  %v2824_v47 = vpack.c.bf16 %v528_v15, %v526_v9  ;;  %v313_v9 = vld [vmem:[%s2527_s26 + $0x80] sm:$0xff]  ;;  %v422_v15 = vmul.f32 %v2551_v22, %v346_v60 }
  0x47   : > { %1250 = vmatmul.mubr.bf16.vlgmr.msra.gmra.mrb[0].mxu0 %v2660_v30  ;;  %1330 = vmatmul.mubr.bf16.vlgmr.msra.gmra.mrb[0].mxu1 %v2723_v28  ;;  %v474_v10 = vadd.f32 %v2554_v23, %v398_v61  ;;  %v421_v61 = vmul.f32 %v2597_v48, %v345_v24  ;;  %v358_v6 = vld [vmem:[%s2527_s26 + $0x1e8] sm:$0xff] }
  0x48   : > { %1411 = vmatpush1.bf16.msra.mxu1 %v2315_v29  ;;  %1604 = vmatpush1.bf16.msra.mxu0 %v2318_v31  ;;  %v2335_v29 = vld [vmem:[%s3633_s3 + $0x9c] ss:$24 sps:$4 sm:$0xff]   ;;  %v2808_v31 = vpack.c.bf16 %v523_v46, %v521_v45  ;;  %v314_v45 = vld [vmem:[%s2527_s26 + $0x88] sm:$0xff]  ;;  %v2822_v46 = vpack.c.bf16 %v536_v27, %v534_v26  ;;  %v540_v26 = vmax.f32 %v476_v12, 0.0  ;;  %v498_v60 = vadd.f32 %v2554_v23, %v422_v15  ;;  %v2348_v15 = vld [vmem:[%s3633_s3 + $0x100] ss:$24 sps:$4 sm:$0xff]  }
  0x49   : > { %1412 = vmatprep.subr.bf16.mxu1 %v2323_v34  ;;  %1605 = vmatprep.subr.bf16.mxu0 %v2326_v36  ;;  %v566_v34 = vmax.f32 %v502_v18, 0.0  ;;  %v568_v36 = vmax.f32 %v504_v19, 0.0  ;;  %v390_v4 = vmul.f32 %v2551_v22, %v314_v45  ;;  %v2339_v19 = vld [vmem:[%s3633_s3 + $0xc8] ss:$24 sps:$4 sm:$0xff]   ;;  %v538_v25 = vmax.f32 %v474_v10, 0.0 }
  0x4a   : > { %1259 = vmatprep.mubr.bf16.mxu0 %v2731_v32  ;;  %1339 = vmatprep.mubr.bf16.mxu1 %v2733_v33  ;;  %v2342_v45 = vld [vmem:[%s3633_s3 + $0xd0] ss:$24 sps:$4 sm:$0xff]   ;;  %v434_v12 = vmul.f32 %v2551_v22, %v358_v6  ;;  %v562_v24 = vmax.f32 %v498_v60, 0.0  ;;  %v349_v60 = vld [vmem:[%s2527_s26 + $0x1a0] sm:$0xff] }
  0x4b   : > { %v2828_v52 = vpack.c.bf16 %v568_v36, %v566_v34  ;;  %v2880_v27 = vadd.f32 %v2554_v23, %v390_v4  ;;  %v347_v34 = vld [vmem:[%s2527_s26 + $0x190] sm:$0xff]  ;;  %v570_v36 = vmax.f32 %v506_v17, 0.0  ;;  %v2892_v55 = vpack.c.bf16 %v540_v26, %v538_v25  ;;  %v328_v4 = vld [vmem:[%s2527_s26 + $0xf8] sm:$0xff] }
  0x4c   : > { %1413 = vmatpush1.bf16.msra.mxu1 %v2321_v1  ;;  %1606 = vmatpush1.bf16.msra.mxu0 %v2324_v2  ;;  %v2341_v1 = vld [vmem:[%s3633_s3 + $0xcc] ss:$24 sps:$4 sm:$0xff]   ;;  %v404_v10 = vmul.f32 %v2551_v22, %v328_v4  ;;  %v467_v17 = vadd.f32 %v2606_v53, %v391_v54  ;;  %v497_v25 = vadd.f32 %v2606_v53, %v421_v61  ;;  %v351_v4 = vld [vmem:[%s2527_s26 + $0x1b0] sm:$0xff] }
  0x4d   : > { %1414 = vmatprep.subr.bf16.mxu1 %v2329_v7  ;;  %1607 = vmatprep.subr.bf16.mxu0 %v2332_v8  ;;  %v2344_v2 = vld [vmem:[%s3633_s3 + $0xd4] ss:$24 sps:$4 sm:$0xff]   ;;  %v432_v7 = vmul.f32 %v2551_v22, %v356_v0  ;;  %v392_v8 = vmul.f32 %v2551_v22, %v316_v50 }
  0x4e   : > { %v480_v26 = vadd.f32 %v2554_v23, %v404_v10  ;;  %v427_v10 = vmul.f32 %v2597_v48, %v351_v4 }
  0x4f   : > { %1260 = vmatmul.mubr.bf16.gmra.mrb[4].mxu0 %v2742_v37  ;;  %1340 = vmatmul.mubr.bf16.gmra.mrb[4].mxu1 %v2745_v43  ;;  %v508_v18 = vadd.f32 %v2554_v23, %v432_v7  ;;  %v2889_v50 = vadd.f32 %v2554_v23, %v392_v8  ;;  %v360_v7 = vld [vmem:[%s2527_s26 + $0x1f8] sm:$0xff]  ;;  %v530_v8 = vmax.f32 %v2880_v27, 0.0  ;;  %v510_v27 = vadd.f32 %v2554_v23, %v434_v12 }
  0x50   : > { %1415 = vmatpush1.bf16.msra.mxu1 %v2327_v20  ;;  %1608 = vmatpush1.bf16.msra.mxu0 %v2330_v21  ;;  %v2875_v20 = vadd.f32 %v2606_v53, %v419_v49  ;;  %v424_v21 = vmul.f32 %v2551_v22, %v348_v5  ;;  %v527_v49 = vmax.f32 %v2819_v40, 0.0  ;;  %v2350_v40 = vld [vmem:[%s3633_s3 + $0x104] ss:$24 sps:$4 sm:$0xff]   ;;  %v402_v5 = vmul.f32 %v2551_v22, %v326_v63  ;;  %v2357_v12 = vld [vmem:[%s3633_s3 + $0x158] ss:$24 sps:$4 sm:$0xff]  }
  0x51   : > { %1416 = vmatprep.subr.bf16.mxu1 %v2335_v29  ;;  %1609 = vmatprep.subr.bf16.mxu0 %v2338_v38  ;;  %v389_v29 = vmul.f32 %v2597_v48, %v313_v9  ;;  %v572_v38 = vmax.f32 %v508_v18, 0.0  ;;  %v532_v16 = vmax.f32 %v2889_v50, 0.0  ;;  %v544_v61 = vmax.f32 %v480_v26, 0.0 }
  0x52   : > { %1269 = vmatprep.mubr.bf16.mxu0 %v2754_v51  ;;  %1349 = vmatprep.mubr.bf16.mxu1 %v2778_v3  ;;  %v559_v0 = vmax.f32 %v2875_v20, 0.0  ;;  %v478_v18 = vadd.f32 %v2554_v23, %v402_v5  ;;  %v436_v20 = vmul.f32 %v2551_v22, %v360_v7  ;;  %v2351_v22 = vld [vmem:[%s3633_s3 + $0x128] ss:$24 sps:$4 sm:$0xff]   ;;  %v574_v63 = vmax.f32 %v510_v27, 0.0  ;;  %v323_v27 = vld [vmem:[%s2527_s26 + $0xd0] sm:$0xff] }
  0x53   : > { %v2903_v62 = vpack.c.bf16 %v572_v38, %v570_v36  ;;  %v2920_v9 = vadd.f32 %v2606_v53, %v389_v29  ;;  %v2354_v29 = vld [vmem:[%s3633_s3 + $0x130] ss:$24 sps:$4 sm:$0xff]   ;;  %v317_v38 = vld [vmem:[%s2527_s26 + $0xa0] sm:$0xff]  ;;  %v503_v26 = vadd.f32 %v2606_v53, %v427_v10 }
  0x54   : > { %1417 = vmatpush1.bf16.msra.mxu1 %v2333_v56  ;;  %1610 = vmatpush1.bf16.msra.mxu0 %v2336_v57  ;;  %v2347_v56 = vld [vmem:[%s3633_s3 + $0xfc] ss:$24 sps:$4 sm:$0xff]   ;;  %v557_v57 = vmax.f32 %v2841_v59, 0.0  ;;  %v2345_v59 = vld [vmem:[%s3633_s3 + $0xf8] ss:$24 sps:$4 sm:$0xff]   ;;  %v542_v50 = vmax.f32 %v478_v18, 0.0  ;;  %v512_v54 = vadd.f32 %v2554_v23, %v436_v20  ;;  %v393_v7 = vmul.f32 %v2597_v48, %v317_v38 }
  0x55   : > { %1418 = vmatprep.subr.bf16.mxu1 %v2341_v1  ;;  %1611 = vmatprep.subr.bf16.mxu0 %v2344_v2  ;;  %v500_v1 = vadd.f32 %v2554_v23, %v424_v21  ;;  %v423_v2 = vmul.f32 %v2597_v48, %v347_v34  ;;  %v2356_v21 = vld [vmem:[%s3633_s3 + $0x134] ss:$24 sps:$4 sm:$0xff]  }
  0x56   : > { %v2359_v23 = vld [vmem:[%s3633_s3 + $0x15c] ss:$24 sps:$4 sm:$0xff]  }
  0x57   : > { %1270 = vmatmul.mubr.bf16.gmra.mrb[8].mxu0 %v2808_v31  ;;  %1350 = vmatmul.mubr.bf16.gmra.mrb[8].mxu1 %v2810_v35  ;;  %v564_v34 = vmax.f32 %v500_v1, 0.0  ;;  %v499_v36 = vadd.f32 %v2606_v53, %v423_v2  ;;  %v529_v1 = vmax.f32 %v2920_v9, 0.0  ;;  %v576_v2 = vmax.f32 %v512_v54, 0.0  ;;  %v2371_v38 = vld [vmem:[%s3633_s3 + $0x1bc] ss:$24 sps:$4 sm:$0xff]  }
  0x58   : > { %1419 = vmatpush1.bf16.msra.mxu1 %v2339_v19  ;;  %1612 = vmatpush1.bf16.msra.mxu0 %v2342_v45  ;;  %v2353_v19 = vld [vmem:[%s3633_s3 + $0x12c] ss:$24 sps:$4 sm:$0xff]   ;;  %v319_v45 = vld [vmem:[%s2527_s26 + $0xb0] sm:$0xff]  ;;  %v399_v54 = vmul.f32 %v2597_v48, %v323_v27 }
  0x59   : > { %1420 = vmatprep.subr.bf16.mxu1 %v2347_v56  ;;  %1613 = vmatprep.subr.bf16.mxu0 %v2350_v40  ;;  %v2954_v56 = vpack.c.bf16 %v527_v49, %v525_v13  ;;  %v2956_v40 = vpack.c.bf16 %v559_v0, %v557_v57  ;;  %v2967_v13 = vpack.c.bf16 %v532_v16, %v530_v8  ;;  %v531_v49 = vmax.f32 %v467_v17, 0.0  ;;  %v2365_v16 = vld [vmem:[%s3633_s3 + $0x18c] ss:$24 sps:$4 sm:$0xff]  }
  0x5a   : > { %1279 = vmatprep.mubr.bf16.mxu0 %v2824_v47  ;;  %1359 = vmatprep.mubr.bf16.mxu1 %v2838_v58  ;;  %v561_v57 = vmax.f32 %v497_v25, 0.0  ;;  %v2969_v0 = vpack.c.bf16 %v544_v61, %v542_v50  ;;  %v2971_v5 = vpack.c.bf16 %v564_v34, %v562_v24  ;;  %v563_v6 = vmax.f32 %v499_v36, 0.0  ;;  %v2368_v17 = vld [vmem:[%s3633_s3 + $0x194] ss:$24 sps:$4 sm:$0xff]   ;;  %v2363_v34 = vld [vmem:[%s3633_s3 + $0x188] ss:$24 sps:$4 sm:$0xff]  }
  0x5b   : > { %v395_v9 = vmul.f32 %v2597_v48, %v319_v45  ;;  %v425_v8 = vmul.f32 %v2597_v48, %v349_v60  ;;  %v2995_v18 = vpack.c.bf16 %v531_v49, %v529_v1  ;;  %v2366_v36 = vld [vmem:[%s3633_s3 + $0x190] ss:$24 sps:$4 sm:$0xff]   ;;  %v2374_v45 = vld [vmem:[%s3633_s3 + $0x1c4] ss:$24 sps:$4 sm:$0xff]  }
  0x5c   : > { %1421 = vmatpush1.bf16.msra.mxu1 %v2345_v59  ;;  %1614 = vmatpush1.bf16.msra.mxu0 %v2348_v15  ;;  %v2974_v59 = vpack.c.bf16 %v576_v2, %v574_v63  ;;  %v2360_v15 = vld [vmem:[%s3633_s3 + $0x160] ss:$24 sps:$4 sm:$0xff]   ;;  %v2997_v20 = vpack.c.bf16 %v563_v6, %v561_v57  ;;  %v567_v2 = vmax.f32 %v503_v26, 0.0  ;;  %v2377_v49 = vld [vmem:[%s3633_s3 + $0x1ec] ss:$24 sps:$4 sm:$0xff]  }
  0x5d   : > { %1422 = vmatprep.subr.bf16.mxu1 %v2353_v19  ;;  %1615 = vmatprep.subr.bf16.mxu0 %v2356_v21  ;;  %v321_v19 = vld [vmem:[%s2527_s26 + $0xc0] sm:$0xff]  ;;  %v469_v21 = vadd.f32 %v2606_v53, %v393_v7  ;;  %v471_v24 = vadd.f32 %v2606_v53, %v395_v9  ;;  %v501_v25 = vadd.f32 %v2606_v53, %v425_v8  ;;  %v2380_v57 = vld [vmem:[%s3633_s3 + $0x1f4] ss:$24 sps:$4 sm:$0xff]  }
  0x5e   : > { %v397_v50 = vmul.f32 %v2597_v48, %v321_v19  ;;  %v475_v7 = vadd.f32 %v2606_v53, %v399_v54  ;;  %v327_v19 = vld [vmem:[%s2527_s26 + $0xf0] sm:$0xff]  ;;  %v2386_v26 = vld [vmem:[%s3633_s3 + $0x224] ss:$24 sps:$4 sm:$0xff]  }
  0x5f   : > { %1280 = vmatmul.mubr.bf16.gmra.mrb[12].mxu0 %v2954_v56  ;;  %1360 = vmatmul.mubr.bf16.gmra.mrb[12].mxu1 %v2956_v40  ;;  %v533_v63 = vmax.f32 %v469_v21, 0.0  ;;  %v535_v1 = vmax.f32 %v471_v24, 0.0  ;;  %v565_v4 = vmax.f32 %v501_v25, 0.0  ;;  %v357_v21 = vld [vmem:[%s2527_s26 + $0x1e0] sm:$0xff]  ;;  %v359_v24 = vld [vmem:[%s2527_s26 + $0x1f0] sm:$0xff] }
  0x60   : > { %1423 = vmatpush1.bf16.msra.mxu1 %v2351_v22  ;;  %1616 = vmatpush1.bf16.msra.mxu0 %v2354_v29  ;;  %v353_v22 = vld [vmem:[%s2527_s26 + $0x1c0] sm:$0xff]  ;;  %v355_v29 = vld [vmem:[%s2527_s26 + $0x1d0] sm:$0xff]  ;;  %v473_v6 = vadd.f32 %v2606_v53, %v397_v50  ;;  %v435_v50 = vmul.f32 %v2597_v48, %v359_v24 }
  0x61   : > { %1424 = vmatprep.subr.bf16.mxu1 %v2359_v23  ;;  %1617 = vmatprep.subr.bf16.mxu0 %v2362_v39  ;;  %v429_v60 = vmul.f32 %v2597_v48, %v353_v22  ;;  %v431_v61 = vmul.f32 %v2597_v48, %v355_v29  ;;  %v2369_v23 = vld [vmem:[%s3633_s3 + $0x1b8] ss:$24 sps:$4 sm:$0xff]   ;;  %v3043_v10 = vpack.c.bf16 %v535_v1, %v533_v63  ;;  %v2383_v25 = vld [vmem:[%s3633_s3 + $0x21c] ss:$24 sps:$4 sm:$0xff]   ;;  %v539_v22 = vmax.f32 %v475_v7, 0.0 }
  0x62   : > { %1289 = vmatprep.mubr.bf16.mxu0 %v2967_v13  ;;  %1369 = vmatprep.mubr.bf16.mxu1 %v2971_v5  ;;  %v2372_v39 = vld [vmem:[%s3633_s3 + $0x1c0] ss:$24 sps:$4 sm:$0xff]   ;;  %v537_v27 = vmax.f32 %v473_v6, 0.0  ;;  %v2395_v6 = vld [vmem:[%s3633_s3 + $0x27c] ss:$24 sps:$4 sm:$0xff]  }
  0x63   : > { %v505_v9 = vadd.f32 %v2606_v53, %v429_v60  ;;  %v507_v8 = vadd.f32 %v2606_v53, %v431_v61  ;;  %v2381_v54 = vld [vmem:[%s3633_s3 + $0x218] ss:$24 sps:$4 sm:$0xff]   ;;  %v2389_v61 = vld [vmem:[%s3633_s3 + $0x24c] ss:$24 sps:$4 sm:$0xff]  }
  0x64   : > { %1425 = vmatpush1.bf16.msra.mxu1 %v2357_v12  ;;  %1618 = vmatpush1.bf16.msra.mxu0 %v2360_v15  ;;  %v3045_v12 = vpack.c.bf16 %v567_v2, %v565_v4  ;;  %v2375_v15 = vld [vmem:[%s3633_s3 + $0x1e8] ss:$24 sps:$4 sm:$0xff]   ;;  %v3083_v63 = vpack.c.bf16 %v539_v22, %v537_v27  ;;  %v2407_v22 = vld [vmem:[%s3633_s3 + $0x2dc] ss:$24 sps:$4 sm:$0xff]  }
  0x65   : > { %1426 = vmatprep.subr.bf16.mxu1 %v2365_v16  ;;  %1619 = vmatprep.subr.bf16.mxu0 %v2368_v17  ;;  %v2378_v16 = vld [vmem:[%s3633_s3 + $0x1f0] ss:$24 sps:$4 sm:$0xff]   ;;  %v325_v17 = vld [vmem:[%s2527_s26 + $0xe0] sm:$0xff]  ;;  %v569_v29 = vmax.f32 %v505_v9, 0.0 }
  0x66   : > { %v2384_v60 = vld [vmem:[%s3633_s3 + $0x220] ss:$24 sps:$4 sm:$0xff]   ;;  %v2402_v27 = vld [vmem:[%s3633_s3 + $0x2b0] ss:$24 sps:$4 sm:$0xff]  }
  0x67   : > { %1290 = vmatmul.mubr.bf16.gmra.mrb[16].mxu0 %v2995_v18  ;;  %1370 = vmatmul.mubr.bf16.gmra.mrb[16].mxu1 %v2997_v20 }
  0x68   : > { %1427 = vmatpush1.bf16.msra.mxu1 %v2363_v34  ;;  %1620 = vmatpush1.bf16.msra.mxu0 %v2366_v36  ;;  %v571_v34 = vmax.f32 %v507_v8, 0.0  ;;  %v401_v36 = vmul.f32 %v2597_v48, %v325_v17  ;;  %v2396_v17 = vld [vmem:[%s3633_s3 + $0x280] ss:$24 sps:$4 sm:$0xff]  }
  0x69   : > { %1428 = vmatprep.subr.bf16.mxu1 %v2371_v38  ;;  %1621 = vmatprep.subr.bf16.mxu0 %v2374_v45  ;;  %v403_v38 = vmul.f32 %v2597_v48, %v327_v19  ;;  %v433_v45 = vmul.f32 %v2597_v48, %v357_v21  ;;  %v2392_v48 = vld [vmem:[%s3633_s3 + $0x254] ss:$24 sps:$4 sm:$0xff]  }
  0x6a   : > { %1299 = vmatprep.mubr.bf16.mxu0 %v2822_v46  ;;  %1379 = vmatprep.mubr.bf16.mxu1 %v2828_v52  ;;  %v3085_v1 = vpack.c.bf16 %v571_v34, %v569_v29  ;;  %v477_v4 = vadd.f32 %v2606_v53, %v401_v36  ;;  %v2401_v19 = vld [vmem:[%s3633_s3 + $0x2ac] ss:$24 sps:$4 sm:$0xff]   ;;  %v2405_v34 = vld [vmem:[%s3633_s3 + $0x2d8] ss:$24 sps:$4 sm:$0xff]  }
  0x6b   : > { %v479_v2 = vadd.f32 %v2606_v53, %v403_v38  ;;  %v2404_v21 = vld [vmem:[%s3633_s3 + $0x2b4] ss:$24 sps:$4 sm:$0xff]   ;;  %v2410_v29 = vld [vmem:[%s3633_s3 + $0x2e4] ss:$24 sps:$4 sm:$0xff]   ;;  %v2408_v36 = vld [vmem:[%s3633_s3 + $0x2e0] ss:$24 sps:$4 sm:$0xff]  }
  0x6c   : > { %1429 = vmatpush1.bf16.msra.mxu1 %v2369_v23  ;;  %1622 = vmatpush1.bf16.msra.mxu0 %v2372_v39  ;;  %v509_v23 = vadd.f32 %v2606_v53, %v433_v45  ;;  %v511_v39 = vadd.f32 %v2606_v53, %v435_v50  ;;  %v2398_v53 = vld [vmem:[%s3633_s3 + $0x284] ss:$24 sps:$4 sm:$0xff]   ;;  %v541_v7 = vmax.f32 %v477_v4, 0.0 }
  0x6d   : > { %1430 = vmatprep.subr.bf16.mxu1 %v2377_v49  ;;  %1623 = vmatprep.subr.bf16.mxu0 %v2380_v57  ;;  %v2387_v49 = vld [vmem:[%s3633_s3 + $0x248] ss:$24 sps:$4 sm:$0xff]   ;;  %v543_v9 = vmax.f32 %v479_v2, 0.0 }
  0x6e   : > { %v2390_v57 = vld [vmem:[%s3633_s3 + $0x250] ss:$24 sps:$4 sm:$0xff]   ;;  %v573_v8 = vmax.f32 %v509_v23, 0.0 }
  0x6f   : > { %1300 = vmatmul.mubr.bf16.gmra.mrb[20].mxu0 %v3043_v10  ;;  %1380 = vmatmul.mubr.bf16.gmra.mrb[20].mxu1 %v3045_v12  ;;  %v591_v24 = vpack.c.bf16 %v543_v9, %v541_v7 }
  0x70   : > { %1431 = vmatpush1.bf16.msra.mxu1 %v2375_v15  ;;  %1624 = vmatpush1.bf16.msra.mxu0 %v2378_v16  ;;  %v575_v15 = vmax.f32 %v511_v39, 0.0  ;;  %v2393_v16 = vld [vmem:[%s3633_s3 + $0x278] ss:$24 sps:$4 sm:$0xff]  }
  0x71   : > { %1432 = vmatprep.subr.bf16.mxu1 %v2383_v25  ;;  %1625 = vmatprep.subr.bf16.mxu0 %v2386_v26  ;;  %v2399_v26 = vld [vmem:[%s3633_s3 + $0x2a8] ss:$24 sps:$4 sm:$0xff]  }
  0x72   : > { %1309 = vmatprep.mubr.bf16.mxu0 %v2892_v55  ;;  %1389 = vmatprep.mubr.bf16.mxu1 %v2903_v62  ;;  %v3119_v25 = vpack.c.bf16 %v575_v15, %v573_v8 }
  0x74   : > { %1433 = vmatpush1.bf16.msra.mxu1 %v2381_v54  ;;  %1626 = vmatpush1.bf16.msra.mxu0 %v2384_v60 }
  0x75   : > { %1434 = vmatprep.subr.bf16.mxu1 %v2389_v61  ;;  %1627 = vmatprep.subr.bf16.mxu0 %v2392_v48 }
  0x77   : > { %1310 = vmatmul.mubr.bf16.gmra.mrb[24].mxu0 %v3083_v63  ;;  %1390 = vmatmul.mubr.bf16.gmra.mrb[24].mxu1 %v3085_v1 }
  0x78   : > { %1435 = vmatpush1.bf16.msra.mxu1 %v2387_v49  ;;  %1628 = vmatpush1.bf16.msra.mxu0 %v2390_v57 }
  0x79   : > { %1436 = vmatprep.subr.bf16.mxu1 %v2395_v6  ;;  %1629 = vmatprep.subr.bf16.mxu0 %v2398_v53 }
  0x7a   : > { %1319 = vmatprep.mubr.bf16.mxu0 %v2969_v0  ;;  %1399 = vmatprep.mubr.bf16.mxu1 %v2974_v59 }
  0x7c   : > { %1437 = vmatpush1.bf16.msra.mxu1 %v2393_v16  ;;  %1630 = vmatpush1.bf16.msra.mxu0 %v2396_v17 }
  0x7d   : > { %1438 = vmatprep.subr.bf16.mxu1 %v2401_v19  ;;  %1631 = vmatprep.subr.bf16.mxu0 %v2404_v21 }
  0x7f   : > { %1320 = vmatmul.mubr.bf16.gmra.mrb[28].mxu0 %v591_v24  ;;  %1400 = vmatmul.mubr.bf16.gmra.mrb[28].mxu1 %v3119_v25 }
  0x80   : > { %1439 = vmatpush1.bf16.msra.mxu1 %v2399_v26  ;;  %1632 = vmatpush1.bf16.msra.mxu0 %v2402_v27 }
  0x81   : > { %1440 = vmatprep.subr.bf16.mxu1 %v2407_v22  ;;  %1633 = vmatprep.subr.bf16.mxu0 %v2410_v29 }
  0x82   : > { %1442 = vmatprep.mubr.bf16.mxu1 %v2577_v41  ;;  %1635 = vmatprep.mubr.bf16.mxu0 %v2577_v41  ;;  %v3205_v41 = vld [vmem:[%s3634_s4] sm:$0x3f] }
  0x84   : > { %1441 = vmatpush1.bf16.msra.mxu1 %v2405_v34  ;;  %1634 = vmatpush1.bf16.msra.mxu0 %v2408_v36 }
  0x87   : > { %1443 = vmatmul.mubr.bf16.vlgmr.msra.gmra.mrb[32].mxu1 %v2660_v30  ;;  %1636 = vmatmul.mubr.bf16.vlgmr.msra.gmra.mrb[32].mxu0 %v2660_v30  ;;  %v3214_v30 = vrot.slane %v3205_v41, %v2533_v14 }
  0x88   : > { %1452 = vmatprep.mubr.bf16.mxu1 %v2731_v32  ;;  %1645 = vmatprep.mubr.bf16.mxu0 %v2731_v32 }
  0x8f   : > { %1453 = vmatmul.mubr.bf16.gmra.mrb[36].mxu1 %v2742_v37  ;;  %1646 = vmatmul.mubr.bf16.gmra.mrb[36].mxu0 %v2742_v37 }
  0x90   : > { %1462 = vmatprep.mubr.bf16.mxu1 %v2754_v51  ;;  %1655 = vmatprep.mubr.bf16.mxu0 %v2754_v51 }
  0x97   : > { %1463 = vmatmul.mubr.bf16.gmra.mrb[40].mxu1 %v2808_v31  ;;  %1656 = vmatmul.mubr.bf16.gmra.mrb[40].mxu0 %v2808_v31 }
  0x98   : > { %1472 = vmatprep.mubr.bf16.mxu1 %v2824_v47  ;;  %1665 = vmatprep.mubr.bf16.mxu0 %v2824_v47 }
  0x9f   : > { %1473 = vmatmul.mubr.bf16.gmra.mrb[44].mxu1 %v2954_v56  ;;  %1666 = vmatmul.mubr.bf16.gmra.mrb[44].mxu0 %v2954_v56 }
  0xa0   : > { %1482 = vmatprep.mubr.bf16.mxu1 %v2967_v13  ;;  %1675 = vmatprep.mubr.bf16.mxu0 %v2967_v13 }
  0xa7   : > { %1483 = vmatmul.mubr.bf16.gmra.mrb[48].mxu1 %v2995_v18  ;;  %1676 = vmatmul.mubr.bf16.gmra.mrb[48].mxu0 %v2995_v18 }
  0xa8   : > { %1492 = vmatprep.mubr.bf16.mxu1 %v2822_v46  ;;  %1685 = vmatprep.mubr.bf16.mxu0 %v2822_v46 }
  0xaf   : > { %1493 = vmatmul.mubr.bf16.gmra.mrb[52].mxu1 %v3043_v10  ;;  %1686 = vmatmul.mubr.bf16.gmra.mrb[52].mxu0 %v3043_v10 }
  0xb0   : > { %1502 = vmatprep.mubr.bf16.mxu1 %v2892_v55  ;;  %1695 = vmatprep.mubr.bf16.mxu0 %v2892_v55 }
  0xb7   : > { %1503 = vmatmul.mubr.bf16.gmra.mrb[56].mxu1 %v3083_v63  ;;  %1696 = vmatmul.mubr.bf16.gmra.mrb[56].mxu0 %v3083_v63 }
  0xb8   : > { %1512 = vmatprep.mubr.bf16.mxu1 %v2969_v0  ;;  %1705 = vmatprep.mubr.bf16.mxu0 %v2969_v0 }
  0xbf   : > { %1513 = vmatmul.mubr.bf16.gmra.mrb[60].mxu1 %v591_v24  ;;  %1706 = vmatmul.mubr.bf16.gmra.mrb[60].mxu0 %v591_v24 }
  0xc0   : > { %1522 = vmatprep.mubr.bf16.mxu1 %v2585_v44  ;;  %1715 = vmatprep.mubr.bf16.mxu0 %v2585_v44  ;;  %v3210_v44 = vrot.slane %v3205_v41, %v2580_v42 }
  0xc7   : > { %1523 = vmatmul.mubr.bf16.gmra.mrb[64].mxu1 %v2723_v28  ;;  %1716 = vmatmul.mubr.bf16.gmra.mrb[64].mxu0 %v2723_v28 }
  0xc8   : > { %1532 = vmatprep.mubr.bf16.mxu1 %v2733_v33  ;;  %1725 = vmatprep.mubr.bf16.mxu0 %v2733_v33 }
  0xcf   : > { %1533 = vmatmul.mubr.bf16.gmra.mrb[68].mxu1 %v2745_v43  ;;  %1726 = vmatmul.mubr.bf16.gmra.mrb[68].mxu0 %v2745_v43 }
  0xd0   : > { %1542 = vmatprep.mubr.bf16.mxu1 %v2778_v3  ;;  %1735 = vmatprep.mubr.bf16.mxu0 %v2778_v3 }
  0xd7   : > { %1543 = vmatmul.mubr.bf16.gmra.mrb[72].mxu1 %v2810_v35  ;;  %1736 = vmatmul.mubr.bf16.gmra.mrb[72].mxu0 %v2810_v35 }
  0xd8   : > { %1552 = vmatprep.mubr.bf16.mxu1 %v2838_v58  ;;  %1745 = vmatprep.mubr.bf16.mxu0 %v2838_v58 }
  0xdf   : > { %1553 = vmatmul.mubr.bf16.gmra.mrb[76].mxu1 %v2956_v40  ;;  %1746 = vmatmul.mubr.bf16.gmra.mrb[76].mxu0 %v2956_v40 }
  0xe0   : > { %1562 = vmatprep.mubr.bf16.mxu1 %v2971_v5  ;;  %1755 = vmatprep.mubr.bf16.mxu0 %v2971_v5 }
  0xe7   : > { %1563 = vmatmul.mubr.bf16.gmra.mrb[80].mxu1 %v2997_v20  ;;  %1756 = vmatmul.mubr.bf16.gmra.mrb[80].mxu0 %v2997_v20 }
  0xe8   : > { %1572 = vmatprep.mubr.bf16.mxu1 %v2828_v52  ;;  %1765 = vmatprep.mubr.bf16.mxu0 %v2828_v52 }
  0xef   : > { %1573 = vmatmul.mubr.bf16.gmra.mrb[84].mxu1 %v3045_v12  ;;  %1766 = vmatmul.mubr.bf16.gmra.mrb[84].mxu0 %v3045_v12 }
  0xf0   : > { %1582 = vmatprep.mubr.bf16.mxu1 %v2903_v62  ;;  %1775 = vmatprep.mubr.bf16.mxu0 %v2903_v62 }
  0xf7   : > { %1583 = vmatmul.mubr.bf16.gmra.mrb[88].mxu1 %v3085_v1  ;;  %1776 = vmatmul.mubr.bf16.gmra.mrb[88].mxu0 %v3085_v1 }
  0xf8   : > { %1592 = vmatprep.mubr.bf16.mxu1 %v2974_v59  ;;  %1785 = vmatprep.mubr.bf16.mxu0 %v2974_v59 }
  0xff   : > { %1593 = vmatmul.mubr.bf16.gmra.mrb[92].mxu1 %v3119_v25  ;;  %1786 = vmatmul.mubr.bf16.gmra.mrb[92].mxu0 %v3119_v25 }
 0x11a   : > { %v1251_v28 = vpop.f32.mrb[0].mxu0  ;;  %v1331_v32 = vpop.f32.mrb[0].mxu1 }
 0x11b   : > { %v1252_v33 = vadd.f32 %v1251_v28, %v3210_v44  ;;  %v1332_v42 = vadd.f32 %v1331_v32, %v3210_v44  ;;  %v1253_v37 = vpop.f32.mrb[1].mxu0  ;;  %v1333_v43 = vpop.f32.mrb[1].mxu1 }
 0x11c   : > { %v1254_v14 = vadd.f32 %v1253_v37, %v3214_v30  ;;  %v1334_v51 = vadd.f32 %v1333_v43, %v3214_v30  ;;  %v1255_v3 = vpop.f32.mrb[2].mxu0  ;;  %v1335_v31 = vpop.f32.mrb[2].mxu1 }
 0x11d   : > { %1796 = vst [vmem:[%s3219_s23] sm:$0xff] %v1252_v33  ;;  %1892 = vst [vmem:[%s3219_s23 + $0x300] sm:$0xff] %v1332_v42  ;;  %v1256_v35 = vadd.f32 %v1255_v3, %v3210_v44  ;;  %v1336_v46 = vadd.f32 %v1335_v31, %v3210_v44  ;;  %v1257_v47 = vpop.f32.mrb[3].mxu0  ;;  %v1337_v52 = vpop.f32.mrb[3].mxu1 }
 0x11e   : > { %1797 = vst [vmem:[%s3219_s23 + $0x8] sm:$0xff] %v1254_v14  ;;  %1893 = vst [vmem:[%s3219_s23 + $0x308] sm:$0xff] %v1334_v51  ;;  %v1258_v58 = vadd.f32 %v1257_v47, %v3214_v30  ;;  %v1338_v55 = vadd.f32 %v1337_v52, %v3214_v30 }
 0x11f   : > { %1802 = vst [vmem:[%s3219_s23 + $0x30] sm:$0xff] %v1256_v35  ;;  %1898 = vst [vmem:[%s3219_s23 + $0x330] sm:$0xff] %v1336_v46 }
 0x120   : > { %1803 = vst [vmem:[%s3219_s23 + $0x38] sm:$0xff] %v1258_v58  ;;  %1899 = vst [vmem:[%s3219_s23 + $0x338] sm:$0xff] %v1338_v55 }
 0x122   : > { %v1261_v62 = vpop.f32.mrb[4].mxu0  ;;  %v1341_v56 = vpop.f32.mrb[4].mxu1 }
 0x123   : > { %v1262_v40 = vadd.f32 %v1261_v62, %v3210_v44  ;;  %v1342_v13 = vadd.f32 %v1341_v56, %v3210_v44  ;;  %v1263_v0 = vpop.f32.mrb[5].mxu0  ;;  %v1343_v5 = vpop.f32.mrb[5].mxu1 }
 0x124   : > { %v1264_v59 = vadd.f32 %v1263_v0, %v3214_v30  ;;  %v1344_v18 = vadd.f32 %v1343_v5, %v3214_v30  ;;  %v1265_v20 = vpop.f32.mrb[6].mxu0  ;;  %v1345_v10 = vpop.f32.mrb[6].mxu1 }
 0x125   : > { %1808 = vst [vmem:[%s3219_s23 + $0x60] sm:$0xff] %v1262_v40  ;;  %1904 = vst [vmem:[%s3219_s23 + $0x360] sm:$0xff] %v1342_v13  ;;  %v1266_v12 = vadd.f32 %v1265_v20, %v3210_v44  ;;  %v1346_v38 = vadd.f32 %v1345_v10, %v3210_v44  ;;  %v1267_v45 = vpop.f32.mrb[7].mxu0  ;;  %v1347_v50 = vpop.f32.mrb[7].mxu1 }
 0x126   : > { %1809 = vst [vmem:[%s3219_s23 + $0x68] sm:$0xff] %v1264_v59  ;;  %1905 = vst [vmem:[%s3219_s23 + $0x368] sm:$0xff] %v1344_v18  ;;  %v1268_v54 = vadd.f32 %v1267_v45, %v3214_v30  ;;  %v1348_v60 = vadd.f32 %v1347_v50, %v3214_v30 }
 0x127   : > { %1814 = vst [vmem:[%s3219_s23 + $0x90] sm:$0xff] %v1266_v12  ;;  %1910 = vst [vmem:[%s3219_s23 + $0x390] sm:$0xff] %v1346_v38 }
 0x128   : > { %1815 = vst [vmem:[%s3219_s23 + $0x98] sm:$0xff] %v1268_v54  ;;  %1911 = vst [vmem:[%s3219_s23 + $0x398] sm:$0xff] %v1348_v60 }
 0x12a   : > { %v1271_v61 = vpop.f32.mrb[8].mxu0  ;;  %v1351_v48 = vpop.f32.mrb[8].mxu1 }
 0x12b   : > { %v1272_v63 = vadd.f32 %v1271_v61, %v3210_v44  ;;  %v1352_v1 = vadd.f32 %v1351_v48, %v3210_v44  ;;  %v1273_v4 = vpop.f32.mrb[9].mxu0  ;;  %v1353_v2 = vpop.f32.mrb[9].mxu1 }
 0x12c   : > { %v1274_v23 = vadd.f32 %v1273_v4, %v3214_v30  ;;  %v1354_v39 = vadd.f32 %v1353_v2, %v3214_v30  ;;  %v1275_v49 = vpop.f32.mrb[10].mxu0  ;;  %v1355_v57 = vpop.f32.mrb[10].mxu1 }
 0x12d   : > { %1820 = vst [vmem:[%s3219_s23 + $0xc0] sm:$0xff] %v1272_v63  ;;  %1916 = vst [vmem:[%s3219_s23 + $0x3c0] sm:$0xff] %v1352_v1  ;;  %v1276_v6 = vadd.f32 %v1275_v49, %v3210_v44  ;;  %v1356_v53 = vadd.f32 %v1355_v57, %v3210_v44  ;;  %v1277_v7 = vpop.f32.mrb[11].mxu0  ;;  %v1357_v9 = vpop.f32.mrb[11].mxu1 }
 0x12e   : > { %1821 = vst [vmem:[%s3219_s23 + $0xc8] sm:$0xff] %v1274_v23  ;;  %1917 = vst [vmem:[%s3219_s23 + $0x3c8] sm:$0xff] %v1354_v39  ;;  %v1278_v8 = vadd.f32 %v1277_v7, %v3214_v30  ;;  %v1358_v15 = vadd.f32 %v1357_v9, %v3214_v30 }
 0x12f   : > { %1826 = vst [vmem:[%s3219_s23 + $0xf0] sm:$0xff] %v1276_v6  ;;  %1922 = vst [vmem:[%s3219_s23 + $0x3f0] sm:$0xff] %v1356_v53 }
 0x130   : > { %1827 = vst [vmem:[%s3219_s23 + $0xf8] sm:$0xff] %v1278_v8  ;;  %1923 = vst [vmem:[%s3219_s23 + $0x3f8] sm:$0xff] %v1358_v15 }
 0x132   : > { %v1281_v16 = vpop.f32.mrb[12].mxu0  ;;  %v1361_v17 = vpop.f32.mrb[12].mxu1 }
 0x133   : > { %v1282_v19 = vadd.f32 %v1281_v16, %v3210_v44  ;;  %v1362_v21 = vadd.f32 %v1361_v17, %v3210_v44  ;;  %v1283_v24 = vpop.f32.mrb[13].mxu0  ;;  %v1363_v25 = vpop.f32.mrb[13].mxu1 }
 0x134   : > { %v1284_v26 = vadd.f32 %v1283_v24, %v3214_v30  ;;  %v1364_v27 = vadd.f32 %v1363_v25, %v3214_v30  ;;  %v1285_v22 = vpop.f32.mrb[14].mxu0  ;;  %v1365_v29 = vpop.f32.mrb[14].mxu1 }
 0x135   : > { %1832 = vst [vmem:[%s3219_s23 + $0x120] sm:$0xff] %v1282_v19  ;;  %1928 = vst [vmem:[%s3219_s23 + $0x420] sm:$0xff] %v1362_v21  ;;  %v1286_v34 = vadd.f32 %v1285_v22, %v3210_v44  ;;  %v1366_v36 = vadd.f32 %v1365_v29, %v3210_v44  ;;  %v1287_v28 = vpop.f32.mrb[15].mxu0  ;;  %v1367_v32 = vpop.f32.mrb[15].mxu1 }
 0x136   : > { %1833 = vst [vmem:[%s3219_s23 + $0x128] sm:$0xff] %v1284_v26  ;;  %1929 = vst [vmem:[%s3219_s23 + $0x428] sm:$0xff] %v1364_v27  ;;  %v1288_v33 = vadd.f32 %v1287_v28, %v3214_v30  ;;  %v1368_v42 = vadd.f32 %v1367_v32, %v3214_v30 }
 0x137   : > { %1838 = vst [vmem:[%s3219_s23 + $0x150] sm:$0xff] %v1286_v34  ;;  %1934 = vst [vmem:[%s3219_s23 + $0x450] sm:$0xff] %v1366_v36  ;;  %v717_v34 = vsub.s32 2, %v2519_v11  ;;  %v725_v36 = vsub.s32 4, %v2519_v11 }
 0x138   : > { %1839 = vst [vmem:[%s3219_s23 + $0x158] sm:$0xff] %v1288_v33  ;;  %1935 = vst [vmem:[%s3219_s23 + $0x458] sm:$0xff] %v1368_v42 }
 0x13a   : > { %v1291_v37 = vpop.f32.mrb[16].mxu0  ;;  %v1371_v43 = vpop.f32.mrb[16].mxu1 }
 0x13b   : > { %v1292_v14 = vadd.f32 %v1291_v37, %v3210_v44  ;;  %v1372_v51 = vadd.f32 %v1371_v43, %v3210_v44  ;;  %v1293_v3 = vpop.f32.mrb[17].mxu0  ;;  %v1373_v31 = vpop.f32.mrb[17].mxu1  ;;  %v721_v37 = vsub.s32 3, %v2519_v11  ;;  %v729_v43 = vsub.s32 5, %v2519_v11 }
 0x13c   : > { %v1294_v35 = vadd.f32 %v1293_v3, %v3214_v30  ;;  %v1374_v46 = vadd.f32 %v1373_v31, %v3214_v30  ;;  %v1295_v47 = vpop.f32.mrb[18].mxu0  ;;  %v1375_v52 = vpop.f32.mrb[18].mxu1  ;;  %v3355_v11 = vrot.slane %v3205_v41, %v725_v36 }
 0x13d   : > { %1844 = vst [vmem:[%s3219_s23 + $0x180] sm:$0xff] %v1292_v14  ;;  %1940 = vst [vmem:[%s3219_s23 + $0x480] sm:$0xff] %v1372_v51  ;;  %v1296_v58 = vadd.f32 %v1295_v47, %v3210_v44  ;;  %v1376_v55 = vadd.f32 %v1375_v52, %v3210_v44  ;;  %v1297_v62 = vpop.f32.mrb[19].mxu0  ;;  %v1377_v56 = vpop.f32.mrb[19].mxu1  ;;  %v3352_v47 = vrot.slane %v3205_v41, %v717_v34 }
 0x13e   : > { %1845 = vst [vmem:[%s3219_s23 + $0x188] sm:$0xff] %v1294_v35  ;;  %1941 = vst [vmem:[%s3219_s23 + $0x488] sm:$0xff] %v1374_v46  ;;  %v1298_v40 = vadd.f32 %v1297_v62, %v3214_v30  ;;  %v1378_v13 = vadd.f32 %v1377_v56, %v3214_v30  ;;  %v3363_v52 = vrot.slane %v3205_v41, %v729_v43 }
 0x13f   : > { %1850 = vst [vmem:[%s3219_s23 + $0x1b0] sm:$0xff] %v1296_v58  ;;  %1946 = vst [vmem:[%s3219_s23 + $0x4b0] sm:$0xff] %v1376_v55 }
 0x140   : > { %1851 = vst [vmem:[%s3219_s23 + $0x1b8] sm:$0xff] %v1298_v40  ;;  %1947 = vst [vmem:[%s3219_s23 + $0x4b8] sm:$0xff] %v1378_v13 }
 0x142   : > { %v1301_v0 = vpop.f32.mrb[20].mxu0  ;;  %v1381_v5 = vpop.f32.mrb[20].mxu1 }
 0x143   : > { %v1302_v59 = vadd.f32 %v1301_v0, %v3210_v44  ;;  %v1382_v18 = vadd.f32 %v1381_v5, %v3210_v44  ;;  %v1303_v20 = vpop.f32.mrb[21].mxu0  ;;  %v1383_v10 = vpop.f32.mrb[21].mxu1 }
 0x144   : > { %v1304_v12 = vadd.f32 %v1303_v20, %v3214_v30  ;;  %v1384_v38 = vadd.f32 %v1383_v10, %v3214_v30  ;;  %v1305_v45 = vpop.f32.mrb[22].mxu0  ;;  %v1385_v50 = vpop.f32.mrb[22].mxu1 }
 0x145   : > { %1856 = vst [vmem:[%s3219_s23 + $0x1e0] sm:$0xff] %v1302_v59  ;;  %1952 = vst [vmem:[%s3219_s23 + $0x4e0] sm:$0xff] %v1382_v18  ;;  %v1306_v54 = vadd.f32 %v1305_v45, %v3210_v44  ;;  %v1386_v60 = vadd.f32 %v1385_v50, %v3210_v44  ;;  %v1307_v61 = vpop.f32.mrb[23].mxu0  ;;  %v1387_v48 = vpop.f32.mrb[23].mxu1 }
 0x146   : > { %1857 = vst [vmem:[%s3219_s23 + $0x1e8] sm:$0xff] %v1304_v12  ;;  %1953 = vst [vmem:[%s3219_s23 + $0x4e8] sm:$0xff] %v1384_v38  ;;  %v1308_v63 = vadd.f32 %v1307_v61, %v3214_v30  ;;  %v1388_v1 = vadd.f32 %v1387_v48, %v3214_v30 }
 0x147   : > { %1862 = vst [vmem:[%s3219_s23 + $0x210] sm:$0xff] %v1306_v54  ;;  %1958 = vst [vmem:[%s3219_s23 + $0x510] sm:$0xff] %v1386_v60 }
 0x148   : > { %1863 = vst [vmem:[%s3219_s23 + $0x218] sm:$0xff] %v1308_v63  ;;  %1959 = vst [vmem:[%s3219_s23 + $0x518] sm:$0xff] %v1388_v1 }
 0x14a   : > { %v1311_v4 = vpop.f32.mrb[24].mxu0  ;;  %v1391_v2 = vpop.f32.mrb[24].mxu1 }
 0x14b   : > { %v1312_v23 = vadd.f32 %v1311_v4, %v3210_v44  ;;  %v1392_v39 = vadd.f32 %v1391_v2, %v3210_v44  ;;  %v1313_v49 = vpop.f32.mrb[25].mxu0  ;;  %v1393_v57 = vpop.f32.mrb[25].mxu1 }
 0x14c   : > { %v1314_v6 = vadd.f32 %v1313_v49, %v3214_v30  ;;  %v1394_v53 = vadd.f32 %v1393_v57, %v3214_v30  ;;  %v1315_v7 = vpop.f32.mrb[26].mxu0  ;;  %v1395_v9 = vpop.f32.mrb[26].mxu1 }
 0x14d   : > { %1868 = vst [vmem:[%s3219_s23 + $0x240] sm:$0xff] %v1312_v23  ;;  %1964 = vst [vmem:[%s3219_s23 + $0x540] sm:$0xff] %v1392_v39  ;;  %v1316_v8 = vadd.f32 %v1315_v7, %v3210_v44  ;;  %v1396_v15 = vadd.f32 %v1395_v9, %v3210_v44  ;;  %v1317_v16 = vpop.f32.mrb[27].mxu0  ;;  %v1397_v17 = vpop.f32.mrb[27].mxu1 }
 0x14e   : > { %1869 = vst [vmem:[%s3219_s23 + $0x248] sm:$0xff] %v1314_v6  ;;  %1965 = vst [vmem:[%s3219_s23 + $0x548] sm:$0xff] %v1394_v53  ;;  %v1318_v19 = vadd.f32 %v1317_v16, %v3214_v30  ;;  %v1398_v21 = vadd.f32 %v1397_v17, %v3214_v30 }
 0x14f   : > { %1874 = vst [vmem:[%s3219_s23 + $0x270] sm:$0xff] %v1316_v8  ;;  %1970 = vst [vmem:[%s3219_s23 + $0x570] sm:$0xff] %v1396_v15 }
 0x150   : > { %1875 = vst [vmem:[%s3219_s23 + $0x278] sm:$0xff] %v1318_v19  ;;  %1971 = vst [vmem:[%s3219_s23 + $0x578] sm:$0xff] %v1398_v21 }
 0x152   : > { %v1321_v24 = vpop.f32.mrb[28].mxu0  ;;  %v1401_v25 = vpop.f32.mrb[28].mxu1 }
 0x153   : > { %v1322_v26 = vadd.f32 %v1321_v24, %v3210_v44  ;;  %v1402_v27 = vadd.f32 %v1401_v25, %v3210_v44  ;;  %v1323_v22 = vpop.f32.mrb[29].mxu0  ;;  %v1403_v29 = vpop.f32.mrb[29].mxu1 }
 0x154   : > { %v1324_v28 = vadd.f32 %v1323_v22, %v3214_v30  ;;  %v1404_v32 = vadd.f32 %v1403_v29, %v3214_v30  ;;  %v1325_v33 = vpop.f32.mrb[30].mxu0  ;;  %v1405_v42 = vpop.f32.mrb[30].mxu1 }
 0x155   : > { %1880 = vst [vmem:[%s3219_s23 + $0x2a0] sm:$0xff] %v1322_v26  ;;  %1976 = vst [vmem:[%s3219_s23 + $0x5a0] sm:$0xff] %v1402_v27  ;;  %v1326_v14 = vadd.f32 %v1325_v33, %v3210_v44  ;;  %v1406_v51 = vadd.f32 %v1405_v42, %v3210_v44  ;;  %v1327_v3 = vpop.f32.mrb[31].mxu0  ;;  %v1407_v31 = vpop.f32.mrb[31].mxu1  ;;  %v3360_v44 = vrot.slane %v3205_v41, %v721_v37 }
 0x156   : > { %1881 = vst [vmem:[%s3219_s23 + $0x2a8] sm:$0xff] %v1324_v28  ;;  %1977 = vst [vmem:[%s3219_s23 + $0x5a8] sm:$0xff] %v1404_v32  ;;  %v1328_v35 = vadd.f32 %v1327_v3, %v3214_v30  ;;  %v1408_v46 = vadd.f32 %v1407_v31, %v3214_v30 }
 0x157   : > { %1886 = vst [vmem:[%s3219_s23 + $0x2d0] sm:$0xff] %v1326_v14  ;;  %1982 = vst [vmem:[%s3219_s23 + $0x5d0] sm:$0xff] %v1406_v51 }
 0x158   : > { %1887 = vst [vmem:[%s3219_s23 + $0x2d8] sm:$0xff] %v1328_v35  ;;  %1983 = vst [vmem:[%s3219_s23 + $0x5d8] sm:$0xff] %v1408_v46 }
 0x15a   : > { %v1444_v58 = vpop.f32.mrb[32].mxu1  ;;  %v1637_v30 = vpop.f32.mrb[32].mxu0 }
 0x15b   : > { %v1445_v55 = vadd.f32 %v1444_v58, %v3352_v47  ;;  %v1638_v62 = vadd.f32 %v1637_v30, %v3355_v11  ;;  %v1446_v56 = vpop.f32.mrb[33].mxu1  ;;  %v1639_v40 = vpop.f32.mrb[33].mxu0 }
 0x15c   : > { %v1447_v13 = vadd.f32 %v1446_v56, %v3360_v44  ;;  %v1640_v0 = vadd.f32 %v1639_v40, %v3363_v52  ;;  %v1448_v41 = vpop.f32.mrb[34].mxu1  ;;  %v1641_v5 = vpop.f32.mrb[34].mxu0 }
 0x15d   : > { %1798 = vst [vmem:[%s3219_s23 + $0x10] sm:$0xff] %v1445_v55  ;;  %1800 = vst [vmem:[%s3219_s23 + $0x20] sm:$0xff] %v1638_v62  ;;  %v1449_v59 = vadd.f32 %v1448_v41, %v3352_v47  ;;  %v1642_v18 = vadd.f32 %v1641_v5, %v3355_v11  ;;  %v1450_v20 = vpop.f32.mrb[35].mxu1  ;;  %v1643_v10 = vpop.f32.mrb[35].mxu0 }
 0x15e   : > { %1799 = vst [vmem:[%s3219_s23 + $0x18] sm:$0xff] %v1447_v13  ;;  %1801 = vst [vmem:[%s3219_s23 + $0x28] sm:$0xff] %v1640_v0  ;;  %v1451_v12 = vadd.f32 %v1450_v20, %v3360_v44  ;;  %v1644_v38 = vadd.f32 %v1643_v10, %v3363_v52 }
 0x15f   : > { %1804 = vst [vmem:[%s3219_s23 + $0x40] sm:$0xff] %v1449_v59  ;;  %1806 = vst [vmem:[%s3219_s23 + $0x50] sm:$0xff] %v1642_v18 }
 0x160   : > { %1805 = vst [vmem:[%s3219_s23 + $0x48] sm:$0xff] %v1451_v12  ;;  %1807 = vst [vmem:[%s3219_s23 + $0x58] sm:$0xff] %v1644_v38 }
 0x162   : > { %v1454_v45 = vpop.f32.mrb[36].mxu1  ;;  %v1647_v50 = vpop.f32.mrb[36].mxu0 }
 0x163   : > { %v1455_v54 = vadd.f32 %v1454_v45, %v3352_v47  ;;  %v1648_v60 = vadd.f32 %v1647_v50, %v3355_v11  ;;  %v1456_v61 = vpop.f32.mrb[37].mxu1  ;;  %v1649_v48 = vpop.f32.mrb[37].mxu0 }
 0x164   : > { %v1457_v63 = vadd.f32 %v1456_v61, %v3360_v44  ;;  %v1650_v1 = vadd.f32 %v1649_v48, %v3363_v52  ;;  %v1458_v4 = vpop.f32.mrb[38].mxu1  ;;  %v1651_v2 = vpop.f32.mrb[38].mxu0 }
 0x165   : > { %1810 = vst [vmem:[%s3219_s23 + $0x70] sm:$0xff] %v1455_v54  ;;  %1812 = vst [vmem:[%s3219_s23 + $0x80] sm:$0xff] %v1648_v60  ;;  %v1459_v23 = vadd.f32 %v1458_v4, %v3352_v47  ;;  %v1652_v39 = vadd.f32 %v1651_v2, %v3355_v11  ;;  %v1460_v49 = vpop.f32.mrb[39].mxu1  ;;  %v1653_v57 = vpop.f32.mrb[39].mxu0 }
 0x166   : > { %1811 = vst [vmem:[%s3219_s23 + $0x78] sm:$0xff] %v1457_v63  ;;  %1813 = vst [vmem:[%s3219_s23 + $0x88] sm:$0xff] %v1650_v1  ;;  %v1461_v6 = vadd.f32 %v1460_v49, %v3360_v44  ;;  %v1654_v53 = vadd.f32 %v1653_v57, %v3363_v52 }
 0x167   : > { %1816 = vst [vmem:[%s3219_s23 + $0xa0] sm:$0xff] %v1459_v23  ;;  %1818 = vst [vmem:[%s3219_s23 + $0xb0] sm:$0xff] %v1652_v39 }
 0x168   : > { %1817 = vst [vmem:[%s3219_s23 + $0xa8] sm:$0xff] %v1461_v6  ;;  %1819 = vst [vmem:[%s3219_s23 + $0xb8] sm:$0xff] %v1654_v53 }
 0x16a   : > { %v1464_v7 = vpop.f32.mrb[40].mxu1  ;;  %v1657_v9 = vpop.f32.mrb[40].mxu0 }
 0x16b   : > { %v1465_v8 = vadd.f32 %v1464_v7, %v3352_v47  ;;  %v1658_v15 = vadd.f32 %v1657_v9, %v3355_v11  ;;  %v1466_v16 = vpop.f32.mrb[41].mxu1  ;;  %v1659_v17 = vpop.f32.mrb[41].mxu0 }
 0x16c   : > { %v1467_v19 = vadd.f32 %v1466_v16, %v3360_v44  ;;  %v1660_v21 = vadd.f32 %v1659_v17, %v3363_v52  ;;  %v1468_v24 = vpop.f32.mrb[42].mxu1  ;;  %v1661_v25 = vpop.f32.mrb[42].mxu0 }
 0x16d   : > { %1822 = vst [vmem:[%s3219_s23 + $0xd0] sm:$0xff] %v1465_v8  ;;  %1824 = vst [vmem:[%s3219_s23 + $0xe0] sm:$0xff] %v1658_v15  ;;  %v1469_v26 = vadd.f32 %v1468_v24, %v3352_v47  ;;  %v1662_v27 = vadd.f32 %v1661_v25, %v3355_v11  ;;  %v1470_v22 = vpop.f32.mrb[43].mxu1  ;;  %v1663_v29 = vpop.f32.mrb[43].mxu0 }
 0x16e   : > { %1823 = vst [vmem:[%s3219_s23 + $0xd8] sm:$0xff] %v1467_v19  ;;  %1825 = vst [vmem:[%s3219_s23 + $0xe8] sm:$0xff] %v1660_v21  ;;  %v1471_v34 = vadd.f32 %v1470_v22, %v3360_v44  ;;  %v1664_v36 = vadd.f32 %v1663_v29, %v3363_v52 }
 0x16f   : > { %1828 = vst [vmem:[%s3219_s23 + $0x100] sm:$0xff] %v1469_v26  ;;  %1830 = vst [vmem:[%s3219_s23 + $0x110] sm:$0xff] %v1662_v27 }
 0x170   : > { %1829 = vst [vmem:[%s3219_s23 + $0x108] sm:$0xff] %v1471_v34  ;;  %1831 = vst [vmem:[%s3219_s23 + $0x118] sm:$0xff] %v1664_v36 }
 0x172   : > { %v1474_v28 = vpop.f32.mrb[44].mxu1  ;;  %v1667_v32 = vpop.f32.mrb[44].mxu0 }
 0x173   : > { %v1475_v33 = vadd.f32 %v1474_v28, %v3352_v47  ;;  %v1668_v42 = vadd.f32 %v1667_v32, %v3355_v11  ;;  %v1476_v37 = vpop.f32.mrb[45].mxu1  ;;  %v1669_v43 = vpop.f32.mrb[45].mxu0 }
 0x174   : > { %v1477_v14 = vadd.f32 %v1476_v37, %v3360_v44  ;;  %v1670_v51 = vadd.f32 %v1669_v43, %v3363_v52  ;;  %v1478_v3 = vpop.f32.mrb[46].mxu1  ;;  %v1671_v31 = vpop.f32.mrb[46].mxu0 }
 0x175   : > { %1834 = vst [vmem:[%s3219_s23 + $0x130] sm:$0xff] %v1475_v33  ;;  %1836 = vst [vmem:[%s3219_s23 + $0x140] sm:$0xff] %v1668_v42  ;;  %v1479_v35 = vadd.f32 %v1478_v3, %v3352_v47  ;;  %v1672_v46 = vadd.f32 %v1671_v31, %v3355_v11  ;;  %v1480_v58 = vpop.f32.mrb[47].mxu1  ;;  %v1673_v30 = vpop.f32.mrb[47].mxu0 }
 0x176   : > { %1835 = vst [vmem:[%s3219_s23 + $0x138] sm:$0xff] %v1477_v14  ;;  %1837 = vst [vmem:[%s3219_s23 + $0x148] sm:$0xff] %v1670_v51  ;;  %v1481_v55 = vadd.f32 %v1480_v58, %v3360_v44  ;;  %v1674_v62 = vadd.f32 %v1673_v30, %v3363_v52 }
 0x177   : > { %1840 = vst [vmem:[%s3219_s23 + $0x160] sm:$0xff] %v1479_v35  ;;  %1842 = vst [vmem:[%s3219_s23 + $0x170] sm:$0xff] %v1672_v46 }
 0x178   : > { %1841 = vst [vmem:[%s3219_s23 + $0x168] sm:$0xff] %v1481_v55  ;;  %1843 = vst [vmem:[%s3219_s23 + $0x178] sm:$0xff] %v1674_v62 }
 0x17a   : > { %v1484_v56 = vpop.f32.mrb[48].mxu1  ;;  %v1677_v40 = vpop.f32.mrb[48].mxu0 }
 0x17b   : > { %v1485_v13 = vadd.f32 %v1484_v56, %v3352_v47  ;;  %v1678_v0 = vadd.f32 %v1677_v40, %v3355_v11  ;;  %v1486_v41 = vpop.f32.mrb[49].mxu1  ;;  %v1679_v5 = vpop.f32.mrb[49].mxu0 }
 0x17c   : > { %v1487_v59 = vadd.f32 %v1486_v41, %v3360_v44  ;;  %v1680_v18 = vadd.f32 %v1679_v5, %v3363_v52  ;;  %v1488_v20 = vpop.f32.mrb[50].mxu1  ;;  %v1681_v10 = vpop.f32.mrb[50].mxu0 }
 0x17d   : > { %1846 = vst [vmem:[%s3219_s23 + $0x190] sm:$0xff] %v1485_v13  ;;  %1848 = vst [vmem:[%s3219_s23 + $0x1a0] sm:$0xff] %v1678_v0  ;;  %v1489_v12 = vadd.f32 %v1488_v20, %v3352_v47  ;;  %v1682_v38 = vadd.f32 %v1681_v10, %v3355_v11  ;;  %v1490_v45 = vpop.f32.mrb[51].mxu1  ;;  %v1683_v50 = vpop.f32.mrb[51].mxu0 }
 0x17e   : > { %1847 = vst [vmem:[%s3219_s23 + $0x198] sm:$0xff] %v1487_v59  ;;  %1849 = vst [vmem:[%s3219_s23 + $0x1a8] sm:$0xff] %v1680_v18  ;;  %v1491_v54 = vadd.f32 %v1490_v45, %v3360_v44  ;;  %v1684_v60 = vadd.f32 %v1683_v50, %v3363_v52 }
 0x17f   : > { %1852 = vst [vmem:[%s3219_s23 + $0x1c0] sm:$0xff] %v1489_v12  ;;  %1854 = vst [vmem:[%s3219_s23 + $0x1d0] sm:$0xff] %v1682_v38 }
 0x180   : > { %1853 = vst [vmem:[%s3219_s23 + $0x1c8] sm:$0xff] %v1491_v54  ;;  %1855 = vst [vmem:[%s3219_s23 + $0x1d8] sm:$0xff] %v1684_v60 }
 0x182   : > { %v1494_v61 = vpop.f32.mrb[52].mxu1  ;;  %v1687_v48 = vpop.f32.mrb[52].mxu0 }
 0x183   : > { %v1495_v63 = vadd.f32 %v1494_v61, %v3352_v47  ;;  %v1688_v1 = vadd.f32 %v1687_v48, %v3355_v11  ;;  %v1496_v4 = vpop.f32.mrb[53].mxu1  ;;  %v1689_v2 = vpop.f32.mrb[53].mxu0 }
 0x184   : > { %v1497_v23 = vadd.f32 %v1496_v4, %v3360_v44  ;;  %v1690_v39 = vadd.f32 %v1689_v2, %v3363_v52  ;;  %v1498_v49 = vpop.f32.mrb[54].mxu1  ;;  %v1691_v57 = vpop.f32.mrb[54].mxu0 }
 0x185   : > { %1858 = vst [vmem:[%s3219_s23 + $0x1f0] sm:$0xff] %v1495_v63  ;;  %1860 = vst [vmem:[%s3219_s23 + $0x200] sm:$0xff] %v1688_v1  ;;  %v1499_v6 = vadd.f32 %v1498_v49, %v3352_v47  ;;  %v1692_v53 = vadd.f32 %v1691_v57, %v3355_v11  ;;  %v1500_v7 = vpop.f32.mrb[55].mxu1  ;;  %v1693_v9 = vpop.f32.mrb[55].mxu0 }
 0x186   : > { %1859 = vst [vmem:[%s3219_s23 + $0x1f8] sm:$0xff] %v1497_v23  ;;  %1861 = vst [vmem:[%s3219_s23 + $0x208] sm:$0xff] %v1690_v39  ;;  %v1501_v8 = vadd.f32 %v1500_v7, %v3360_v44  ;;  %v1694_v15 = vadd.f32 %v1693_v9, %v3363_v52 }
 0x187   : > { %1864 = vst [vmem:[%s3219_s23 + $0x220] sm:$0xff] %v1499_v6  ;;  %1866 = vst [vmem:[%s3219_s23 + $0x230] sm:$0xff] %v1692_v53 }
 0x188   : > { %1865 = vst [vmem:[%s3219_s23 + $0x228] sm:$0xff] %v1501_v8  ;;  %1867 = vst [vmem:[%s3219_s23 + $0x238] sm:$0xff] %v1694_v15 }
 0x18a   : > { %v1504_v16 = vpop.f32.mrb[56].mxu1  ;;  %v1697_v17 = vpop.f32.mrb[56].mxu0 }
 0x18b   : > { %v1505_v19 = vadd.f32 %v1504_v16, %v3352_v47  ;;  %v1698_v21 = vadd.f32 %v1697_v17, %v3355_v11  ;;  %v1506_v24 = vpop.f32.mrb[57].mxu1  ;;  %v1699_v25 = vpop.f32.mrb[57].mxu0 }
 0x18c   : > { %v1507_v26 = vadd.f32 %v1506_v24, %v3360_v44  ;;  %v1700_v27 = vadd.f32 %v1699_v25, %v3363_v52  ;;  %v1508_v22 = vpop.f32.mrb[58].mxu1  ;;  %v1701_v29 = vpop.f32.mrb[58].mxu0 }
 0x18d   : > { %1870 = vst [vmem:[%s3219_s23 + $0x250] sm:$0xff] %v1505_v19  ;;  %1872 = vst [vmem:[%s3219_s23 + $0x260] sm:$0xff] %v1698_v21  ;;  %v1509_v34 = vadd.f32 %v1508_v22, %v3352_v47  ;;  %v1702_v36 = vadd.f32 %v1701_v29, %v3355_v11  ;;  %v1510_v28 = vpop.f32.mrb[59].mxu1  ;;  %v1703_v32 = vpop.f32.mrb[59].mxu0 }
 0x18e   : > { %1871 = vst [vmem:[%s3219_s23 + $0x258] sm:$0xff] %v1507_v26  ;;  %1873 = vst [vmem:[%s3219_s23 + $0x268] sm:$0xff] %v1700_v27  ;;  %v1511_v33 = vadd.f32 %v1510_v28, %v3360_v44  ;;  %v1704_v42 = vadd.f32 %v1703_v32, %v3363_v52 }
 0x18f   : > { %1876 = vst [vmem:[%s3219_s23 + $0x280] sm:$0xff] %v1509_v34  ;;  %1878 = vst [vmem:[%s3219_s23 + $0x290] sm:$0xff] %v1702_v36 }
 0x190   : > { %1877 = vst [vmem:[%s3219_s23 + $0x288] sm:$0xff] %v1511_v33  ;;  %1879 = vst [vmem:[%s3219_s23 + $0x298] sm:$0xff] %v1704_v42 }
 0x192   : > { %v1514_v37 = vpop.f32.mrb[60].mxu1  ;;  %v1707_v43 = vpop.f32.mrb[60].mxu0 }
 0x193   : > { %v1515_v14 = vadd.f32 %v1514_v37, %v3352_v47  ;;  %v1708_v51 = vadd.f32 %v1707_v43, %v3355_v11  ;;  %v1516_v3 = vpop.f32.mrb[61].mxu1  ;;  %v1709_v31 = vpop.f32.mrb[61].mxu0 }
 0x194   : > { %v1517_v35 = vadd.f32 %v1516_v3, %v3360_v44  ;;  %v1710_v46 = vadd.f32 %v1709_v31, %v3363_v52  ;;  %v1518_v58 = vpop.f32.mrb[62].mxu1  ;;  %v1711_v30 = vpop.f32.mrb[62].mxu0 }
 0x195   : > { %1882 = vst [vmem:[%s3219_s23 + $0x2b0] sm:$0xff] %v1515_v14  ;;  %1884 = vst [vmem:[%s3219_s23 + $0x2c0] sm:$0xff] %v1708_v51  ;;  %v1519_v55 = vadd.f32 %v1518_v58, %v3352_v47  ;;  %v1712_v62 = vadd.f32 %v1711_v30, %v3355_v11  ;;  %v1520_v56 = vpop.f32.mrb[63].mxu1  ;;  %v1713_v40 = vpop.f32.mrb[63].mxu0 }
 0x196   : > { %1883 = vst [vmem:[%s3219_s23 + $0x2b8] sm:$0xff] %v1517_v35  ;;  %1885 = vst [vmem:[%s3219_s23 + $0x2c8] sm:$0xff] %v1710_v46  ;;  %v1521_v13 = vadd.f32 %v1520_v56, %v3360_v44  ;;  %v1714_v0 = vadd.f32 %v1713_v40, %v3363_v52 }
 0x197   : > { %1888 = vst [vmem:[%s3219_s23 + $0x2e0] sm:$0xff] %v1519_v55  ;;  %1890 = vst [vmem:[%s3219_s23 + $0x2f0] sm:$0xff] %v1712_v62 }
 0x198   : > { %1889 = vst [vmem:[%s3219_s23 + $0x2e8] sm:$0xff] %v1521_v13  ;;  %1891 = vst [vmem:[%s3219_s23 + $0x2f8] sm:$0xff] %v1714_v0 }
 0x19a   : > { %v1524_v41 = vpop.f32.mrb[64].mxu1  ;;  %v1717_v5 = vpop.f32.mrb[64].mxu0 }
 0x19b   : > { %v1525_v59 = vadd.f32 %v1524_v41, %v3352_v47  ;;  %v1718_v18 = vadd.f32 %v1717_v5, %v3355_v11  ;;  %v1526_v20 = vpop.f32.mrb[65].mxu1  ;;  %v1719_v10 = vpop.f32.mrb[65].mxu0 }
 0x19c   : > { %v1527_v12 = vadd.f32 %v1526_v20, %v3360_v44  ;;  %v1720_v38 = vadd.f32 %v1719_v10, %v3363_v52  ;;  %v1528_v45 = vpop.f32.mrb[66].mxu1  ;;  %v1721_v50 = vpop.f32.mrb[66].mxu0 }
 0x19d   : > { %1894 = vst [vmem:[%s3219_s23 + $0x310] sm:$0xff] %v1525_v59  ;;  %1896 = vst [vmem:[%s3219_s23 + $0x320] sm:$0xff] %v1718_v18  ;;  %v1529_v54 = vadd.f32 %v1528_v45, %v3352_v47  ;;  %v1722_v60 = vadd.f32 %v1721_v50, %v3355_v11  ;;  %v1530_v61 = vpop.f32.mrb[67].mxu1  ;;  %v1723_v48 = vpop.f32.mrb[67].mxu0 }
 0x19e   : > { %1895 = vst [vmem:[%s3219_s23 + $0x318] sm:$0xff] %v1527_v12  ;;  %1897 = vst [vmem:[%s3219_s23 + $0x328] sm:$0xff] %v1720_v38  ;;  %v1531_v63 = vadd.f32 %v1530_v61, %v3360_v44  ;;  %v1724_v1 = vadd.f32 %v1723_v48, %v3363_v52 }
 0x19f   : > { %1900 = vst [vmem:[%s3219_s23 + $0x340] sm:$0xff] %v1529_v54  ;;  %1902 = vst [vmem:[%s3219_s23 + $0x350] sm:$0xff] %v1722_v60 }
 0x1a0   : > { %1901 = vst [vmem:[%s3219_s23 + $0x348] sm:$0xff] %v1531_v63  ;;  %1903 = vst [vmem:[%s3219_s23 + $0x358] sm:$0xff] %v1724_v1 }
 0x1a2   : > { %v1534_v4 = vpop.f32.mrb[68].mxu1  ;;  %v1727_v2 = vpop.f32.mrb[68].mxu0 }
 0x1a3   : > { %v1535_v23 = vadd.f32 %v1534_v4, %v3352_v47  ;;  %v1728_v39 = vadd.f32 %v1727_v2, %v3355_v11  ;;  %v1536_v49 = vpop.f32.mrb[69].mxu1  ;;  %v1729_v57 = vpop.f32.mrb[69].mxu0 }
 0x1a4   : > { %v1537_v6 = vadd.f32 %v1536_v49, %v3360_v44  ;;  %v1730_v53 = vadd.f32 %v1729_v57, %v3363_v52  ;;  %v1538_v7 = vpop.f32.mrb[70].mxu1  ;;  %v1731_v9 = vpop.f32.mrb[70].mxu0 }
 0x1a5   : > { %1906 = vst [vmem:[%s3219_s23 + $0x370] sm:$0xff] %v1535_v23  ;;  %1908 = vst [vmem:[%s3219_s23 + $0x380] sm:$0xff] %v1728_v39  ;;  %v1539_v8 = vadd.f32 %v1538_v7, %v3352_v47  ;;  %v1732_v15 = vadd.f32 %v1731_v9, %v3355_v11  ;;  %v1540_v16 = vpop.f32.mrb[71].mxu1  ;;  %v1733_v17 = vpop.f32.mrb[71].mxu0 }
 0x1a6   : > { %1907 = vst [vmem:[%s3219_s23 + $0x378] sm:$0xff] %v1537_v6  ;;  %1909 = vst [vmem:[%s3219_s23 + $0x388] sm:$0xff] %v1730_v53  ;;  %v1541_v19 = vadd.f32 %v1540_v16, %v3360_v44  ;;  %v1734_v21 = vadd.f32 %v1733_v17, %v3363_v52 }
 0x1a7   : > { %1912 = vst [vmem:[%s3219_s23 + $0x3a0] sm:$0xff] %v1539_v8  ;;  %1914 = vst [vmem:[%s3219_s23 + $0x3b0] sm:$0xff] %v1732_v15 }
 0x1a8   : > { %1913 = vst [vmem:[%s3219_s23 + $0x3a8] sm:$0xff] %v1541_v19  ;;  %1915 = vst [vmem:[%s3219_s23 + $0x3b8] sm:$0xff] %v1734_v21 }
 0x1aa   : > { %v1544_v24 = vpop.f32.mrb[72].mxu1  ;;  %v1737_v25 = vpop.f32.mrb[72].mxu0 }
 0x1ab   : > { %v1545_v26 = vadd.f32 %v1544_v24, %v3352_v47  ;;  %v1738_v27 = vadd.f32 %v1737_v25, %v3355_v11  ;;  %v1546_v22 = vpop.f32.mrb[73].mxu1  ;;  %v1739_v29 = vpop.f32.mrb[73].mxu0 }
 0x1ac   : > { %v1547_v34 = vadd.f32 %v1546_v22, %v3360_v44  ;;  %v1740_v36 = vadd.f32 %v1739_v29, %v3363_v52  ;;  %v1548_v28 = vpop.f32.mrb[74].mxu1  ;;  %v1741_v32 = vpop.f32.mrb[74].mxu0 }
 0x1ad   : > { %1918 = vst [vmem:[%s3219_s23 + $0x3d0] sm:$0xff] %v1545_v26  ;;  %1920 = vst [vmem:[%s3219_s23 + $0x3e0] sm:$0xff] %v1738_v27  ;;  %v1549_v33 = vadd.f32 %v1548_v28, %v3352_v47  ;;  %v1742_v42 = vadd.f32 %v1741_v32, %v3355_v11  ;;  %v1550_v37 = vpop.f32.mrb[75].mxu1  ;;  %v1743_v43 = vpop.f32.mrb[75].mxu0 }
 0x1ae   : > { %1919 = vst [vmem:[%s3219_s23 + $0x3d8] sm:$0xff] %v1547_v34  ;;  %1921 = vst [vmem:[%s3219_s23 + $0x3e8] sm:$0xff] %v1740_v36  ;;  %v1551_v14 = vadd.f32 %v1550_v37, %v3360_v44  ;;  %v1744_v51 = vadd.f32 %v1743_v43, %v3363_v52 }
 0x1af   : > { %1924 = vst [vmem:[%s3219_s23 + $0x400] sm:$0xff] %v1549_v33  ;;  %1926 = vst [vmem:[%s3219_s23 + $0x410] sm:$0xff] %v1742_v42 }
 0x1b0   : > { %1925 = vst [vmem:[%s3219_s23 + $0x408] sm:$0xff] %v1551_v14  ;;  %1927 = vst [vmem:[%s3219_s23 + $0x418] sm:$0xff] %v1744_v51 }
 0x1b2   : > { %v1554_v3 = vpop.f32.mrb[76].mxu1  ;;  %v1747_v31 = vpop.f32.mrb[76].mxu0 }
 0x1b3   : > { %v1555_v35 = vadd.f32 %v1554_v3, %v3352_v47  ;;  %v1748_v46 = vadd.f32 %v1747_v31, %v3355_v11  ;;  %v1556_v58 = vpop.f32.mrb[77].mxu1  ;;  %v1749_v30 = vpop.f32.mrb[77].mxu0 }
 0x1b4   : > { %v1557_v55 = vadd.f32 %v1556_v58, %v3360_v44  ;;  %v1750_v62 = vadd.f32 %v1749_v30, %v3363_v52  ;;  %v1558_v56 = vpop.f32.mrb[78].mxu1  ;;  %v1751_v40 = vpop.f32.mrb[78].mxu0 }
 0x1b5   : > { %1930 = vst [vmem:[%s3219_s23 + $0x430] sm:$0xff] %v1555_v35  ;;  %1932 = vst [vmem:[%s3219_s23 + $0x440] sm:$0xff] %v1748_v46  ;;  %v1559_v13 = vadd.f32 %v1558_v56, %v3352_v47  ;;  %v1752_v0 = vadd.f32 %v1751_v40, %v3355_v11  ;;  %v1560_v41 = vpop.f32.mrb[79].mxu1  ;;  %v1753_v5 = vpop.f32.mrb[79].mxu0 }
 0x1b6   : > { %1931 = vst [vmem:[%s3219_s23 + $0x438] sm:$0xff] %v1557_v55  ;;  %1933 = vst [vmem:[%s3219_s23 + $0x448] sm:$0xff] %v1750_v62  ;;  %v1561_v59 = vadd.f32 %v1560_v41, %v3360_v44  ;;  %v1754_v18 = vadd.f32 %v1753_v5, %v3363_v52 }
 0x1b7   : > { %1936 = vst [vmem:[%s3219_s23 + $0x460] sm:$0xff] %v1559_v13  ;;  %1938 = vst [vmem:[%s3219_s23 + $0x470] sm:$0xff] %v1752_v0 }
 0x1b8   : > { %1937 = vst [vmem:[%s3219_s23 + $0x468] sm:$0xff] %v1561_v59  ;;  %1939 = vst [vmem:[%s3219_s23 + $0x478] sm:$0xff] %v1754_v18 }
 0x1ba   : > { %v1564_v20 = vpop.f32.mrb[80].mxu1  ;;  %v1757_v10 = vpop.f32.mrb[80].mxu0 }
 0x1bb   : > { %v1565_v12 = vadd.f32 %v1564_v20, %v3352_v47  ;;  %v1758_v38 = vadd.f32 %v1757_v10, %v3355_v11  ;;  %v1566_v45 = vpop.f32.mrb[81].mxu1  ;;  %v1759_v50 = vpop.f32.mrb[81].mxu0 }
 0x1bc   : > { %v1567_v54 = vadd.f32 %v1566_v45, %v3360_v44  ;;  %v1760_v60 = vadd.f32 %v1759_v50, %v3363_v52  ;;  %v1568_v61 = vpop.f32.mrb[82].mxu1  ;;  %v1761_v48 = vpop.f32.mrb[82].mxu0 }
 0x1bd   : > { %1942 = vst [vmem:[%s3219_s23 + $0x490] sm:$0xff] %v1565_v12  ;;  %1944 = vst [vmem:[%s3219_s23 + $0x4a0] sm:$0xff] %v1758_v38  ;;  %v1569_v63 = vadd.f32 %v1568_v61, %v3352_v47  ;;  %v1762_v1 = vadd.f32 %v1761_v48, %v3355_v11  ;;  %v1570_v4 = vpop.f32.mrb[83].mxu1  ;;  %v1763_v2 = vpop.f32.mrb[83].mxu0 }
 0x1be   : > { %1943 = vst [vmem:[%s3219_s23 + $0x498] sm:$0xff] %v1567_v54  ;;  %1945 = vst [vmem:[%s3219_s23 + $0x4a8] sm:$0xff] %v1760_v60  ;;  %v1571_v23 = vadd.f32 %v1570_v4, %v3360_v44  ;;  %v1764_v39 = vadd.f32 %v1763_v2, %v3363_v52 }
 0x1bf   : > { %1948 = vst [vmem:[%s3219_s23 + $0x4c0] sm:$0xff] %v1569_v63  ;;  %1950 = vst [vmem:[%s3219_s23 + $0x4d0] sm:$0xff] %v1762_v1 }
 0x1c0   : > { %1949 = vst [vmem:[%s3219_s23 + $0x4c8] sm:$0xff] %v1571_v23  ;;  %1951 = vst [vmem:[%s3219_s23 + $0x4d8] sm:$0xff] %v1764_v39 }
 0x1c2   : > { %v1574_v49 = vpop.f32.mrb[84].mxu1  ;;  %v1767_v57 = vpop.f32.mrb[84].mxu0 }
 0x1c3   : > { %v1575_v6 = vadd.f32 %v1574_v49, %v3352_v47  ;;  %v1768_v53 = vadd.f32 %v1767_v57, %v3355_v11  ;;  %v1576_v7 = vpop.f32.mrb[85].mxu1  ;;  %v1769_v9 = vpop.f32.mrb[85].mxu0 }
 0x1c4   : > { %v1577_v8 = vadd.f32 %v1576_v7, %v3360_v44  ;;  %v1770_v15 = vadd.f32 %v1769_v9, %v3363_v52  ;;  %v1578_v16 = vpop.f32.mrb[86].mxu1  ;;  %v1771_v17 = vpop.f32.mrb[86].mxu0 }
 0x1c5   : > { %1954 = vst [vmem:[%s3219_s23 + $0x4f0] sm:$0xff] %v1575_v6  ;;  %1956 = vst [vmem:[%s3219_s23 + $0x500] sm:$0xff] %v1768_v53  ;;  %v1579_v19 = vadd.f32 %v1578_v16, %v3352_v47  ;;  %v1772_v21 = vadd.f32 %v1771_v17, %v3355_v11  ;;  %v1580_v24 = vpop.f32.mrb[87].mxu1  ;;  %v1773_v25 = vpop.f32.mrb[87].mxu0 }
 0x1c6   : > { %1955 = vst [vmem:[%s3219_s23 + $0x4f8] sm:$0xff] %v1577_v8  ;;  %1957 = vst [vmem:[%s3219_s23 + $0x508] sm:$0xff] %v1770_v15  ;;  %v1581_v26 = vadd.f32 %v1580_v24, %v3360_v44  ;;  %v1774_v27 = vadd.f32 %v1773_v25, %v3363_v52 }
 0x1c7   : > { %1960 = vst [vmem:[%s3219_s23 + $0x520] sm:$0xff] %v1579_v19  ;;  %1962 = vst [vmem:[%s3219_s23 + $0x530] sm:$0xff] %v1772_v21 }
 0x1c8   : > { %1961 = vst [vmem:[%s3219_s23 + $0x528] sm:$0xff] %v1581_v26  ;;  %1963 = vst [vmem:[%s3219_s23 + $0x538] sm:$0xff] %v1774_v27 }
 0x1ca   : > { %v1584_v22 = vpop.f32.mrb[88].mxu1  ;;  %v1777_v29 = vpop.f32.mrb[88].mxu0 }
 0x1cb   : > { %v1585_v34 = vadd.f32 %v1584_v22, %v3352_v47  ;;  %v1778_v36 = vadd.f32 %v1777_v29, %v3355_v11  ;;  %v1586_v28 = vpop.f32.mrb[89].mxu1  ;;  %v1779_v32 = vpop.f32.mrb[89].mxu0 }
 0x1cc   : > { %v1587_v33 = vadd.f32 %v1586_v28, %v3360_v44  ;;  %v1780_v42 = vadd.f32 %v1779_v32, %v3363_v52  ;;  %v1588_v37 = vpop.f32.mrb[90].mxu1  ;;  %v1781_v43 = vpop.f32.mrb[90].mxu0 }
 0x1cd   : > { %1966 = vst [vmem:[%s3219_s23 + $0x550] sm:$0xff] %v1585_v34  ;;  %1968 = vst [vmem:[%s3219_s23 + $0x560] sm:$0xff] %v1778_v36  ;;  %v1589_v14 = vadd.f32 %v1588_v37, %v3352_v47  ;;  %v1782_v51 = vadd.f32 %v1781_v43, %v3355_v11  ;;  %v1590_v3 = vpop.f32.mrb[91].mxu1  ;;  %v1783_v31 = vpop.f32.mrb[91].mxu0 }
 0x1ce   : > { %1967 = vst [vmem:[%s3219_s23 + $0x558] sm:$0xff] %v1587_v33  ;;  %1969 = vst [vmem:[%s3219_s23 + $0x568] sm:$0xff] %v1780_v42  ;;  %v1591_v35 = vadd.f32 %v1590_v3, %v3360_v44  ;;  %v1784_v46 = vadd.f32 %v1783_v31, %v3363_v52 }
 0x1cf   : > { %1972 = vst [vmem:[%s3219_s23 + $0x580] sm:$0xff] %v1589_v14  ;;  %1974 = vst [vmem:[%s3219_s23 + $0x590] sm:$0xff] %v1782_v51 }
 0x1d0   : > { %1973 = vst [vmem:[%s3219_s23 + $0x588] sm:$0xff] %v1591_v35  ;;  %1975 = vst [vmem:[%s3219_s23 + $0x598] sm:$0xff] %v1784_v46 }
 0x1d2   : > { %v1594_v58 = vpop.f32.mrb[92].mxu1  ;;  %v1787_v30 = vpop.f32.mrb[92].mxu0 }
 0x1d3   : > { %v1595_v55 = vadd.f32 %v1594_v58, %v3352_v47  ;;  %v1788_v62 = vadd.f32 %v1787_v30, %v3355_v11  ;;  %v1596_v56 = vpop.f32.mrb[93].mxu1  ;;  %v1789_v40 = vpop.f32.mrb[93].mxu0 }
 0x1d4   : > { %v1597_v13 = vadd.f32 %v1596_v56, %v3360_v44  ;;  %v1790_v0 = vadd.f32 %v1789_v40, %v3363_v52  ;;  %v1598_v41 = vpop.f32.mrb[94].mxu1  ;;  %v1791_v5 = vpop.f32.mrb[94].mxu0 }
 0x1d5   : > { %1978 = vst [vmem:[%s3219_s23 + $0x5b0] sm:$0xff] %v1595_v55  ;;  %1980 = vst [vmem:[%s3219_s23 + $0x5c0] sm:$0xff] %v1788_v62  ;;  %v1599_v59 = vadd.f32 %v1598_v41, %v3352_v47  ;;  %v1792_v18 = vadd.f32 %v1791_v5, %v3355_v11  ;;  %v1600_v20 = vpop.f32.mrb[95].mxu1  ;;  %v1793_v10 = vpop.f32.mrb[95].mxu0 }
 0x1d6   : > { %1979 = vst [vmem:[%s3219_s23 + $0x5b8] sm:$0xff] %v1597_v13  ;;  %1981 = vst [vmem:[%s3219_s23 + $0x5c8] sm:$0xff] %v1790_v0  ;;  %v1601_v12 = vadd.f32 %v1600_v20, %v3360_v44  ;;  %v1794_v38 = vadd.f32 %v1793_v10, %v3363_v52 }
 0x1d7   : > { %1984 = vst [vmem:[%s3219_s23 + $0x5e0] sm:$0xff] %v1599_v59  ;;  %1986 = vst [vmem:[%s3219_s23 + $0x5f0] sm:$0xff] %v1792_v18 }
 0x1d8   : > { %1985 = vst [vmem:[%s3219_s23 + $0x5e8] sm:$0xff] %v1601_v12  ;;  %1987 = vst [vmem:[%s3219_s23 + $0x5f8] sm:$0xff] %v1794_v38 }
 0x1d9 PF: > { %s15_s20 = sadd.s32 1, %s2433_s20   ;;  %s3636_s18 = smov %s2429_s19 }
 0x1da   : > { %p12_p5 = scmp.ge.s32.totalorder %s15_s20, 4   ;;  %s3637_s19 = smov %s3639_s21 }
 0x1dc   :  { %14 = sbr.rel (!%p12_p5) target bundleno = 2 (0x2), region = 76 }

// kernel: sczgcl_mse_forward.2
= control target key start
LH: loop header
LB: loop body
LE: loop exit
PB: predicated region body
PF: predicated region fallthrough
CT: control target
= control target key end

     0   :  { %s4498_s27 = smov 0   ;;  %s4500_s28 = smov 0   ;;  %s5587_s0 = inlined_call_operand.vmem [shape: bf16[512,768], index: 0, kind: input, shape index: {}]   ;;  %s5588_s1 = inlined_call_operand.vmem [shape: bf16[768,256], index: 1, kind: input, shape index: {}]   ;;  %s5589_s2 = inlined_call_operand.vmem [shape: f32[1,256], index: 2, kind: input, shape index: {}]   ;;  %s5590_s3 = inlined_call_operand.vmem [shape: bf16[256,128], index: 3, kind: input, shape index: {}]   ;;  %s5591_s4 = inlined_call_operand.vmem [shape: f32[1,128], index: 4, kind: input, shape index: {}]   ;;  %s5592_s5 = inlined_call_operand.vmem [shape: bf16[256,256], index: 5, kind: input, shape index: {}]   ;;  %s5593_s6 = inlined_call_operand.vmem [shape: f32[1,256], index: 6, kind: input, shape index: {}]   ;;  %s5594_s7 = inlined_call_operand.vmem [shape: f32[512,128], index: 7, kind: output, shape index: {0}]   ;;  %s5595_s8 = inlined_call_operand.vmem [shape: f32[512,256], index: 8, kind: output, shape index: {1}]  }
   0x1   :  { %s4502_s29 = smov 0  }
   0x2 LB: > { %s31_s30 = sadd.s32 1, %s4447_s28  ;;  %p3528_p0 = scmp.ge.s32.totalorder %s4451_s29, 1  ;;  %s4451_s29 = sphi %s4502_s29, %s19_s29   ;;  %s4447_s28 = sphi %s4500_s28, %s5608_s28   ;;  %s4443_s27 = sphi %s4498_s27, %s5607_s27  }
   0x3   : > { %p33_p1 = scmp.ge.s32.totalorder %s31_s30, 2  ;;  %p298_p2 = scmp.lt.s32.totalorder %s4451_s29, 3 }
   0x5   : > { %s5610_s30 = smov (%p33_p1, %s31_s30), 0  ;;  %p299_p3 = pnand %p3528_p0, %p298_p2 }
   0x7   : > { %302 = sbr.rel (%p299_p3) target bundleno = 961 (0x3c1), region = 48 }
   0xe   : > { %v4077_v0 = vld [vmem:[%s5588_s1 + $0x4] ss:$8 sps:$4 sm:$0xff]   ;;  %v4079_v1 = vld [vmem:[%s5588_s1] ss:$8 sps:$4 sm:$0xff]   ;;  %v4080_v2 = vld [vmem:[%s5588_s1 + $0x14] ss:$8 sps:$4 sm:$0xff]  }
   0xf   : > { %1666 = vmatprep.subr.bf16.mxu0 %v4077_v0  ;;  %3892 = vmatprep.subr.bf16.mxu1 %v4077_v0  ;;  %v4082_v3 = vld [vmem:[%s5588_s1 + $0x10] ss:$8 sps:$4 sm:$0xff]   ;;  %v4083_v4 = vld [vmem:[%s5588_s1 + $0x24] ss:$8 sps:$4 sm:$0xff]   ;;  %s3529_s19 = sshll.u32 %s4443_s27, 5 }
  0x10   : > { %1667 = vmatpush1.bf16.msra.mxu0 %v4079_v1  ;;  %3908 = vmatpush1.bf16.msra.mxu1 %v4079_v1  ;;  %v4085_v5 = vld [vmem:[%s5588_s1 + $0x20] ss:$8 sps:$4 sm:$0xff]   ;;  %p351_p4 = scmp.lt.s32.totalorder %s3529_s19, 63  ;;  %v4086_v6 = vld [vmem:[%s5588_s1 + $0x34] ss:$8 sps:$4 sm:$0xff]  }
  0x11   : > { %1668 = vmatprep.subr.bf16.mxu0 %v4080_v2  ;;  %3893 = vmatprep.subr.bf16.mxu1 %v4080_v2  ;;  %v4088_v7 = vld [vmem:[%s5588_s1 + $0x30] ss:$8 sps:$4 sm:$0xff]   ;;  %v4089_v8 = vld [vmem:[%s5588_s1 + $0x44] ss:$8 sps:$4 sm:$0xff]   ;;  %v4091_v9 = vld [vmem:[%s5588_s1 + $0x40] ss:$8 sps:$4 sm:$0xff]  }
  0x12   : > { %s5612_s19 = smov (!%p351_p4, %s3529_s19), 63  ;;  %v4092_v10 = vld [vmem:[%s5588_s1 + $0x54] ss:$8 sps:$4 sm:$0xff]   ;;  %v4094_v11 = vld [vmem:[%s5588_s1 + $0x50] ss:$8 sps:$4 sm:$0xff]  }
  0x13   : > { %s4052_s11 = smul.u32 24, %s5612_s19  ;;  %v4095_v12 = vld [vmem:[%s5588_s1 + $0x64] ss:$8 sps:$4 sm:$0xff]   ;;  %v4097_v14 = vld [vmem:[%s5588_s1 + $0x60] ss:$8 sps:$4 sm:$0xff]   ;;  %s3532_s27 = sshll.u32 %s5612_s19, 3 }
  0x14   : > { %1669 = vmatpush1.bf16.msra.mxu0 %v4082_v3  ;;  %3909 = vmatpush1.bf16.msra.mxu1 %v4082_v3  ;;  %v4098_v15 = vld [vmem:[%s5588_s1 + $0x74] ss:$8 sps:$4 sm:$0xff]   ;;  %v4100_v16 = vld [vmem:[%s5588_s1 + $0x70] ss:$8 sps:$4 sm:$0xff]   ;;  %v4101_v17 = vld [vmem:[%s5588_s1 + $0x84] ss:$8 sps:$4 sm:$0xff]   ;;  %s5358_s13 = scalar_lea.vmem %s5594_s7, %s3532_s27 }
  0x15   : > { %1670 = vmatprep.subr.bf16.mxu0 %v4083_v4  ;;  %3894 = vmatprep.subr.bf16.mxu1 %v4083_v4  ;;  %s4561_s18 = scalar_lea.vmem %s5587_s0, %s4052_s11  ;;  %v4103_v18 = vld [vmem:[%s5588_s1 + $0x80] ss:$8 sps:$4 sm:$0xff]   ;;  %v4104_v19 = vld [vmem:[%s5588_s1 + $0x94] ss:$8 sps:$4 sm:$0xff]   ;;  %v4106_v20 = vld [vmem:[%s5588_s1 + $0x90] ss:$8 sps:$4 sm:$0xff]  }
  0x16   : > { %v4127_v13 = vld [vmem:[%s4561_s18 + $0x4] ss:$24 sps:$4 sm:$0xff]   ;;  %v4109_v22 = vld [vmem:[%s5588_s1 + $0xa0] ss:$8 sps:$4 sm:$0xff]   ;;  %v4112_v24 = vld [vmem:[%s5588_s1 + $0xb0] ss:$8 sps:$4 sm:$0xff]  }
  0x17   : > { %1698 = vmatprep.mubr.bf16.mxu0 %v4127_v13  ;;  %v4107_v21 = vld [vmem:[%s5588_s1 + $0xa4] ss:$8 sps:$4 sm:$0xff]   ;;  %v4110_v23 = vld [vmem:[%s5588_s1 + $0xb4] ss:$8 sps:$4 sm:$0xff]   ;;  %v4115_v26 = vld [vmem:[%s5588_s1 + $0xc0] ss:$8 sps:$4 sm:$0xff]  }
  0x18   : > { %1671 = vmatpush1.bf16.msra.mxu0 %v4085_v5  ;;  %3910 = vmatpush1.bf16.msra.mxu1 %v4085_v5  ;;  %v4113_v25 = vld [vmem:[%s5588_s1 + $0xc4] ss:$8 sps:$4 sm:$0xff]   ;;  %v4116_v27 = vld [vmem:[%s5588_s1 + $0xd4] ss:$8 sps:$4 sm:$0xff]   ;;  %v4118_v28 = vld [vmem:[%s5588_s1 + $0xd0] ss:$8 sps:$4 sm:$0xff]  }
  0x19   : > { %1672 = vmatprep.subr.bf16.mxu0 %v4086_v6  ;;  %3895 = vmatprep.subr.bf16.mxu1 %v4086_v6  ;;  %v4119_v29 = vld [vmem:[%s5588_s1 + $0xe4] ss:$8 sps:$4 sm:$0xff]   ;;  %v4121_v30 = vld [vmem:[%s5588_s1 + $0xe0] ss:$8 sps:$4 sm:$0xff]   ;;  %v4122_v31 = vld [vmem:[%s5588_s1 + $0xf4] ss:$8 sps:$4 sm:$0xff]  }
  0x1a   : > { %v4124_v32 = vld [vmem:[%s5588_s1 + $0xf0] ss:$8 sps:$4 sm:$0xff]   ;;  %v4130_v33 = vld [vmem:[%s5588_s1 + $0x104] ss:$8 sps:$4 sm:$0xff]   ;;  %v4128_v35 = vld [vmem:[%s5588_s1 + $0x100] ss:$8 sps:$4 sm:$0xff]  }
  0x1b   : > { %v4125_v34 = vld [vmem:[%s4561_s18] ss:$24 sps:$4 sm:$0xff]   ;;  %v4134_v36 = vld [vmem:[%s4561_s18 + $0x34] ss:$24 sps:$4 sm:$0xff]   ;;  %v4136_v40 = vld [vmem:[%s4561_s18 + $0x30] ss:$24 sps:$4 sm:$0xff]  }
  0x1c   : > { %1673 = vmatpush1.bf16.msra.mxu0 %v4088_v7  ;;  %3911 = vmatpush1.bf16.msra.mxu1 %v4088_v7  ;;  %v4133_v37 = vld [vmem:[%s5588_s1 + $0x114] ss:$8 sps:$4 sm:$0xff]   ;;  %v4131_v38 = vld [vmem:[%s5588_s1 + $0x110] ss:$8 sps:$4 sm:$0xff]   ;;  %v4139_v39 = vld [vmem:[%s5588_s1 + $0x124] ss:$8 sps:$4 sm:$0xff]  }
  0x1d   : > { %1674 = vmatprep.subr.bf16.mxu0 %v4089_v8  ;;  %3896 = vmatprep.subr.bf16.mxu1 %v4089_v8  ;;  %v4137_v41 = vld [vmem:[%s5588_s1 + $0x120] ss:$8 sps:$4 sm:$0xff]   ;;  %v4143_v42 = vld [vmem:[%s4561_s18 + $0x64] ss:$24 sps:$4 sm:$0xff]   ;;  %v4140_v44 = vld [vmem:[%s5588_s1 + $0x130] ss:$8 sps:$4 sm:$0xff]  }
  0x1e   : > { %v4142_v43 = vld [vmem:[%s5588_s1 + $0x134] ss:$8 sps:$4 sm:$0xff]   ;;  %v4148_v45 = vld [vmem:[%s5588_s1 + $0x144] ss:$8 sps:$4 sm:$0xff]   ;;  %v4145_v46 = vld [vmem:[%s4561_s18 + $0x60] ss:$24 sps:$4 sm:$0xff]  }
  0x1f   : > { %v4146_v47 = vld [vmem:[%s5588_s1 + $0x140] ss:$8 sps:$4 sm:$0xff]   ;;  %v4152_v48 = vld [vmem:[%s4561_s18 + $0x94] ss:$24 sps:$4 sm:$0xff]   ;;  %v4149_v50 = vld [vmem:[%s5588_s1 + $0x150] ss:$8 sps:$4 sm:$0xff]  }
  0x20   : > { %1675 = vmatpush1.bf16.msra.mxu0 %v4091_v9  ;;  %3912 = vmatpush1.bf16.msra.mxu1 %v4091_v9  ;;  %v4151_v49 = vld [vmem:[%s5588_s1 + $0x154] ss:$8 sps:$4 sm:$0xff]   ;;  %v4157_v51 = vld [vmem:[%s5588_s1 + $0x164] ss:$8 sps:$4 sm:$0xff]   ;;  %v4154_v52 = vld [vmem:[%s4561_s18 + $0x90] ss:$24 sps:$4 sm:$0xff]  }
  0x21   : > { %1676 = vmatprep.subr.bf16.mxu0 %v4092_v10  ;;  %3897 = vmatprep.subr.bf16.mxu1 %v4092_v10  ;;  %v4155_v53 = vld [vmem:[%s5588_s1 + $0x160] ss:$8 sps:$4 sm:$0xff]   ;;  %v4161_v54 = vld [vmem:[%s4561_s18 + $0xc4] ss:$24 sps:$4 sm:$0xff]   ;;  %v4158_v56 = vld [vmem:[%s5588_s1 + $0x170] ss:$8 sps:$4 sm:$0xff]  }
  0x22   : > { %v4160_v55 = vld [vmem:[%s5588_s1 + $0x174] ss:$8 sps:$4 sm:$0xff]   ;;  %v4166_v57 = vld [vmem:[%s5588_s1 + $0x184] ss:$8 sps:$4 sm:$0xff]   ;;  %v4163_v58 = vld [vmem:[%s4561_s18 + $0xc0] ss:$24 sps:$4 sm:$0xff]  }
  0x23   : > { %v4164_v59 = vld [vmem:[%s5588_s1 + $0x180] ss:$8 sps:$4 sm:$0xff]   ;;  %v4170_v60 = vld [vmem:[%s4561_s18 + $0xf4] ss:$24 sps:$4 sm:$0xff]   ;;  %v4167_v62 = vld [vmem:[%s5588_s1 + $0x190] ss:$8 sps:$4 sm:$0xff]  }
  0x24   : > { %1677 = vmatpush1.bf16.msra.mxu0 %v4094_v11  ;;  %3913 = vmatpush1.bf16.msra.mxu1 %v4094_v11  ;;  %v4169_v61 = vld [vmem:[%s5588_s1 + $0x194] ss:$8 sps:$4 sm:$0xff]   ;;  %v4175_v63 = vld [vmem:[%s5588_s1 + $0x1a4] ss:$8 sps:$4 sm:$0xff]   ;;  %v4172_v0 = vld [vmem:[%s4561_s18 + $0xf0] ss:$24 sps:$4 sm:$0xff]  }
  0x25   : > { %1678 = vmatprep.subr.bf16.mxu0 %v4095_v12  ;;  %3898 = vmatprep.subr.bf16.mxu1 %v4095_v12  ;;  %v4173_v1 = vld [vmem:[%s5588_s1 + $0x1a0] ss:$8 sps:$4 sm:$0xff]   ;;  %v4179_v2 = vld [vmem:[%s4561_s18 + $0x124] ss:$24 sps:$4 sm:$0xff]   ;;  %v4176_v4 = vld [vmem:[%s5588_s1 + $0x1b0] ss:$8 sps:$4 sm:$0xff]  }
  0x26   : > { %v4178_v3 = vld [vmem:[%s5588_s1 + $0x1b4] ss:$8 sps:$4 sm:$0xff]   ;;  %v4184_v5 = vld [vmem:[%s5588_s1 + $0x1c4] ss:$8 sps:$4 sm:$0xff]   ;;  %v4181_v6 = vld [vmem:[%s4561_s18 + $0x120] ss:$24 sps:$4 sm:$0xff]  }
  0x27   : > { %v4182_v7 = vld [vmem:[%s5588_s1 + $0x1c0] ss:$8 sps:$4 sm:$0xff]   ;;  %v4188_v8 = vld [vmem:[%s4561_s18 + $0x154] ss:$24 sps:$4 sm:$0xff]   ;;  %v4185_v10 = vld [vmem:[%s5588_s1 + $0x1d0] ss:$8 sps:$4 sm:$0xff]  }
  0x28   : > { %1679 = vmatpush1.bf16.msra.mxu0 %v4097_v14  ;;  %3914 = vmatpush1.bf16.msra.mxu1 %v4097_v14  ;;  %v4187_v9 = vld [vmem:[%s5588_s1 + $0x1d4] ss:$8 sps:$4 sm:$0xff]   ;;  %v4193_v11 = vld [vmem:[%s5588_s1 + $0x1e4] ss:$8 sps:$4 sm:$0xff]   ;;  %v4190_v12 = vld [vmem:[%s4561_s18 + $0x150] ss:$24 sps:$4 sm:$0xff]  }
  0x29   : > { %1680 = vmatprep.subr.bf16.mxu0 %v4098_v15  ;;  %3899 = vmatprep.subr.bf16.mxu1 %v4098_v15  ;;  %v4191_v13 = vld [vmem:[%s5588_s1 + $0x1e0] ss:$8 sps:$4 sm:$0xff]   ;;  %v4199_v14 = vld [vmem:[%s4561_s18 + $0xc] ss:$24 sps:$4 sm:$0xff]   ;;  %v4196_v15 = vld [vmem:[%s5588_s1 + $0x1f4] ss:$8 sps:$4 sm:$0xff]  }
  0x2c   : > { %1681 = vmatpush1.bf16.msra.mxu0 %v4100_v16  ;;  %3915 = vmatpush1.bf16.msra.mxu1 %v4100_v16  ;;  %v4194_v16 = vld [vmem:[%s5588_s1 + $0x1f0] ss:$8 sps:$4 sm:$0xff]  }
  0x2d   : > { %1682 = vmatprep.subr.bf16.mxu0 %v4101_v17  ;;  %3900 = vmatprep.subr.bf16.mxu1 %v4101_v17  ;;  %v4202_v17 = vld [vmem:[%s5588_s1 + $0x204] ss:$8 sps:$4 sm:$0xff]  }
  0x30   : > { %1683 = vmatpush1.bf16.msra.mxu0 %v4103_v18  ;;  %3916 = vmatpush1.bf16.msra.mxu1 %v4103_v18  ;;  %v4197_v18 = vld [vmem:[%s4561_s18 + $0x8] ss:$24 sps:$4 sm:$0xff]  }
  0x31   : > { %1684 = vmatprep.subr.bf16.mxu0 %v4104_v19  ;;  %3901 = vmatprep.subr.bf16.mxu1 %v4104_v19  ;;  %v4200_v19 = vld [vmem:[%s5588_s1 + $0x200] ss:$8 sps:$4 sm:$0xff]  }
  0x34   : > { %1685 = vmatpush1.bf16.msra.mxu0 %v4106_v20  ;;  %3917 = vmatpush1.bf16.msra.mxu1 %v4106_v20  ;;  %v4203_v20 = vld [vmem:[%s4561_s18 + $0x3c] ss:$24 sps:$4 sm:$0xff]  }
  0x35   : > { %1686 = vmatprep.subr.bf16.mxu0 %v4107_v21  ;;  %3902 = vmatprep.subr.bf16.mxu1 %v4107_v21  ;;  %v4208_v21 = vld [vmem:[%s5588_s1 + $0x214] ss:$8 sps:$4 sm:$0xff]  }
  0x38   : > { %1687 = vmatpush1.bf16.msra.mxu0 %v4109_v22  ;;  %3918 = vmatpush1.bf16.msra.mxu1 %v4109_v22  ;;  %v4206_v22 = vld [vmem:[%s5588_s1 + $0x210] ss:$8 sps:$4 sm:$0xff]  }
  0x39   : > { %1688 = vmatprep.subr.bf16.mxu0 %v4110_v23  ;;  %3903 = vmatprep.subr.bf16.mxu1 %v4110_v23  ;;  %v4214_v23 = vld [vmem:[%s5588_s1 + $0x224] ss:$8 sps:$4 sm:$0xff]  }
  0x3c   : > { %1689 = vmatpush1.bf16.msra.mxu0 %v4112_v24  ;;  %3919 = vmatpush1.bf16.msra.mxu1 %v4112_v24  ;;  %v4205_v24 = vld [vmem:[%s4561_s18 + $0x38] ss:$24 sps:$4 sm:$0xff]  }
  0x3d   : > { %1690 = vmatprep.subr.bf16.mxu0 %v4113_v25  ;;  %3904 = vmatprep.subr.bf16.mxu1 %v4113_v25  ;;  %v4209_v25 = vld [vmem:[%s4561_s18 + $0x6c] ss:$24 sps:$4 sm:$0xff]  }
  0x40   : > { %1691 = vmatpush1.bf16.msra.mxu0 %v4115_v26  ;;  %3920 = vmatpush1.bf16.msra.mxu1 %v4115_v26  ;;  %v4212_v26 = vld [vmem:[%s5588_s1 + $0x220] ss:$8 sps:$4 sm:$0xff]  }
  0x41   : > { %1692 = vmatprep.subr.bf16.mxu0 %v4116_v27  ;;  %3905 = vmatprep.subr.bf16.mxu1 %v4116_v27  ;;  %v4220_v27 = vld [vmem:[%s5588_s1 + $0x234] ss:$8 sps:$4 sm:$0xff]  }
  0x44   : > { %1693 = vmatpush1.bf16.msra.mxu0 %v4118_v28  ;;  %3921 = vmatpush1.bf16.msra.mxu1 %v4118_v28  ;;  %v4218_v28 = vld [vmem:[%s5588_s1 + $0x230] ss:$8 sps:$4 sm:$0xff]  }
  0x45   : > { %1694 = vmatprep.subr.bf16.mxu0 %v4119_v29  ;;  %3906 = vmatprep.subr.bf16.mxu1 %v4119_v29  ;;  %v4226_v29 = vld [vmem:[%s5588_s1 + $0x244] ss:$8 sps:$4 sm:$0xff]  }
  0x48   : > { %1695 = vmatpush1.bf16.msra.mxu0 %v4121_v30  ;;  %3922 = vmatpush1.bf16.msra.mxu1 %v4121_v30  ;;  %v4211_v30 = vld [vmem:[%s4561_s18 + $0x68] ss:$24 sps:$4 sm:$0xff]  }
  0x49   : > { %1696 = vmatprep.subr.bf16.mxu0 %v4122_v31  ;;  %3907 = vmatprep.subr.bf16.mxu1 %v4122_v31  ;;  %v4215_v31 = vld [vmem:[%s4561_s18 + $0x9c] ss:$24 sps:$4 sm:$0xff]  }
  0x4c   : > { %1697 = vmatpush1.bf16.msra.mxu0 %v4124_v32  ;;  %3923 = vmatpush1.bf16.msra.mxu1 %v4124_v32  ;;  %v4224_v32 = vld [vmem:[%s5588_s1 + $0x240] ss:$8 sps:$4 sm:$0xff]  }
  0x4d   : > { %1859 = vmatprep.subr.bf16.mxu0 %v4130_v33  ;;  %v4232_v33 = vld [vmem:[%s5588_s1 + $0x254] ss:$8 sps:$4 sm:$0xff]  }
  0x4f   : > { %1699 = vmatmul.mubr.bf16.vlgmr.msra.gmra.mrb[0].mxu0 %v4125_v34  ;;  %v4230_v34 = vld [vmem:[%s5588_s1 + $0x250] ss:$8 sps:$4 sm:$0xff]  }
  0x50   : > { %1860 = vmatpush1.bf16.msra.mxu0 %v4128_v35  ;;  %1708 = vmatprep.mubr.bf16.mxu0 %v4134_v36  ;;  %v4238_v35 = vld [vmem:[%s5588_s1 + $0x264] ss:$8 sps:$4 sm:$0xff]   ;;  %v4217_v36 = vld [vmem:[%s4561_s18 + $0x98] ss:$24 sps:$4 sm:$0xff]  }
  0x51   : > { %1861 = vmatprep.subr.bf16.mxu0 %v4133_v37  ;;  %v4221_v37 = vld [vmem:[%s4561_s18 + $0xcc] ss:$24 sps:$4 sm:$0xff]  }
  0x54   : > { %1862 = vmatpush1.bf16.msra.mxu0 %v4131_v38  ;;  %v4236_v38 = vld [vmem:[%s5588_s1 + $0x260] ss:$8 sps:$4 sm:$0xff]  }
  0x55   : > { %1863 = vmatprep.subr.bf16.mxu0 %v4139_v39  ;;  %v4244_v39 = vld [vmem:[%s5588_s1 + $0x274] ss:$8 sps:$4 sm:$0xff]  }
  0x57   : > { %1709 = vmatmul.mubr.bf16.gmra.mrb[4].mxu0 %v4136_v40  ;;  %v4242_v40 = vld [vmem:[%s5588_s1 + $0x270] ss:$8 sps:$4 sm:$0xff]  }
  0x58   : > { %1864 = vmatpush1.bf16.msra.mxu0 %v4137_v41  ;;  %1718 = vmatprep.mubr.bf16.mxu0 %v4143_v42  ;;  %v4250_v41 = vld [vmem:[%s5588_s1 + $0x284] ss:$8 sps:$4 sm:$0xff]   ;;  %v4223_v42 = vld [vmem:[%s4561_s18 + $0xc8] ss:$24 sps:$4 sm:$0xff]  }
  0x59   : > { %1865 = vmatprep.subr.bf16.mxu0 %v4142_v43  ;;  %v4227_v43 = vld [vmem:[%s4561_s18 + $0xfc] ss:$24 sps:$4 sm:$0xff]  }
  0x5c   : > { %1866 = vmatpush1.bf16.msra.mxu0 %v4140_v44  ;;  %v4248_v44 = vld [vmem:[%s5588_s1 + $0x280] ss:$8 sps:$4 sm:$0xff]  }
  0x5d   : > { %1867 = vmatprep.subr.bf16.mxu0 %v4148_v45  ;;  %v4256_v45 = vld [vmem:[%s5588_s1 + $0x294] ss:$8 sps:$4 sm:$0xff]  }
  0x5f   : > { %1719 = vmatmul.mubr.bf16.gmra.mrb[8].mxu0 %v4145_v46  ;;  %v4254_v46 = vld [vmem:[%s5588_s1 + $0x290] ss:$8 sps:$4 sm:$0xff]  }
  0x60   : > { %1868 = vmatpush1.bf16.msra.mxu0 %v4146_v47  ;;  %1728 = vmatprep.mubr.bf16.mxu0 %v4152_v48  ;;  %v4262_v47 = vld [vmem:[%s5588_s1 + $0x2a4] ss:$8 sps:$4 sm:$0xff]   ;;  %v4229_v48 = vld [vmem:[%s4561_s18 + $0xf8] ss:$24 sps:$4 sm:$0xff]  }
  0x61   : > { %1869 = vmatprep.subr.bf16.mxu0 %v4151_v49  ;;  %v4233_v49 = vld [vmem:[%s4561_s18 + $0x12c] ss:$24 sps:$4 sm:$0xff]  }
  0x64   : > { %1870 = vmatpush1.bf16.msra.mxu0 %v4149_v50  ;;  %v4260_v50 = vld [vmem:[%s5588_s1 + $0x2a0] ss:$8 sps:$4 sm:$0xff]  }
  0x65   : > { %1871 = vmatprep.subr.bf16.mxu0 %v4157_v51  ;;  %v4268_v51 = vld [vmem:[%s5588_s1 + $0x2b4] ss:$8 sps:$4 sm:$0xff]  }
  0x67   : > { %1729 = vmatmul.mubr.bf16.gmra.mrb[12].mxu0 %v4154_v52  ;;  %v4266_v52 = vld [vmem:[%s5588_s1 + $0x2b0] ss:$8 sps:$4 sm:$0xff]  }
  0x68   : > { %1872 = vmatpush1.bf16.msra.mxu0 %v4155_v53  ;;  %1738 = vmatprep.mubr.bf16.mxu0 %v4161_v54  ;;  %v4274_v53 = vld [vmem:[%s5588_s1 + $0x2c4] ss:$8 sps:$4 sm:$0xff]   ;;  %v4235_v54 = vld [vmem:[%s4561_s18 + $0x128] ss:$24 sps:$4 sm:$0xff]  }
  0x69   : > { %1873 = vmatprep.subr.bf16.mxu0 %v4160_v55  ;;  %v4239_v55 = vld [vmem:[%s4561_s18 + $0x15c] ss:$24 sps:$4 sm:$0xff]  }
  0x6c   : > { %1874 = vmatpush1.bf16.msra.mxu0 %v4158_v56  ;;  %v4272_v56 = vld [vmem:[%s5588_s1 + $0x2c0] ss:$8 sps:$4 sm:$0xff]  }
  0x6d   : > { %1875 = vmatprep.subr.bf16.mxu0 %v4166_v57  ;;  %v4280_v57 = vld [vmem:[%s5588_s1 + $0x2d4] ss:$8 sps:$4 sm:$0xff]  }
  0x6f   : > { %1739 = vmatmul.mubr.bf16.gmra.mrb[16].mxu0 %v4163_v58  ;;  %v4278_v58 = vld [vmem:[%s5588_s1 + $0x2d0] ss:$8 sps:$4 sm:$0xff]  }
  0x70   : > { %1876 = vmatpush1.bf16.msra.mxu0 %v4164_v59  ;;  %1748 = vmatprep.mubr.bf16.mxu0 %v4170_v60  ;;  %v4286_v59 = vld [vmem:[%s5588_s1 + $0x2e4] ss:$8 sps:$4 sm:$0xff]   ;;  %v4241_v60 = vld [vmem:[%s4561_s18 + $0x158] ss:$24 sps:$4 sm:$0xff]  }
  0x71   : > { %1877 = vmatprep.subr.bf16.mxu0 %v4169_v61  ;;  %v4245_v61 = vld [vmem:[%s4561_s18 + $0x18c] ss:$24 sps:$4 sm:$0xff]  }
  0x74   : > { %1878 = vmatpush1.bf16.msra.mxu0 %v4167_v62  ;;  %v4284_v62 = vld [vmem:[%s5588_s1 + $0x2e0] ss:$8 sps:$4 sm:$0xff]  }
  0x75   : > { %1879 = vmatprep.subr.bf16.mxu0 %v4175_v63  ;;  %v4292_v63 = vld [vmem:[%s5588_s1 + $0x2f4] ss:$8 sps:$4 sm:$0xff]  }
  0x77   : > { %1749 = vmatmul.mubr.bf16.gmra.mrb[20].mxu0 %v4172_v0  ;;  %v4317_v0 = vld [vmem:[%s4561_s18 + $0x180] ss:$24 sps:$4 sm:$0xff]  }
  0x78   : > { %1880 = vmatpush1.bf16.msra.mxu0 %v4173_v1  ;;  %1758 = vmatprep.mubr.bf16.mxu0 %v4179_v2  ;;  %v4319_v1 = vld [vmem:[%s4561_s18 + $0x184] ss:$24 sps:$4 sm:$0xff]   ;;  %v4290_v2 = vld [vmem:[%s5588_s1 + $0x2f0] ss:$8 sps:$4 sm:$0xff]  }
  0x79   : > { %1881 = vmatprep.subr.bf16.mxu0 %v4178_v3  ;;  %1778 = vmatprep.mubr.bf16.mxu1 %v4319_v1  ;;  %v4247_v3 = vld [vmem:[%s4561_s18 + $0x188] ss:$24 sps:$4 sm:$0xff]  }
  0x7a   : > { %1779 = vmatmul.mubr.bf16.vlgmr.msra.gmra.mrb[0].mxu1 %v4317_v0  ;;  %v4326_v0 = vld [vmem:[%s4561_s18 + $0x1c4] ss:$24 sps:$4 sm:$0xff]   ;;  %v4328_v1 = vld [vmem:[%s4561_s18 + $0x1c0] ss:$24 sps:$4 sm:$0xff]  }
  0x7c   : > { %1882 = vmatpush1.bf16.msra.mxu0 %v4176_v4  ;;  %v4251_v4 = vld [vmem:[%s4561_s18 + $0x1bc] ss:$24 sps:$4 sm:$0xff]  }
  0x7d   : > { %1883 = vmatprep.subr.bf16.mxu0 %v4184_v5  ;;  %v4323_v5 = vld [vmem:[%s4561_s18 + $0x1b4] ss:$24 sps:$4 sm:$0xff]  }
  0x7e   : > { %1788 = vmatprep.mubr.bf16.mxu1 %v4323_v5  ;;  %v4340_v5 = vld [vmem:[%s4561_s18 + $0x220] ss:$24 sps:$4 sm:$0xff]  }
  0x7f   : > { %1759 = vmatmul.mubr.bf16.gmra.mrb[24].mxu0 %v4181_v6  ;;  %v4325_v6 = vld [vmem:[%s4561_s18 + $0x1b0] ss:$24 sps:$4 sm:$0xff]  }
  0x80   : > { %1884 = vmatpush1.bf16.msra.mxu0 %v4182_v7  ;;  %1768 = vmatprep.mubr.bf16.mxu0 %v4188_v8  ;;  %v4253_v7 = vld [vmem:[%s4561_s18 + $0x1b8] ss:$24 sps:$4 sm:$0xff]   ;;  %v4257_v8 = vld [vmem:[%s4561_s18 + $0x1ec] ss:$24 sps:$4 sm:$0xff]  }
  0x81   : > { %1885 = vmatprep.subr.bf16.mxu0 %v4187_v9  ;;  %v4329_v9 = vld [vmem:[%s4561_s18 + $0x1e4] ss:$24 sps:$4 sm:$0xff]  }
  0x82   : > { %1789 = vmatmul.mubr.bf16.gmra.mrb[4].mxu1 %v4325_v6  ;;  %v4344_v6 = vld [vmem:[%s4561_s18 + $0x254] ss:$24 sps:$4 sm:$0xff]  }
  0x83   : > { %1798 = vmatprep.mubr.bf16.mxu1 %v4329_v9  ;;  %v4346_v9 = vld [vmem:[%s4561_s18 + $0x250] ss:$24 sps:$4 sm:$0xff]  }
  0x84   : > { %1886 = vmatpush1.bf16.msra.mxu0 %v4185_v10  ;;  %v4331_v10 = vld [vmem:[%s4561_s18 + $0x1e0] ss:$24 sps:$4 sm:$0xff]  }
  0x85   : > { %1887 = vmatprep.subr.bf16.mxu0 %v4193_v11  ;;  %v4259_v11 = vld [vmem:[%s4561_s18 + $0x1e8] ss:$24 sps:$4 sm:$0xff]  }
  0x87   : > { %1769 = vmatmul.mubr.bf16.gmra.mrb[28].mxu0 %v4190_v12  ;;  %v4263_v12 = vld [vmem:[%s4561_s18 + $0x21c] ss:$24 sps:$4 sm:$0xff]  }
  0x88   : > { %1888 = vmatpush1.bf16.msra.mxu0 %v4191_v13  ;;  %1891 = vmatprep.mubr.bf16.mxu0 %v4199_v14  ;;  %v4335_v13 = vld [vmem:[%s4561_s18 + $0x214] ss:$24 sps:$4 sm:$0xff]   ;;  %v4337_v14 = vld [vmem:[%s4561_s18 + $0x210] ss:$24 sps:$4 sm:$0xff]  }
  0x89   : > { %1889 = vmatprep.subr.bf16.mxu0 %v4196_v15  ;;  %v4265_v15 = vld [vmem:[%s4561_s18 + $0x218] ss:$24 sps:$4 sm:$0xff]  }
  0x8a   : > { %1799 = vmatmul.mubr.bf16.gmra.mrb[8].mxu1 %v4331_v10  ;;  %v4350_v10 = vld [vmem:[%s4561_s18 + $0x284] ss:$24 sps:$4 sm:$0xff]  }
  0x8b   : > { %1808 = vmatprep.mubr.bf16.mxu1 %v4335_v13  ;;  %v4356_v13 = vld [vmem:[%s4561_s18 + $0x2b4] ss:$24 sps:$4 sm:$0xff]  }
  0x8c   : > { %1890 = vmatpush1.bf16.msra.mxu0 %v4194_v16  ;;  %v4269_v16 = vld [vmem:[%s4561_s18 + $0x24c] ss:$24 sps:$4 sm:$0xff]  }
  0x8d   : > { %2052 = vmatprep.subr.bf16.mxu0 %v4202_v17  ;;  %v4341_v17 = vld [vmem:[%s4561_s18 + $0x244] ss:$24 sps:$4 sm:$0xff]  }
  0x8f   : > { %1892 = vmatmul.mubr.bf16.vlgmr.msra.gmra.mrb[0].mxu0 %v4197_v18  ;;  %v4343_v18 = vld [vmem:[%s4561_s18 + $0x240] ss:$24 sps:$4 sm:$0xff]  }
  0x90   : > { %2053 = vmatpush1.bf16.msra.mxu0 %v4200_v19  ;;  %1901 = vmatprep.mubr.bf16.mxu0 %v4203_v20  ;;  %v4271_v19 = vld [vmem:[%s4561_s18 + $0x248] ss:$24 sps:$4 sm:$0xff]   ;;  %v4275_v20 = vld [vmem:[%s4561_s18 + $0x27c] ss:$24 sps:$4 sm:$0xff]  }
  0x91   : > { %2054 = vmatprep.subr.bf16.mxu0 %v4208_v21  ;;  %v4347_v21 = vld [vmem:[%s4561_s18 + $0x274] ss:$24 sps:$4 sm:$0xff]  }
  0x92   : > { %1809 = vmatmul.mubr.bf16.gmra.mrb[12].mxu1 %v4337_v14  ;;  %v4358_v14 = vld [vmem:[%s4561_s18 + $0x2b0] ss:$24 sps:$4 sm:$0xff]  }
  0x93   : > { %1818 = vmatprep.mubr.bf16.mxu1 %v4341_v17 }
  0x94   : > { %2055 = vmatpush1.bf16.msra.mxu0 %v4206_v22  ;;  %v4349_v22 = vld [vmem:[%s4561_s18 + $0x270] ss:$24 sps:$4 sm:$0xff]  }
  0x95   : > { %2056 = vmatprep.subr.bf16.mxu0 %v4214_v23  ;;  %v4277_v23 = vld [vmem:[%s4561_s18 + $0x278] ss:$24 sps:$4 sm:$0xff]  }
  0x97   : > { %1902 = vmatmul.mubr.bf16.gmra.mrb[4].mxu0 %v4205_v24  ;;  %v4281_v24 = vld [vmem:[%s4561_s18 + $0x2ac] ss:$24 sps:$4 sm:$0xff]  }
  0x98   : > { %1911 = vmatprep.mubr.bf16.mxu0 %v4209_v25  ;;  %2057 = vmatpush1.bf16.msra.mxu0 %v4212_v26  ;;  %v4353_v25 = vld [vmem:[%s4561_s18 + $0x2a4] ss:$24 sps:$4 sm:$0xff]   ;;  %v4355_v26 = vld [vmem:[%s4561_s18 + $0x2a0] ss:$24 sps:$4 sm:$0xff]  }
  0x99   : > { %2058 = vmatprep.subr.bf16.mxu0 %v4220_v27  ;;  %v4283_v27 = vld [vmem:[%s4561_s18 + $0x2a8] ss:$24 sps:$4 sm:$0xff]  }
  0x9a   : > { %1819 = vmatmul.mubr.bf16.gmra.mrb[16].mxu1 %v4343_v18 }
  0x9b   : > { %1828 = vmatprep.mubr.bf16.mxu1 %v4347_v21 }
  0x9c   : > { %2059 = vmatpush1.bf16.msra.mxu0 %v4218_v28  ;;  %v4287_v28 = vld [vmem:[%s4561_s18 + $0x2dc] ss:$24 sps:$4 sm:$0xff]  }
  0x9d   : > { %2060 = vmatprep.subr.bf16.mxu0 %v4226_v29  ;;  %v4359_v29 = vld [vmem:[%s4561_s18 + $0x2d4] ss:$24 sps:$4 sm:$0xff]  }
  0x9f   : > { %1912 = vmatmul.mubr.bf16.gmra.mrb[8].mxu0 %v4211_v30  ;;  %v4361_v30 = vld [vmem:[%s4561_s18 + $0x2d0] ss:$24 sps:$4 sm:$0xff]  }
  0xa0   : > { %1921 = vmatprep.mubr.bf16.mxu0 %v4215_v31  ;;  %2061 = vmatpush1.bf16.msra.mxu0 %v4224_v32  ;;  %v4289_v31 = vld [vmem:[%s4561_s18 + $0x2d8] ss:$24 sps:$4 sm:$0xff]   ;;  %v4295_v32 = vld [vmem:[%s4561_s18 + $0x14] ss:$24 sps:$4 sm:$0xff]  }
  0xa1   : > { %2062 = vmatprep.subr.bf16.mxu0 %v4232_v33  ;;  %v4365_v33 = vld [vmem:[%s5590_s3 + $0x40] sm:$0xff]  }
  0xa2   : > { %1829 = vmatmul.mubr.bf16.gmra.mrb[20].mxu1 %v4349_v22  ;;  %3780 = vmatprep.subr.bf16.mxu1 %v4365_v33 }
  0xa3   : > { %1838 = vmatprep.mubr.bf16.mxu1 %v4353_v25 }
  0xa4   : > { %2063 = vmatpush1.bf16.msra.mxu0 %v4230_v34  ;;  %v4366_v34 = vld [vmem:[%s5590_s3] sm:$0xff]  }
  0xa5   : > { %2064 = vmatprep.subr.bf16.mxu0 %v4238_v35  ;;  %v4367_v35 = vld [vmem:[%s5590_s3 + $0x48] sm:$0xff]   ;;  %3781 = vmatpush3.bf16.msra.mxu1 %v4366_v34 }
  0xa6   : > { %3782 = vmatprep.subr.bf16.mxu1 %v4367_v35 }
  0xa7   : > { %1922 = vmatmul.mubr.bf16.gmra.mrb[12].mxu0 %v4217_v36  ;;  %v4368_v36 = vld [vmem:[%s5590_s3 + $0x8] sm:$0xff]  }
  0xa8   : > { %1931 = vmatprep.mubr.bf16.mxu0 %v4221_v37  ;;  %2065 = vmatpush1.bf16.msra.mxu0 %v4236_v38  ;;  %v4293_v37 = vld [vmem:[%s4561_s18 + $0x10] ss:$24 sps:$4 sm:$0xff]  }
  0xa9   : > { %2066 = vmatprep.subr.bf16.mxu0 %v4244_v39  ;;  %v4369_v38 = vld [vmem:[%s5590_s3 + $0x50] sm:$0xff]   ;;  %v4296_v39 = vld [vmem:[%s4561_s18 + $0x44] ss:$24 sps:$4 sm:$0xff]   ;;  %3783 = vmatpush3.bf16.msra.mxu1 %v4368_v36 }
  0xaa   : > { %1839 = vmatmul.mubr.bf16.gmra.mrb[24].mxu1 %v4355_v26  ;;  %3784 = vmatprep.subr.bf16.mxu1 %v4369_v38 }
  0xab   : > { %1848 = vmatprep.mubr.bf16.mxu1 %v4359_v29 }
  0xac   : > { %2067 = vmatpush1.bf16.msra.mxu0 %v4242_v40  ;;  %v4370_v40 = vld [vmem:[%s5590_s3 + $0x10] sm:$0xff]  }
  0xad   : > { %2068 = vmatprep.subr.bf16.mxu0 %v4250_v41  ;;  %v4371_v41 = vld [vmem:[%s5590_s3 + $0x58] sm:$0xff]   ;;  %3785 = vmatpush3.bf16.msra.mxu1 %v4370_v40 }
  0xae   : > { %3786 = vmatprep.subr.bf16.mxu1 %v4371_v41 }
  0xaf   : > { %1932 = vmatmul.mubr.bf16.gmra.mrb[16].mxu0 %v4223_v42  ;;  %v4372_v42 = vld [vmem:[%s5590_s3 + $0x18] sm:$0xff]  }
  0xb0   : > { %1941 = vmatprep.mubr.bf16.mxu0 %v4227_v43  ;;  %2069 = vmatpush1.bf16.msra.mxu0 %v4248_v44  ;;  %v4298_v43 = vld [vmem:[%s4561_s18 + $0x40] ss:$24 sps:$4 sm:$0xff]  }
  0xb1   : > { %2070 = vmatprep.subr.bf16.mxu0 %v4256_v45  ;;  %v4373_v44 = vld [vmem:[%s5590_s3 + $0x60] sm:$0xff]   ;;  %v4299_v45 = vld [vmem:[%s4561_s18 + $0x74] ss:$24 sps:$4 sm:$0xff]   ;;  %3787 = vmatpush3.bf16.msra.mxu1 %v4372_v42 }
  0xb2   : > { %1849 = vmatmul.mubr.bf16.gmra.mrb[28].mxu1 %v4361_v30  ;;  %3788 = vmatprep.subr.bf16.mxu1 %v4373_v44 }
  0xb4   : > { %2071 = vmatpush1.bf16.msra.mxu0 %v4254_v46  ;;  %v4374_v46 = vld [vmem:[%s5590_s3 + $0x20] sm:$0xff]  }
  0xb5   : > { %2072 = vmatprep.subr.bf16.mxu0 %v4262_v47  ;;  %v4375_v47 = vld [vmem:[%s5590_s3 + $0x68] sm:$0xff]   ;;  %3789 = vmatpush3.bf16.msra.mxu1 %v4374_v46 }
  0xb6   : > { %3790 = vmatprep.subr.bf16.mxu1 %v4375_v47 }
  0xb7   : > { %1942 = vmatmul.mubr.bf16.gmra.mrb[20].mxu0 %v4229_v48  ;;  %v4376_v48 = vld [vmem:[%s5590_s3 + $0x28] sm:$0xff]  }
  0xb8   : > { %1951 = vmatprep.mubr.bf16.mxu0 %v4233_v49  ;;  %2073 = vmatpush1.bf16.msra.mxu0 %v4260_v50  ;;  %v4301_v49 = vld [vmem:[%s4561_s18 + $0x70] ss:$24 sps:$4 sm:$0xff]  }
  0xb9   : > { %2074 = vmatprep.subr.bf16.mxu0 %v4268_v51  ;;  %v4377_v50 = vld [vmem:[%s5590_s3 + $0x70] sm:$0xff]   ;;  %v4302_v51 = vld [vmem:[%s4561_s18 + $0xa4] ss:$24 sps:$4 sm:$0xff]   ;;  %3791 = vmatpush3.bf16.msra.mxu1 %v4376_v48 }
  0xba   : > { %3792 = vmatprep.subr.bf16.mxu1 %v4377_v50 }
  0xbc   : > { %2075 = vmatpush1.bf16.msra.mxu0 %v4266_v52  ;;  %v4378_v52 = vld [vmem:[%s5590_s3 + $0x30] sm:$0xff]  }
  0xbd   : > { %2076 = vmatprep.subr.bf16.mxu0 %v4274_v53  ;;  %3793 = vmatpush3.bf16.msra.mxu1 %v4378_v52  ;;  %v4304_v53 = vld [vmem:[%s4561_s18 + $0xa0] ss:$24 sps:$4 sm:$0xff]  }
  0xbe   : > { %v2440_v52 = vld [vmem:[%s5589_s2] sm:$0x3] }
  0xbf   : > { %1952 = vmatmul.mubr.bf16.gmra.mrb[24].mxu0 %v4235_v54  ;;  %v4305_v54 = vld [vmem:[%s4561_s18 + $0xd4] ss:$24 sps:$4 sm:$0xff]  }
  0xc0   : > { %1961 = vmatprep.mubr.bf16.mxu0 %v4239_v55  ;;  %2077 = vmatpush1.bf16.msra.mxu0 %v4272_v56  ;;  %v4307_v55 = vld [vmem:[%s4561_s18 + $0xd0] ss:$24 sps:$4 sm:$0xff]   ;;  %v4308_v56 = vld [vmem:[%s4561_s18 + $0x104] ss:$24 sps:$4 sm:$0xff]  }
  0xc1   : > { %2078 = vmatprep.subr.bf16.mxu0 %v4280_v57  ;;  %v4310_v57 = vld [vmem:[%s4561_s18 + $0x100] ss:$24 sps:$4 sm:$0xff]  }
  0xc4   : > { %2079 = vmatpush1.bf16.msra.mxu0 %v4278_v58  ;;  %v4311_v58 = vld [vmem:[%s4561_s18 + $0x134] ss:$24 sps:$4 sm:$0xff]  }
  0xc5   : > { %2080 = vmatprep.subr.bf16.mxu0 %v4286_v59  ;;  %v4313_v59 = vld [vmem:[%s4561_s18 + $0x130] ss:$24 sps:$4 sm:$0xff]  }
  0xc7   : > { %1962 = vmatmul.mubr.bf16.gmra.mrb[28].mxu0 %v4241_v60  ;;  %v4314_v60 = vld [vmem:[%s4561_s18 + $0x164] ss:$24 sps:$4 sm:$0xff]  }
  0xc8   : > { %1971 = vmatprep.mubr.bf16.mxu0 %v4245_v61  ;;  %2081 = vmatpush1.bf16.msra.mxu0 %v4284_v62  ;;  %v4316_v61 = vld [vmem:[%s4561_s18 + $0x160] ss:$24 sps:$4 sm:$0xff]   ;;  %v4320_v62 = vld [vmem:[%s4561_s18 + $0x194] ss:$24 sps:$4 sm:$0xff]  }
  0xc9   : > { %2082 = vmatprep.subr.bf16.mxu0 %v4292_v63  ;;  %v4322_v63 = vld [vmem:[%s4561_s18 + $0x190] ss:$24 sps:$4 sm:$0xff]  }
  0xcc   : > { %2083 = vmatpush1.bf16.msra.mxu0 %v4290_v2  ;;  %v4332_v2 = vld [vmem:[%s4561_s18 + $0x1f4] ss:$24 sps:$4 sm:$0xff]  }
  0xcf   : > { %1972 = vmatmul.mubr.bf16.gmra.mrb[32].mxu0 %v4247_v3  ;;  %v4334_v3 = vld [vmem:[%s4561_s18 + $0x1f0] ss:$24 sps:$4 sm:$0xff]  }
  0xd0   : > { %1981 = vmatprep.mubr.bf16.mxu0 %v4251_v4  ;;  %v4338_v4 = vld [vmem:[%s4561_s18 + $0x224] ss:$24 sps:$4 sm:$0xff]  }
  0xd7   : > { %1982 = vmatmul.mubr.bf16.gmra.mrb[36].mxu0 %v4253_v7  ;;  %v4379_v7 = vld [vmem:[%s5590_s3 + $0x78] sm:$0xff]  }
  0xd8   : > { %1991 = vmatprep.mubr.bf16.mxu0 %v4257_v8  ;;  %v4380_v8 = vld [vmem:[%s5590_s3 + $0x38] sm:$0xff]   ;;  %3794 = vmatprep.subr.bf16.mxu1 %v4379_v7  ;;  %v4381_v7 = vld [vmem:[%s5592_s5] ss:$8 sps:$4 sm:$0xff]  }
  0xd9   : > { %3795 = vmatpush3.bf16.msra.mxu1 %v4380_v8 }
  0xdf   : > { %1992 = vmatmul.mubr.bf16.gmra.mrb[40].mxu0 %v4259_v11  ;;  %v4383_v11 = vld [vmem:[%s5592_s5 + $0x4] ss:$8 sps:$4 sm:$0xff]  }
  0xe0   : > { %2001 = vmatprep.mubr.bf16.mxu0 %v4263_v12  ;;  %v4352_v12 = vld [vmem:[%s4561_s18 + $0x280] ss:$24 sps:$4 sm:$0xff]   ;;  %3144 = vmatprep.subr.bf16.mxu1 %v4383_v11 }
  0xe7   : > { %2002 = vmatmul.mubr.bf16.gmra.mrb[44].mxu0 %v4265_v15  ;;  %v4362_v15 = vld [vmem:[%s4561_s18 + $0x2e4] ss:$24 sps:$4 sm:$0xff]  }
  0xe8   : > { %2011 = vmatprep.mubr.bf16.mxu0 %v4269_v16  ;;  %v4364_v16 = vld [vmem:[%s4561_s18 + $0x2e0] ss:$24 sps:$4 sm:$0xff]   ;;  %s3779_s18 = sshll.u32 %s5612_s19, 4 }
  0xe9   : > { %s5448_s20 = scalar_lea.vmem %s5595_s8, %s3779_s18 }
  0xef   : > { %2012 = vmatmul.mubr.bf16.gmra.mrb[48].mxu0 %v4271_v19 }
  0xf0   : > { %2021 = vmatprep.mubr.bf16.mxu0 %v4275_v20 }
  0xf7   : > { %2022 = vmatmul.mubr.bf16.gmra.mrb[52].mxu0 %v4277_v23 }
  0xf8   : > { %2031 = vmatprep.mubr.bf16.mxu0 %v4281_v24 }
  0xff   : > { %2032 = vmatmul.mubr.bf16.gmra.mrb[56].mxu0 %v4283_v27 }
 0x100   : > { %2041 = vmatprep.mubr.bf16.mxu0 %v4287_v28 }
 0x107   : > { %2042 = vmatmul.mubr.bf16.gmra.mrb[60].mxu0 %v4289_v31 }
 0x108   : > { %2084 = vmatprep.mubr.bf16.mxu0 %v4295_v32 }
 0x10f   : > { %2085 = vmatmul.mubr.bf16.vlgmr.msra.gmra.mrb[0].mxu0 %v4293_v37 }
 0x110   : > { %2094 = vmatprep.mubr.bf16.mxu0 %v4296_v39 }
 0x117   : > { %2095 = vmatmul.mubr.bf16.gmra.mrb[4].mxu0 %v4298_v43 }
 0x118   : > { %2104 = vmatprep.mubr.bf16.mxu0 %v4299_v45  ;;  %v2442_v45 = vlaneseq }
 0x11a   : > { %v5018_v46 = vshrl.u32 %v2442_v45, 7 }
 0x11c   : > { %5601 = vst [vmem:[#allocation3_spill] sm:$0xff] %v5018_v46 }
 0x11f   : > { %2105 = vmatmul.mubr.bf16.gmra.mrb[8].mxu0 %v4301_v49 }
 0x120   : > { %2114 = vmatprep.mubr.bf16.mxu0 %v4302_v51  ;;  %v5597_v51 = vsub.s32 0, %v5018_v46 }
 0x127   : > { %2115 = vmatmul.mubr.bf16.gmra.mrb[12].mxu0 %v4304_v53  ;;  %v5596_v53 = vsub.s32 1, %v5018_v46 }
 0x128   : > { %2124 = vmatprep.mubr.bf16.mxu0 %v4305_v54  ;;  %v5035_v54 = vrot.slane %v2440_v52, %v5597_v51 }
 0x12f   : > { %2125 = vmatmul.mubr.bf16.gmra.mrb[16].mxu0 %v4307_v55  ;;  %v5039_v55 = vrot.slane %v2440_v52, %v5596_v53 }
 0x130   : > { %2134 = vmatprep.mubr.bf16.mxu0 %v4308_v56 }
 0x137   : > { %2135 = vmatmul.mubr.bf16.gmra.mrb[20].mxu0 %v4310_v57 }
 0x138   : > { %2144 = vmatprep.mubr.bf16.mxu0 %v4311_v58 }
 0x13f   : > { %2145 = vmatmul.mubr.bf16.gmra.mrb[24].mxu0 %v4313_v59 }
 0x140   : > { %2154 = vmatprep.mubr.bf16.mxu0 %v4314_v60 }
 0x147   : > { %2155 = vmatmul.mubr.bf16.gmra.mrb[28].mxu0 %v4316_v61 }
 0x148   : > { %2164 = vmatprep.mubr.bf16.mxu0 %v4320_v62 }
 0x14d   : > { %v4962_v17 = vpop.f32.mrb[0].mxu1 }
 0x14e   : > { %v4964_v18 = vpop.f32.mrb[1].mxu1 }
 0x14f   : > { %2165 = vmatmul.mubr.bf16.gmra.mrb[32].mxu0 %v4322_v63  ;;  %v4966_v19 = vpop.f32.mrb[2].mxu1 }
 0x150   : > { %2174 = vmatprep.mubr.bf16.mxu0 %v4326_v0  ;;  %v4968_v20 = vpop.f32.mrb[3].mxu1 }
 0x155   : > { %v4970_v21 = vpop.f32.mrb[4].mxu1 }
 0x156   : > { %v4972_v22 = vpop.f32.mrb[5].mxu1 }
 0x157   : > { %2175 = vmatmul.mubr.bf16.gmra.mrb[36].mxu0 %v4328_v1  ;;  %v4974_v23 = vpop.f32.mrb[6].mxu1 }
 0x158   : > { %2184 = vmatprep.mubr.bf16.mxu0 %v4332_v2  ;;  %v4976_v24 = vpop.f32.mrb[7].mxu1 }
 0x15d   : > { %v4978_v25 = vpop.f32.mrb[8].mxu1 }
 0x15e   : > { %v4980_v26 = vpop.f32.mrb[9].mxu1 }
 0x15f   : > { %2185 = vmatmul.mubr.bf16.gmra.mrb[40].mxu0 %v4334_v3  ;;  %v4982_v27 = vpop.f32.mrb[10].mxu1 }
 0x160   : > { %2194 = vmatprep.mubr.bf16.mxu0 %v4338_v4  ;;  %v4984_v28 = vpop.f32.mrb[11].mxu1 }
 0x165   : > { %v4986_v29 = vpop.f32.mrb[12].mxu1 }
 0x166   : > { %v4988_v30 = vpop.f32.mrb[13].mxu1 }
 0x167   : > { %2195 = vmatmul.mubr.bf16.gmra.mrb[44].mxu0 %v4340_v5  ;;  %v4990_v31 = vpop.f32.mrb[14].mxu1 }
 0x168   : > { %2204 = vmatprep.mubr.bf16.mxu0 %v4344_v6  ;;  %v4992_v32 = vpop.f32.mrb[15].mxu1 }
 0x16d   : > { %v4994_v33 = vpop.f32.mrb[16].mxu1 }
 0x16e   : > { %v4996_v34 = vpop.f32.mrb[17].mxu1 }
 0x16f   : > { %2205 = vmatmul.mubr.bf16.gmra.mrb[48].mxu0 %v4346_v9  ;;  %v4998_v35 = vpop.f32.mrb[18].mxu1 }
 0x170   : > { %2214 = vmatprep.mubr.bf16.mxu0 %v4350_v10  ;;  %v5000_v36 = vpop.f32.mrb[19].mxu1  ;;  %v4386_v10 = vld [vmem:[%s5592_s5 + $0x14] ss:$8 sps:$4 sm:$0xff]  }
 0x175   : > { %v5002_v37 = vpop.f32.mrb[20].mxu1 }
 0x176   : > { %v5004_v38 = vpop.f32.mrb[21].mxu1 }
 0x177   : > { %2215 = vmatmul.mubr.bf16.gmra.mrb[52].mxu0 %v4352_v12  ;;  %v5006_v39 = vpop.f32.mrb[22].mxu1 }
 0x178   : > { %2224 = vmatprep.mubr.bf16.mxu0 %v4356_v13  ;;  %v5008_v40 = vpop.f32.mrb[23].mxu1 }
 0x17d   : > { %v5010_v41 = vpop.f32.mrb[24].mxu1 }
 0x17e   : > { %v5012_v42 = vpop.f32.mrb[25].mxu1 }
 0x17f   : > { %2225 = vmatmul.mubr.bf16.gmra.mrb[56].mxu0 %v4358_v14  ;;  %v5014_v43 = vpop.f32.mrb[26].mxu1 }
 0x180   : > { %2234 = vmatprep.mubr.bf16.mxu0 %v4362_v15  ;;  %v5016_v44 = vpop.f32.mrb[27].mxu1 }
 0x185   : > { %v5020_v47 = vpop.f32.mrb[28].mxu1 }
 0x186   : > { %v5022_v48 = vpop.f32.mrb[29].mxu1 }
 0x187   : > { %2235 = vmatmul.mubr.bf16.gmra.mrb[60].mxu0 %v4364_v16  ;;  %v5024_v49 = vpop.f32.mrb[30].mxu1  ;;  %v4384_v16 = vld [vmem:[%s5592_s5 + $0x10] ss:$8 sps:$4 sm:$0xff]  }
 0x188   : > { %v5026_v50 = vpop.f32.mrb[31].mxu1 }
 0x1e2   : > { %v2086_v56 = vpop.f32.mrb[0].mxu0 }
 0x1e3   : > { %v2452_v57 = vadd.f32 %v5035_v54, %v2086_v56  ;;  %v2088_v58 = vpop.f32.mrb[1].mxu0  ;;  %v4389_v56 = vld [vmem:[%s5592_s5 + $0x24] ss:$8 sps:$4 sm:$0xff]  }
 0x1e4   : > { %v2453_v59 = vadd.f32 %v5039_v55, %v2088_v58  ;;  %v2090_v60 = vpop.f32.mrb[2].mxu0 }
 0x1e5   : > { %v2454_v61 = vadd.f32 %v5035_v54, %v2090_v60  ;;  %v2092_v62 = vpop.f32.mrb[3].mxu0  ;;  %v2516_v0 = vmax.f32 %v2452_v57, 0.0 }
 0x1e6   : > { %v2455_v63 = vadd.f32 %v5039_v55, %v2092_v62  ;;  %v2517_v2 = vmax.f32 %v2453_v59, 0.0  ;;  %v4387_v62 = vld [vmem:[%s5592_s5 + $0x20] ss:$8 sps:$4 sm:$0xff]  }
 0x1e7   : > { %v2518_v1 = vmax.f32 %v2454_v61, 0.0 }
 0x1e8   : > { %v2519_v3 = vmax.f32 %v2455_v63, 0.0 }
 0x1e9   : > { %v5045_v4 = vpack.c.bf16 %v2518_v1, %v2516_v0  ;;  %v4392_v1 = vld [vmem:[%s5592_s5 + $0x34] ss:$8 sps:$4 sm:$0xff]  }
 0x1ea   : > { %v5047_v5 = vpack.c.bf16 %v2519_v3, %v2517_v2  ;;  %v2096_v6 = vpop.f32.mrb[4].mxu0 }
 0x1eb   : > { %v2456_v8 = vadd.f32 %v5035_v54, %v2096_v6  ;;  %v2098_v9 = vpop.f32.mrb[5].mxu0 }
 0x1ec   : > { %v2457_v11 = vadd.f32 %v5039_v55, %v2098_v9  ;;  %v2100_v12 = vpop.f32.mrb[6].mxu0  ;;  %2779 = vmatprep.mubr.bf16.mxu1 %v5047_v5  ;;  %v4390_v9 = vld [vmem:[%s5592_s5 + $0x30] ss:$8 sps:$4 sm:$0xff]  }
 0x1ed   : > { %v2458_v13 = vadd.f32 %v5035_v54, %v2100_v12  ;;  %v2102_v14 = vpop.f32.mrb[7].mxu0  ;;  %2780 = vmatmul.mubr.bf16.vlgmr.msra.gmra.mrb[32].mxu1 %v5045_v4  ;;  %v2520_v45 = vmax.f32 %v2456_v8, 0.0  ;;  %v4395_v12 = vld [vmem:[%s5592_s5 + $0x44] ss:$8 sps:$4 sm:$0xff]  }
 0x1ee   : > { %v2459_v15 = vadd.f32 %v5039_v55, %v2102_v14  ;;  %3145 = vmatpush1.bf16.msra.mxu1 %v4381_v7  ;;  %v2521_v57 = vmax.f32 %v2457_v11, 0.0 }
 0x1ef   : > { %v2522_v52 = vmax.f32 %v2458_v13, 0.0  ;;  %3146 = vmatprep.subr.bf16.mxu1 %v4386_v10 }
 0x1f0   : > { %v2523_v58 = vmax.f32 %v2459_v15, 0.0 }
 0x1f1   : > { %v5067_v59 = vpack.c.bf16 %v2522_v52, %v2520_v45  ;;  %v4393_v52 = vld [vmem:[%s5592_s5 + $0x40] ss:$8 sps:$4 sm:$0xff]  }
 0x1f2   : > { %v5069_v60 = vpack.c.bf16 %v2523_v58, %v2521_v57  ;;  %v2106_v61 = vpop.f32.mrb[8].mxu0  ;;  %3147 = vmatpush1.bf16.msra.mxu1 %v4384_v16  ;;  %v4398_v58 = vld [vmem:[%s5592_s5 + $0x54] ss:$8 sps:$4 sm:$0xff]  }
 0x1f3   : > { %v2460_v63 = vadd.f32 %v5035_v54, %v2106_v61  ;;  %v2108_v0 = vpop.f32.mrb[9].mxu0  ;;  %3148 = vmatprep.subr.bf16.mxu1 %v4389_v56 }
 0x1f4   : > { %v2461_v2 = vadd.f32 %v5039_v55, %v2108_v0  ;;  %v2110_v3 = vpop.f32.mrb[10].mxu0  ;;  %2787 = vmatprep.mubr.bf16.mxu1 %v5069_v60 }
 0x1f5   : > { %v2462_v6 = vadd.f32 %v5035_v54, %v2110_v3  ;;  %v2112_v7 = vpop.f32.mrb[11].mxu0  ;;  %2788 = vmatmul.mubr.bf16.gmra.mrb[36].mxu1 %v5067_v59  ;;  %v2524_v10 = vmax.f32 %v2460_v63, 0.0 }
 0x1f6   : > { %v2463_v8 = vadd.f32 %v5039_v55, %v2112_v7  ;;  %3149 = vmatpush1.bf16.msra.mxu1 %v4387_v62  ;;  %v2525_v13 = vmax.f32 %v2461_v2, 0.0  ;;  %v4396_v2 = vld [vmem:[%s5592_s5 + $0x50] ss:$8 sps:$4 sm:$0xff]   ;;  %v4401_v7 = vld [vmem:[%s5592_s5 + $0x64] ss:$8 sps:$4 sm:$0xff]  }
 0x1f7   : > { %v2526_v11 = vmax.f32 %v2462_v6, 0.0  ;;  %3150 = vmatprep.subr.bf16.mxu1 %v4392_v1 }
 0x1f8   : > { %v2527_v14 = vmax.f32 %v2463_v8, 0.0 }
 0x1f9   : > { %v5089_v15 = vpack.c.bf16 %v2526_v11, %v2524_v10 }
 0x1fa   : > { %v5091_v16 = vpack.c.bf16 %v2527_v14, %v2525_v13  ;;  %v2116_v45 = vpop.f32.mrb[12].mxu0  ;;  %3151 = vmatpush1.bf16.msra.mxu1 %v4390_v9  ;;  %v4399_v13 = vld [vmem:[%s5592_s5 + $0x60] ss:$8 sps:$4 sm:$0xff]  }
 0x1fb   : > { %v2464_v56 = vadd.f32 %v5035_v54, %v2116_v45  ;;  %v2118_v57 = vpop.f32.mrb[13].mxu0  ;;  %3152 = vmatprep.subr.bf16.mxu1 %v4395_v12 }
 0x1fc   : > { %v2465_v61 = vadd.f32 %v5039_v55, %v2118_v57  ;;  %v2120_v62 = vpop.f32.mrb[14].mxu0  ;;  %2795 = vmatprep.mubr.bf16.mxu1 %v5091_v16 }
 0x1fd   : > { %v2466_v63 = vadd.f32 %v5035_v54, %v2120_v62  ;;  %v2122_v0 = vpop.f32.mrb[15].mxu0  ;;  %2796 = vmatmul.mubr.bf16.gmra.mrb[40].mxu1 %v5089_v15  ;;  %v2528_v3 = vmax.f32 %v2464_v56, 0.0 }
 0x1fe   : > { %v2467_v1 = vadd.f32 %v5039_v55, %v2122_v0  ;;  %3153 = vmatpush1.bf16.msra.mxu1 %v4393_v52  ;;  %v2529_v8 = vmax.f32 %v2465_v61, 0.0  ;;  %v4404_v52 = vld [vmem:[%s5592_s5 + $0x74] ss:$8 sps:$4 sm:$0xff]  }
 0x1ff   : > { %v2530_v6 = vmax.f32 %v2466_v63, 0.0  ;;  %3154 = vmatprep.subr.bf16.mxu1 %v4398_v58  ;;  %v4402_v63 = vld [vmem:[%s5592_s5 + $0x70] ss:$8 sps:$4 sm:$0xff]  }
 0x200   : > { %v2531_v9 = vmax.f32 %v2467_v1, 0.0 }
 0x201   : > { %v5111_v10 = vpack.c.bf16 %v2530_v6, %v2528_v3 }
 0x202   : > { %v5113_v11 = vpack.c.bf16 %v2531_v9, %v2529_v8  ;;  %v2126_v12 = vpop.f32.mrb[16].mxu0  ;;  %3155 = vmatpush1.bf16.msra.mxu1 %v4396_v2  ;;  %v4407_v2 = vld [vmem:[%s5592_s5 + $0x84] ss:$8 sps:$4 sm:$0xff]  }
 0x203   : > { %v2468_v14 = vadd.f32 %v5035_v54, %v2126_v12  ;;  %v2128_v45 = vpop.f32.mrb[17].mxu0  ;;  %3156 = vmatprep.subr.bf16.mxu1 %v4401_v7  ;;  %v4405_v12 = vld [vmem:[%s5592_s5 + $0x80] ss:$8 sps:$4 sm:$0xff]  }
 0x204   : > { %v2469_v56 = vadd.f32 %v5039_v55, %v2128_v45  ;;  %v2130_v57 = vpop.f32.mrb[18].mxu0  ;;  %2803 = vmatprep.mubr.bf16.mxu1 %v5113_v11  ;;  %v4410_v45 = vld [vmem:[%s5592_s5 + $0x94] ss:$8 sps:$4 sm:$0xff]  }
 0x205   : > { %v2470_v58 = vadd.f32 %v5035_v54, %v2130_v57  ;;  %v2132_v61 = vpop.f32.mrb[19].mxu0  ;;  %2804 = vmatmul.mubr.bf16.gmra.mrb[44].mxu1 %v5111_v10  ;;  %v2532_v0 = vmax.f32 %v2468_v14, 0.0 }
 0x206   : > { %v2471_v62 = vadd.f32 %v5039_v55, %v2132_v61  ;;  %3157 = vmatpush1.bf16.msra.mxu1 %v4399_v13  ;;  %v2533_v3 = vmax.f32 %v2469_v56, 0.0 }
 0x207   : > { %v2534_v1 = vmax.f32 %v2470_v58, 0.0  ;;  %3158 = vmatprep.subr.bf16.mxu1 %v4404_v52 }
 0x208   : > { %v2535_v6 = vmax.f32 %v2471_v62, 0.0  ;;  %v4408_v62 = vld [vmem:[%s5592_s5 + $0x90] ss:$8 sps:$4 sm:$0xff]  }
 0x209   : > { %v5133_v7 = vpack.c.bf16 %v2534_v1, %v2532_v0  ;;  %v4413_v1 = vld [vmem:[%s5592_s5 + $0xa4] ss:$8 sps:$4 sm:$0xff]  }
 0x20a   : > { %v5135_v8 = vpack.c.bf16 %v2535_v6, %v2533_v3  ;;  %v2136_v9 = vpop.f32.mrb[20].mxu0  ;;  %3159 = vmatpush1.bf16.msra.mxu1 %v4402_v63 }
 0x20b   : > { %v2472_v13 = vadd.f32 %v5035_v54, %v2136_v9  ;;  %v2138_v14 = vpop.f32.mrb[21].mxu0  ;;  %3160 = vmatprep.subr.bf16.mxu1 %v4407_v2 }
 0x20c   : > { %v2473_v52 = vadd.f32 %v5039_v55, %v2138_v14  ;;  %v2140_v56 = vpop.f32.mrb[22].mxu0  ;;  %2811 = vmatprep.mubr.bf16.mxu1 %v5135_v8 }
 0x20d   : > { %v2474_v57 = vadd.f32 %v5035_v54, %v2140_v56  ;;  %v2142_v58 = vpop.f32.mrb[23].mxu0  ;;  %2812 = vmatmul.mubr.bf16.gmra.mrb[48].mxu1 %v5133_v7  ;;  %v2536_v63 = vmax.f32 %v2472_v13, 0.0 }
 0x20e   : > { %v2475_v61 = vadd.f32 %v5039_v55, %v2142_v58  ;;  %3161 = vmatpush1.bf16.msra.mxu1 %v4405_v12  ;;  %v2537_v2 = vmax.f32 %v2473_v52, 0.0  ;;  %v4411_v12 = vld [vmem:[%s5592_s5 + $0xa0] ss:$8 sps:$4 sm:$0xff]  }
 0x20f   : > { %v2538_v0 = vmax.f32 %v2474_v57, 0.0  ;;  %3162 = vmatprep.subr.bf16.mxu1 %v4410_v45  ;;  %v4416_v45 = vld [vmem:[%s5592_s5 + $0xb4] ss:$8 sps:$4 sm:$0xff]  }
 0x210   : > { %v2539_v3 = vmax.f32 %v2475_v61, 0.0 }
 0x211   : > { %v5155_v6 = vpack.c.bf16 %v2538_v0, %v2536_v63  ;;  %v4414_v63 = vld [vmem:[%s5592_s5 + $0xb0] ss:$8 sps:$4 sm:$0xff]  }
 0x212   : > { %v5157_v9 = vpack.c.bf16 %v2539_v3, %v2537_v2  ;;  %v2146_v14 = vpop.f32.mrb[24].mxu0  ;;  %3163 = vmatpush1.bf16.msra.mxu1 %v4408_v62  ;;  %v4419_v2 = vld [vmem:[%s5592_s5 + $0xc4] ss:$8 sps:$4 sm:$0xff]  }
 0x213   : > { %v2476_v13 = vadd.f32 %v5035_v54, %v2146_v14  ;;  %v2148_v56 = vpop.f32.mrb[25].mxu0  ;;  %3164 = vmatprep.subr.bf16.mxu1 %v4413_v1 }
 0x214   : > { %v2477_v52 = vadd.f32 %v5039_v55, %v2148_v56  ;;  %v2150_v57 = vpop.f32.mrb[26].mxu0  ;;  %2819 = vmatprep.mubr.bf16.mxu1 %v5157_v9 }
 0x215   : > { %v2478_v58 = vadd.f32 %v5035_v54, %v2150_v57  ;;  %v2152_v61 = vpop.f32.mrb[27].mxu0  ;;  %2820 = vmatmul.mubr.bf16.gmra.mrb[52].mxu1 %v5155_v6  ;;  %v2540_v0 = vmax.f32 %v2476_v13, 0.0 }
 0x216   : > { %v2479_v62 = vadd.f32 %v5039_v55, %v2152_v61  ;;  %3165 = vmatpush1.bf16.msra.mxu1 %v4411_v12  ;;  %v2541_v3 = vmax.f32 %v2477_v52, 0.0  ;;  %v4417_v12 = vld [vmem:[%s5592_s5 + $0xc0] ss:$8 sps:$4 sm:$0xff]  }
 0x217   : > { %v2542_v1 = vmax.f32 %v2478_v58, 0.0  ;;  %3166 = vmatprep.subr.bf16.mxu1 %v4416_v45  ;;  %v4422_v45 = vld [vmem:[%s5592_s5 + $0xd4] ss:$8 sps:$4 sm:$0xff]  }
 0x218   : > { %v2543_v14 = vmax.f32 %v2479_v62, 0.0 }
 0x219   : > { %v5177_v56 = vpack.c.bf16 %v2542_v1, %v2540_v0 }
 0x21a   : > { %v5179_v57 = vpack.c.bf16 %v2543_v14, %v2541_v3  ;;  %v2156_v53 = vpop.f32.mrb[28].mxu0  ;;  %3167 = vmatpush1.bf16.msra.mxu1 %v4414_v63  ;;  %v4425_v3 = vld [vmem:[%s5592_s5 + $0xe4] ss:$8 sps:$4 sm:$0xff]  }
 0x21b   : > { %v2480_v13 = vadd.f32 %v5035_v54, %v2156_v53  ;;  %v2158_v58 = vpop.f32.mrb[29].mxu0  ;;  %3168 = vmatprep.subr.bf16.mxu1 %v4419_v2  ;;  %v4420_v53 = vld [vmem:[%s5592_s5 + $0xd0] ss:$8 sps:$4 sm:$0xff]  }
 0x21c   : > { %v2481_v52 = vadd.f32 %v5039_v55, %v2158_v58  ;;  %v2160_v61 = vpop.f32.mrb[30].mxu0  ;;  %2827 = vmatprep.mubr.bf16.mxu1 %v5179_v57 }
 0x21d   : > { %v2482_v62 = vadd.f32 %v5035_v54, %v2160_v61  ;;  %v2162_v63 = vpop.f32.mrb[31].mxu0  ;;  %2828 = vmatmul.mubr.bf16.gmra.mrb[56].mxu1 %v5177_v56  ;;  %v2544_v1 = vmax.f32 %v2480_v13, 0.0 }
 0x21e   : > { %v2483_v0 = vadd.f32 %v5039_v55, %v2162_v63  ;;  %3169 = vmatpush1.bf16.msra.mxu1 %v4417_v12  ;;  %v2545_v14 = vmax.f32 %v2481_v52, 0.0  ;;  %v4423_v12 = vld [vmem:[%s5592_s5 + $0xe0] ss:$8 sps:$4 sm:$0xff]  }
 0x21f   : > { %v2546_v2 = vmax.f32 %v2482_v62, 0.0  ;;  %3170 = vmatprep.subr.bf16.mxu1 %v4422_v45  ;;  %v4428_v45 = vld [vmem:[%s5592_s5 + $0xf4] ss:$8 sps:$4 sm:$0xff]  }
 0x220   : > { %v2547_v58 = vmax.f32 %v2483_v0, 0.0 }
 0x221   : > { %v5199_v61 = vpack.c.bf16 %v2546_v2, %v2544_v1  ;;  %v4426_v2 = vld [vmem:[%s5592_s5 + $0xf0] ss:$8 sps:$4 sm:$0xff]  }
 0x222   : > { %v5201_v51 = vpack.c.bf16 %v2547_v58, %v2545_v14  ;;  %v2166_v46 = vpop.f32.mrb[32].mxu0  ;;  %3171 = vmatpush1.bf16.msra.mxu1 %v4420_v53 }
 0x223   : > { %5602 = vst [vmem:[#allocation4_spill] sm:$0xff] %v5199_v61  ;;  %v3924_v13 = vadd.f32 %v2166_v46, %v4962_v17  ;;  %v2168_v62 = vpop.f32.mrb[33].mxu0  ;;  %3172 = vmatprep.subr.bf16.mxu1 %v4425_v3 }
 0x224   : > { %v3925_v52 = vadd.f32 %v2168_v62, %v4964_v18  ;;  %v2170_v63 = vpop.f32.mrb[34].mxu0  ;;  %2835 = vmatprep.mubr.bf16.mxu1 %v5201_v51 }
 0x225   : > { %v2484_v0 = vadd.f32 %v3924_v13, %v5035_v54  ;;  %v3926_v53 = vadd.f32 %v2170_v63, %v4966_v19  ;;  %v2172_v1 = vpop.f32.mrb[35].mxu0  ;;  %2836 = vmatmul.mubr.bf16.gmra.mrb[60].mxu1 %v5199_v61 }
 0x226   : > { %v2485_v17 = vadd.f32 %v3925_v52, %v5039_v55  ;;  %v3927_v46 = vadd.f32 %v2172_v1, %v4968_v20  ;;  %3173 = vmatpush1.bf16.msra.mxu1 %v4423_v12 }
 0x227   : > { %v2486_v18 = vadd.f32 %v3926_v53, %v5035_v54  ;;  %3174 = vmatprep.subr.bf16.mxu1 %v4428_v45  ;;  %v2548_v14 = vmax.f32 %v2484_v0, 0.0 }
 0x228   : > { %v2487_v3 = vadd.f32 %v3927_v46, %v5039_v55  ;;  %v2549_v19 = vmax.f32 %v2485_v17, 0.0 }
 0x229   : > { %v2550_v58 = vmax.f32 %v2486_v18, 0.0 }
 0x22a   : > { %v2551_v13 = vmax.f32 %v2487_v3, 0.0  ;;  %v2176_v62 = vpop.f32.mrb[36].mxu0  ;;  %3175 = vmatpush1.bf16.msra.mxu1 %v4426_v2 }
 0x22b   : > { %v3928_v52 = vadd.f32 %v2176_v62, %v4970_v21  ;;  %v2178_v63 = vpop.f32.mrb[37].mxu0  ;;  %v5223_v20 = vpack.c.bf16 %v2550_v58, %v2548_v14 }
 0x22c   : > { %v3929_v12 = vadd.f32 %v2178_v63, %v4972_v22  ;;  %v2180_v1 = vpop.f32.mrb[38].mxu0  ;;  %v5226_v61 = vpack.c.bf16 %v2551_v13, %v2549_v19 }
 0x22d   : > { %v2488_v45 = vadd.f32 %v3928_v52, %v5035_v54  ;;  %v3930_v53 = vadd.f32 %v2180_v1, %v4974_v23  ;;  %v2182_v0 = vpop.f32.mrb[39].mxu0 }
 0x22e   : > { %v2489_v17 = vadd.f32 %v3929_v12, %v5039_v55  ;;  %v3931_v46 = vadd.f32 %v2182_v0, %v4976_v24  ;;  %2843 = vmatprep.mubr.bf16.mxu1 %v5226_v61 }
 0x22f   : > { %v2490_v21 = vadd.f32 %v3930_v53, %v5035_v54  ;;  %2844 = vmatmul.mubr.bf16.gmra.mrb[64].mxu1 %v5223_v20  ;;  %v2552_v2 = vmax.f32 %v2488_v45, 0.0 }
 0x230   : > { %v2491_v22 = vadd.f32 %v3931_v46, %v5039_v55  ;;  %v2553_v3 = vmax.f32 %v2489_v17, 0.0 }
 0x231   : > { %v2554_v18 = vmax.f32 %v2490_v21, 0.0 }
 0x232   : > { %v2555_v14 = vmax.f32 %v2491_v22, 0.0  ;;  %v2186_v58 = vpop.f32.mrb[40].mxu0 }
 0x233   : > { %v3932_v23 = vadd.f32 %v2186_v58, %v4978_v25  ;;  %v2188_v19 = vpop.f32.mrb[41].mxu0  ;;  %v5237_v13 = vpack.c.bf16 %v2554_v18, %v2552_v2 }
 0x234   : > { %v3933_v24 = vadd.f32 %v2188_v19, %v4980_v26  ;;  %v2190_v62 = vpop.f32.mrb[42].mxu0  ;;  %v5240_v52 = vpack.c.bf16 %v2555_v14, %v2553_v3 }
 0x235   : > { %v2492_v63 = vadd.f32 %v3932_v23, %v5035_v54  ;;  %v3934_v12 = vadd.f32 %v2190_v62, %v4982_v27  ;;  %v2192_v1 = vpop.f32.mrb[43].mxu0 }
 0x236   : > { %v2493_v45 = vadd.f32 %v3933_v24, %v5039_v55  ;;  %v3935_v53 = vadd.f32 %v2192_v1, %v4984_v28  ;;  %2851 = vmatprep.mubr.bf16.mxu1 %v5240_v52 }
 0x237   : > { %v2494_v25 = vadd.f32 %v3934_v12, %v5035_v54  ;;  %2852 = vmatmul.mubr.bf16.gmra.mrb[68].mxu1 %v5237_v13  ;;  %v2556_v0 = vmax.f32 %v2492_v63, 0.0 }
 0x238   : > { %v2495_v26 = vadd.f32 %v3935_v53, %v5039_v55  ;;  %v2557_v46 = vmax.f32 %v2493_v45, 0.0 }
 0x239   : > { %v2558_v17 = vmax.f32 %v2494_v25, 0.0 }
 0x23a   : > { %v2559_v21 = vmax.f32 %v2495_v26, 0.0  ;;  %v2196_v22 = vpop.f32.mrb[44].mxu0 }
 0x23b   : > { %v3936_v27 = vadd.f32 %v2196_v22, %v4986_v29  ;;  %v2198_v2 = vpop.f32.mrb[45].mxu0  ;;  %v5251_v18 = vpack.c.bf16 %v2558_v17, %v2556_v0 }
 0x23c   : > { %v3937_v28 = vadd.f32 %v2198_v2, %v4988_v30  ;;  %v2200_v3 = vpop.f32.mrb[46].mxu0  ;;  %v5254_v14 = vpack.c.bf16 %v2559_v21, %v2557_v46 }
 0x23d   : > { %v2496_v58 = vadd.f32 %v3936_v27, %v5035_v54  ;;  %v3938_v23 = vadd.f32 %v2200_v3, %v4990_v31  ;;  %v2202_v19 = vpop.f32.mrb[47].mxu0 }
 0x23e   : > { %v2497_v24 = vadd.f32 %v3937_v28, %v5039_v55  ;;  %v3939_v62 = vadd.f32 %v2202_v19, %v4992_v32  ;;  %2859 = vmatprep.mubr.bf16.mxu1 %v5254_v14 }
 0x23f   : > { %v2498_v29 = vadd.f32 %v3938_v23, %v5035_v54  ;;  %2860 = vmatmul.mubr.bf16.gmra.mrb[72].mxu1 %v5251_v18  ;;  %v2560_v63 = vmax.f32 %v2496_v58, 0.0 }
 0x240   : > { %v2499_v30 = vadd.f32 %v3939_v62, %v5039_v55  ;;  %v2561_v1 = vmax.f32 %v2497_v24, 0.0 }
 0x241   : > { %v2562_v12 = vmax.f32 %v2498_v29, 0.0 }
 0x242   : > { %v2563_v45 = vmax.f32 %v2499_v30, 0.0  ;;  %v2206_v53 = vpop.f32.mrb[48].mxu0 }
 0x243   : > { %v3940_v31 = vadd.f32 %v2206_v53, %v4994_v33  ;;  %v2208_v25 = vpop.f32.mrb[49].mxu0  ;;  %v5265_v26 = vpack.c.bf16 %v2562_v12, %v2560_v63 }
 0x244   : > { %v3941_v32 = vadd.f32 %v2208_v25, %v4996_v34  ;;  %v2210_v0 = vpop.f32.mrb[50].mxu0  ;;  %v5268_v17 = vpack.c.bf16 %v2563_v45, %v2561_v1 }
 0x245   : > { %v2500_v46 = vadd.f32 %v3940_v31, %v5035_v54  ;;  %v3942_v21 = vadd.f32 %v2210_v0, %v4998_v35  ;;  %v2212_v22 = vpop.f32.mrb[51].mxu0 }
 0x246   : > { %v2501_v27 = vadd.f32 %v3941_v32, %v5039_v55  ;;  %v3943_v2 = vadd.f32 %v2212_v22, %v5000_v36  ;;  %2867 = vmatprep.mubr.bf16.mxu1 %v5268_v17 }
 0x247   : > { %v2502_v33 = vadd.f32 %v3942_v21, %v5035_v54  ;;  %2868 = vmatmul.mubr.bf16.gmra.mrb[76].mxu1 %v5265_v26  ;;  %v2564_v28 = vmax.f32 %v2500_v46, 0.0 }
 0x248   : > { %v2503_v34 = vadd.f32 %v3943_v2, %v5039_v55  ;;  %v2565_v58 = vmax.f32 %v2501_v27, 0.0 }
 0x249   : > { %v2566_v3 = vmax.f32 %v2502_v33, 0.0 }
 0x24a   : > { %v2567_v23 = vmax.f32 %v2503_v34, 0.0  ;;  %v2216_v19 = vpop.f32.mrb[52].mxu0 }
 0x24b   : > { %v3944_v35 = vadd.f32 %v2216_v19, %v5002_v37  ;;  %v2218_v24 = vpop.f32.mrb[53].mxu0  ;;  %v5279_v62 = vpack.c.bf16 %v2566_v3, %v2564_v28 }
 0x24c   : > { %v3945_v36 = vadd.f32 %v2218_v24, %v5004_v38  ;;  %v2220_v29 = vpop.f32.mrb[54].mxu0  ;;  %v5282_v30 = vpack.c.bf16 %v2567_v23, %v2565_v58 }
 0x24d   : > { %v2504_v63 = vadd.f32 %v3944_v35, %v5035_v54  ;;  %v3946_v12 = vadd.f32 %v2220_v29, %v5006_v39  ;;  %v2222_v1 = vpop.f32.mrb[55].mxu0 }
 0x24e   : > { %v2505_v45 = vadd.f32 %v3945_v36, %v5039_v55  ;;  %v3947_v53 = vadd.f32 %v2222_v1, %v5008_v40  ;;  %2875 = vmatprep.mubr.bf16.mxu1 %v5282_v30 }
 0x24f   : > { %v2506_v37 = vadd.f32 %v3946_v12, %v5035_v54  ;;  %2876 = vmatmul.mubr.bf16.gmra.mrb[80].mxu1 %v5279_v62  ;;  %v2568_v31 = vmax.f32 %v2504_v63, 0.0 }
 0x250   : > { %v2507_v38 = vadd.f32 %v3947_v53, %v5039_v55  ;;  %v2569_v32 = vmax.f32 %v2505_v45, 0.0 }
 0x251   : > { %v2570_v25 = vmax.f32 %v2506_v37, 0.0 }
 0x252   : > { %v2571_v0 = vmax.f32 %v2507_v38, 0.0  ;;  %v2226_v46 = vpop.f32.mrb[56].mxu0 }
 0x253   : > { %v3948_v39 = vadd.f32 %v2226_v46, %v5010_v41  ;;  %v2228_v21 = vpop.f32.mrb[57].mxu0  ;;  %v5293_v22 = vpack.c.bf16 %v2570_v25, %v2568_v31 }
 0x254   : > { %v3949_v40 = vadd.f32 %v2228_v21, %v5012_v42  ;;  %v2230_v27 = vpop.f32.mrb[58].mxu0  ;;  %v5296_v2 = vpack.c.bf16 %v2571_v0, %v2569_v32 }
 0x255   : > { %v2508_v33 = vadd.f32 %v3948_v39, %v5035_v54  ;;  %v3950_v34 = vadd.f32 %v2230_v27, %v5014_v43  ;;  %v2232_v28 = vpop.f32.mrb[59].mxu0 }
 0x256   : > { %v2509_v3 = vadd.f32 %v3949_v40, %v5039_v55  ;;  %v3951_v58 = vadd.f32 %v2232_v28, %v5016_v44  ;;  %2883 = vmatprep.mubr.bf16.mxu1 %v5296_v2 }
 0x257   : > { %v2510_v41 = vadd.f32 %v3950_v34, %v5035_v54  ;;  %2884 = vmatmul.mubr.bf16.gmra.mrb[84].mxu1 %v5293_v22  ;;  %v2572_v23 = vmax.f32 %v2508_v33, 0.0 }
 0x258   : > { %v2511_v42 = vadd.f32 %v3951_v58, %v5039_v55  ;;  %v2573_v35 = vmax.f32 %v2509_v3, 0.0 }
 0x259   : > { %v2574_v19 = vmax.f32 %v2510_v41, 0.0 }
 0x25a   : > { %v2575_v24 = vmax.f32 %v2511_v42, 0.0  ;;  %v2236_v36 = vpop.f32.mrb[60].mxu0 }
 0x25b   : > { %v3952_v43 = vadd.f32 %v2236_v36, %v5020_v47  ;;  %v2238_v29 = vpop.f32.mrb[61].mxu0  ;;  %v5307_v63 = vpack.c.bf16 %v2574_v19, %v2572_v23 }
 0x25c   : > { %v3953_v44 = vadd.f32 %v2238_v29, %v5022_v48  ;;  %v2240_v12 = vpop.f32.mrb[62].mxu0  ;;  %v5310_v1 = vpack.c.bf16 %v2575_v24, %v2573_v35 }
 0x25d   : > { %v2512_v45 = vadd.f32 %v3952_v43, %v5035_v54  ;;  %v3954_v53 = vadd.f32 %v2240_v12, %v5024_v49  ;;  %v2242_v37 = vpop.f32.mrb[63].mxu0 }
 0x25e   : > { %v2513_v38 = vadd.f32 %v3953_v44, %v5039_v55  ;;  %v3955_v31 = vadd.f32 %v2242_v37, %v5026_v50  ;;  %2891 = vmatprep.mubr.bf16.mxu1 %v5310_v1  ;;  %v5603_v50 = vld [vmem:[#allocation4_spill] sm:$0xff] }
 0x25f   : > { %v2514_v47 = vadd.f32 %v3954_v53, %v5035_v54  ;;  %2892 = vmatmul.mubr.bf16.gmra.mrb[88].mxu1 %v5307_v63  ;;  %v2576_v25 = vmax.f32 %v2512_v45, 0.0 }
 0x260   : > { %v2515_v48 = vadd.f32 %v3955_v31, %v5039_v55  ;;  %v2577_v0 = vmax.f32 %v2513_v38, 0.0 }
 0x261   : > { %v2578_v32 = vmax.f32 %v2514_v47, 0.0 }
 0x262   : > { %v2579_v46 = vmax.f32 %v2515_v48, 0.0 }
 0x263   : > { %v5320_v39 = vpack.c.bf16 %v2578_v32, %v2576_v25 }
 0x264   : > { %v5322_v49 = vpack.c.bf16 %v2579_v46, %v2577_v0 }
 0x266   : > { %2899 = vmatprep.mubr.bf16.mxu1 %v5322_v49 }
 0x267   : > { %2900 = vmatmul.mubr.bf16.gmra.mrb[92].mxu1 %v5320_v39 }
 0x268   : > { %3176 = vmatprep.mubr.bf16.mxu1 %v5047_v5 }
 0x26f   : > { %3177 = vmatmul.mubr.bf16.vlgmr.msra.gmra.mrb[96].mxu1 %v5045_v4 }
 0x270   : > { %3186 = vmatprep.mubr.bf16.mxu1 %v5069_v60 }
 0x277   : > { %3187 = vmatmul.mubr.bf16.gmra.mrb[100].mxu1 %v5067_v59 }
 0x278   : > { %3196 = vmatprep.mubr.bf16.mxu1 %v5091_v16 }
 0x27f   : > { %3197 = vmatmul.mubr.bf16.gmra.mrb[104].mxu1 %v5089_v15 }
 0x280   : > { %3206 = vmatprep.mubr.bf16.mxu1 %v5113_v11 }
 0x287   : > { %3207 = vmatmul.mubr.bf16.gmra.mrb[108].mxu1 %v5111_v10 }
 0x288   : > { %3216 = vmatprep.mubr.bf16.mxu1 %v5135_v8 }
 0x28f   : > { %3217 = vmatmul.mubr.bf16.gmra.mrb[112].mxu1 %v5133_v7 }
 0x290   : > { %3226 = vmatprep.mubr.bf16.mxu1 %v5157_v9 }
 0x297   : > { %3227 = vmatmul.mubr.bf16.gmra.mrb[116].mxu1 %v5155_v6 }
 0x298   : > { %3236 = vmatprep.mubr.bf16.mxu1 %v5179_v57 }
 0x29f   : > { %3237 = vmatmul.mubr.bf16.gmra.mrb[120].mxu1 %v5177_v56 }
 0x2a0   : > { %3246 = vmatprep.mubr.bf16.mxu1 %v5201_v51  ;;  %v5353_v51 = vld [vmem:[%s5591_s4] ss:$0 sm:$0xff] }
 0x2a7   : > { %3247 = vmatmul.mubr.bf16.gmra.mrb[124].mxu1 %v5603_v50 }
 0x2a8   : > { %3256 = vmatprep.mubr.bf16.mxu1 %v5226_v61 }
 0x2af   : > { %3257 = vmatmul.mubr.bf16.gmra.mrb[128].mxu1 %v5223_v20 }
 0x2b0   : > { %3266 = vmatprep.mubr.bf16.mxu1 %v5240_v52 }
 0x2b7   : > { %3267 = vmatmul.mubr.bf16.gmra.mrb[132].mxu1 %v5237_v13 }
 0x2b8   : > { %3276 = vmatprep.mubr.bf16.mxu1 %v5254_v14 }
 0x2bf   : > { %3277 = vmatmul.mubr.bf16.gmra.mrb[136].mxu1 %v5251_v18 }
 0x2c0   : > { %v3796_v54 = vpop.f32.mrb[32].mxu1  ;;  %3286 = vmatprep.mubr.bf16.mxu1 %v5268_v17 }
 0x2c1   : > { %v3797_v55 = vpop.f32.mrb[33].mxu1 }
 0x2c2   : > { %v3798_v4 = vadd.f32 %v3797_v55, %v3796_v54  ;;  %v3799_v5 = vpop.f32.mrb[34].mxu1 }
 0x2c3   : > { %v3800_v59 = vpop.f32.mrb[35].mxu1 }
 0x2c4   : > { %v2782_v60 = vadd.f32 %v3798_v4, %v5353_v51  ;;  %v3801_v15 = vadd.f32 %v3800_v59, %v3799_v5 }
 0x2c6   : > { %2908 = vst [vmem:[%s5358_s13] sm:$0xff] %v2782_v60  ;;  %v2785_v16 = vadd.f32 %v3801_v15, %v5353_v51 }
 0x2c7   : > { %3287 = vmatmul.mubr.bf16.gmra.mrb[140].mxu1 %v5265_v26 }
 0x2c8   : > { %2909 = vst [vmem:[%s5358_s13 + $0x8] sm:$0xff] %v2785_v16  ;;  %v3802_v10 = vpop.f32.mrb[36].mxu1  ;;  %3296 = vmatprep.mubr.bf16.mxu1 %v5282_v30 }
 0x2c9   : > { %v3803_v11 = vpop.f32.mrb[37].mxu1 }
 0x2ca   : > { %v3804_v7 = vadd.f32 %v3803_v11, %v3802_v10  ;;  %v3805_v8 = vpop.f32.mrb[38].mxu1 }
 0x2cb   : > { %v3806_v6 = vpop.f32.mrb[39].mxu1 }
 0x2cc   : > { %v2790_v9 = vadd.f32 %v3804_v7, %v5353_v51  ;;  %v3807_v56 = vadd.f32 %v3806_v6, %v3805_v8 }
 0x2ce   : > { %2910 = vst [vmem:[%s5358_s13 + $0x10] sm:$0xff] %v2790_v9  ;;  %v2793_v57 = vadd.f32 %v3807_v56, %v5353_v51 }
 0x2cf   : > { %3297 = vmatmul.mubr.bf16.gmra.mrb[144].mxu1 %v5279_v62 }
 0x2d0   : > { %2911 = vst [vmem:[%s5358_s13 + $0x18] sm:$0xff] %v2793_v57  ;;  %v3808_v61 = vpop.f32.mrb[40].mxu1  ;;  %3306 = vmatprep.mubr.bf16.mxu1 %v5296_v2 }
 0x2d1   : > { %v3809_v20 = vpop.f32.mrb[41].mxu1 }
 0x2d2   : > { %v3810_v13 = vadd.f32 %v3809_v20, %v3808_v61  ;;  %v3811_v52 = vpop.f32.mrb[42].mxu1 }
 0x2d3   : > { %v3812_v18 = vpop.f32.mrb[43].mxu1 }
 0x2d4   : > { %v2798_v14 = vadd.f32 %v3810_v13, %v5353_v51  ;;  %v3813_v26 = vadd.f32 %v3812_v18, %v3811_v52 }
 0x2d6   : > { %2912 = vst [vmem:[%s5358_s13 + $0x20] sm:$0xff] %v2798_v14  ;;  %v2801_v17 = vadd.f32 %v3813_v26, %v5353_v51 }
 0x2d7   : > { %3307 = vmatmul.mubr.bf16.gmra.mrb[148].mxu1 %v5293_v22 }
 0x2d8   : > { %2913 = vst [vmem:[%s5358_s13 + $0x28] sm:$0xff] %v2801_v17  ;;  %v3814_v62 = vpop.f32.mrb[44].mxu1  ;;  %3316 = vmatprep.mubr.bf16.mxu1 %v5310_v1 }
 0x2d9   : > { %v3815_v30 = vpop.f32.mrb[45].mxu1 }
 0x2da   : > { %v3816_v21 = vadd.f32 %v3815_v30, %v3814_v62  ;;  %v3817_v40 = vpop.f32.mrb[46].mxu1 }
 0x2db   : > { %v3818_v27 = vpop.f32.mrb[47].mxu1 }
 0x2dc   : > { %v2806_v2 = vadd.f32 %v3816_v21, %v5353_v51  ;;  %v3819_v33 = vadd.f32 %v3818_v27, %v3817_v40 }
 0x2de   : > { %2914 = vst [vmem:[%s5358_s13 + $0x30] sm:$0xff] %v2806_v2  ;;  %v2809_v34 = vadd.f32 %v3819_v33, %v5353_v51 }
 0x2df   : > { %3317 = vmatmul.mubr.bf16.gmra.mrb[152].mxu1 %v5307_v63 }
 0x2e0   : > { %2915 = vst [vmem:[%s5358_s13 + $0x38] sm:$0xff] %v2809_v34  ;;  %v3820_v22 = vpop.f32.mrb[48].mxu1  ;;  %3326 = vmatprep.mubr.bf16.mxu1 %v5322_v49 }
 0x2e1   : > { %v3821_v28 = vpop.f32.mrb[49].mxu1 }
 0x2e2   : > { %v3822_v3 = vadd.f32 %v3821_v28, %v3820_v22  ;;  %v3823_v58 = vpop.f32.mrb[50].mxu1 }
 0x2e3   : > { %v3824_v41 = vpop.f32.mrb[51].mxu1 }
 0x2e4   : > { %v2814_v42 = vadd.f32 %v3822_v3, %v5353_v51  ;;  %v3825_v23 = vadd.f32 %v3824_v41, %v3823_v58 }
 0x2e6   : > { %2916 = vst [vmem:[%s5358_s13 + $0x40] sm:$0xff] %v2814_v42  ;;  %v2817_v19 = vadd.f32 %v3825_v23, %v5353_v51 }
 0x2e7   : > { %3327 = vmatmul.mubr.bf16.gmra.mrb[156].mxu1 %v5320_v39 }
 0x2e8   : > { %2917 = vst [vmem:[%s5358_s13 + $0x48] sm:$0xff] %v2817_v19  ;;  %v3826_v35 = vpop.f32.mrb[52].mxu1 }
 0x2e9   : > { %v3827_v24 = vpop.f32.mrb[53].mxu1 }
 0x2ea   : > { %v3828_v36 = vadd.f32 %v3827_v24, %v3826_v35  ;;  %v3829_v43 = vpop.f32.mrb[54].mxu1 }
 0x2eb   : > { %v3830_v29 = vpop.f32.mrb[55].mxu1 }
 0x2ec   : > { %v2822_v63 = vadd.f32 %v3828_v36, %v5353_v51  ;;  %v3831_v44 = vadd.f32 %v3830_v29, %v3829_v43 }
 0x2ee   : > { %2918 = vst [vmem:[%s5358_s13 + $0x50] sm:$0xff] %v2822_v63  ;;  %v2825_v12 = vadd.f32 %v3831_v44, %v5353_v51 }
 0x2f0   : > { %2919 = vst [vmem:[%s5358_s13 + $0x58] sm:$0xff] %v2825_v12  ;;  %v3832_v1 = vpop.f32.mrb[56].mxu1 }
 0x2f1   : > { %v3833_v45 = vpop.f32.mrb[57].mxu1 }
 0x2f2   : > { %v3834_v53 = vadd.f32 %v3833_v45, %v3832_v1  ;;  %v3835_v37 = vpop.f32.mrb[58].mxu1 }
 0x2f3   : > { %v3836_v38 = vpop.f32.mrb[59].mxu1 }
 0x2f4   : > { %v2830_v31 = vadd.f32 %v3834_v53, %v5353_v51  ;;  %v3837_v47 = vadd.f32 %v3836_v38, %v3835_v37 }
 0x2f6   : > { %2920 = vst [vmem:[%s5358_s13 + $0x60] sm:$0xff] %v2830_v31  ;;  %v2833_v48 = vadd.f32 %v3837_v47, %v5353_v51 }
 0x2f8   : > { %2921 = vst [vmem:[%s5358_s13 + $0x68] sm:$0xff] %v2833_v48  ;;  %v3838_v25 = vpop.f32.mrb[60].mxu1 }
 0x2f9   : > { %v3839_v32 = vpop.f32.mrb[61].mxu1 }
 0x2fa   : > { %v3840_v0 = vadd.f32 %v3839_v32, %v3838_v25  ;;  %v3841_v46 = vpop.f32.mrb[62].mxu1 }
 0x2fb   : > { %v3842_v39 = vpop.f32.mrb[63].mxu1 }
 0x2fc   : > { %v2838_v49 = vadd.f32 %v3840_v0, %v5353_v51  ;;  %v3843_v50 = vadd.f32 %v3842_v39, %v3841_v46 }
 0x2fe   : > { %2922 = vst [vmem:[%s5358_s13 + $0x70] sm:$0xff] %v2838_v49  ;;  %v2841_v54 = vadd.f32 %v3843_v50, %v5353_v51  ;;  %v2972_v49 = vld [vmem:[%s5593_s6] sm:$0x3] }
 0x300   : > { %2923 = vst [vmem:[%s5358_s13 + $0x78] sm:$0xff] %v2841_v54 }
 0x302   : > { %v3844_v55 = vpop.f32.mrb[64].mxu1 }
 0x303   : > { %v3845_v4 = vpop.f32.mrb[65].mxu1 }
 0x304   : > { %v3846_v5 = vadd.f32 %v3845_v4, %v3844_v55  ;;  %v3847_v59 = vpop.f32.mrb[66].mxu1  ;;  %v5604_v4 = vld [vmem:[#allocation3_spill] sm:$0xff] }
 0x305   : > { %v3848_v60 = vpop.f32.mrb[67].mxu1 }
 0x306   : > { %v2846_v15 = vadd.f32 %v3846_v5, %v5353_v51  ;;  %v3849_v16 = vadd.f32 %v3848_v60, %v3847_v59  ;;  %v5605_v5 = vsub.s32 0, %v5604_v4 }
 0x308   : > { %2924 = vst [vmem:[%s5358_s13 + $0x80] sm:$0xff] %v2846_v15  ;;  %v2849_v10 = vadd.f32 %v3849_v16, %v5353_v51  ;;  %v5436_v59 = vrot.slane %v2972_v49, %v5605_v5  ;;  %v5606_v15 = vsub.s32 1, %v5604_v4 }
 0x30a   : > { %2925 = vst [vmem:[%s5358_s13 + $0x88] sm:$0xff] %v2849_v10  ;;  %v3850_v11 = vpop.f32.mrb[68].mxu1  ;;  %v5442_v16 = vrot.slane %v2972_v49, %v5606_v15 }
 0x30b   : > { %v3851_v7 = vpop.f32.mrb[69].mxu1 }
 0x30c   : > { %v3852_v8 = vadd.f32 %v3851_v7, %v3850_v11  ;;  %v3853_v6 = vpop.f32.mrb[70].mxu1 }
 0x30d   : > { %v3854_v9 = vpop.f32.mrb[71].mxu1 }
 0x30e   : > { %v2854_v56 = vadd.f32 %v3852_v8, %v5353_v51  ;;  %v3855_v57 = vadd.f32 %v3854_v9, %v3853_v6 }
 0x310   : > { %2926 = vst [vmem:[%s5358_s13 + $0x90] sm:$0xff] %v2854_v56  ;;  %v2857_v61 = vadd.f32 %v3855_v57, %v5353_v51 }
 0x312   : > { %2927 = vst [vmem:[%s5358_s13 + $0x98] sm:$0xff] %v2857_v61  ;;  %v3856_v20 = vpop.f32.mrb[72].mxu1 }
 0x313   : > { %v3857_v13 = vpop.f32.mrb[73].mxu1 }
 0x314   : > { %v3858_v52 = vadd.f32 %v3857_v13, %v3856_v20  ;;  %v3859_v18 = vpop.f32.mrb[74].mxu1 }
 0x315   : > { %v3860_v14 = vpop.f32.mrb[75].mxu1 }
 0x316   : > { %v2862_v26 = vadd.f32 %v3858_v52, %v5353_v51  ;;  %v3861_v17 = vadd.f32 %v3860_v14, %v3859_v18 }
 0x318   : > { %2928 = vst [vmem:[%s5358_s13 + $0xa0] sm:$0xff] %v2862_v26  ;;  %v2865_v62 = vadd.f32 %v3861_v17, %v5353_v51 }
 0x31a   : > { %2929 = vst [vmem:[%s5358_s13 + $0xa8] sm:$0xff] %v2865_v62  ;;  %v3862_v30 = vpop.f32.mrb[76].mxu1 }
 0x31b   : > { %v3863_v21 = vpop.f32.mrb[77].mxu1 }
 0x31c   : > { %v3864_v40 = vadd.f32 %v3863_v21, %v3862_v30  ;;  %v3865_v27 = vpop.f32.mrb[78].mxu1 }
 0x31d   : > { %v3866_v2 = vpop.f32.mrb[79].mxu1 }
 0x31e   : > { %v2870_v33 = vadd.f32 %v3864_v40, %v5353_v51  ;;  %v3867_v34 = vadd.f32 %v3866_v2, %v3865_v27 }
 0x320   : > { %2930 = vst [vmem:[%s5358_s13 + $0xb0] sm:$0xff] %v2870_v33  ;;  %v2873_v22 = vadd.f32 %v3867_v34, %v5353_v51 }
 0x322   : > { %2931 = vst [vmem:[%s5358_s13 + $0xb8] sm:$0xff] %v2873_v22  ;;  %v3868_v28 = vpop.f32.mrb[80].mxu1 }
 0x323   : > { %v3869_v3 = vpop.f32.mrb[81].mxu1 }
 0x324   : > { %v3870_v58 = vadd.f32 %v3869_v3, %v3868_v28  ;;  %v3871_v41 = vpop.f32.mrb[82].mxu1 }
 0x325   : > { %v3872_v42 = vpop.f32.mrb[83].mxu1 }
 0x326   : > { %v2878_v23 = vadd.f32 %v3870_v58, %v5353_v51  ;;  %v3873_v19 = vadd.f32 %v3872_v42, %v3871_v41 }
 0x328   : > { %2932 = vst [vmem:[%s5358_s13 + $0xc0] sm:$0xff] %v2878_v23  ;;  %v2881_v35 = vadd.f32 %v3873_v19, %v5353_v51 }
 0x32a   : > { %2933 = vst [vmem:[%s5358_s13 + $0xc8] sm:$0xff] %v2881_v35  ;;  %v3874_v24 = vpop.f32.mrb[84].mxu1 }
 0x32b   : > { %v3875_v36 = vpop.f32.mrb[85].mxu1 }
 0x32c   : > { %v3876_v43 = vadd.f32 %v3875_v36, %v3874_v24  ;;  %v3877_v29 = vpop.f32.mrb[86].mxu1 }
 0x32d   : > { %v3878_v63 = vpop.f32.mrb[87].mxu1 }
 0x32e   : > { %v2886_v44 = vadd.f32 %v3876_v43, %v5353_v51  ;;  %v3879_v12 = vadd.f32 %v3878_v63, %v3877_v29 }
 0x330   : > { %2934 = vst [vmem:[%s5358_s13 + $0xd0] sm:$0xff] %v2886_v44  ;;  %v2889_v1 = vadd.f32 %v3879_v12, %v5353_v51 }
 0x332   : > { %2935 = vst [vmem:[%s5358_s13 + $0xd8] sm:$0xff] %v2889_v1  ;;  %v3880_v45 = vpop.f32.mrb[88].mxu1 }
 0x333   : > { %v3881_v53 = vpop.f32.mrb[89].mxu1 }
 0x334   : > { %v3882_v37 = vadd.f32 %v3881_v53, %v3880_v45  ;;  %v3883_v38 = vpop.f32.mrb[90].mxu1 }
 0x335   : > { %v3884_v31 = vpop.f32.mrb[91].mxu1 }
 0x336   : > { %v2894_v47 = vadd.f32 %v3882_v37, %v5353_v51  ;;  %v3885_v48 = vadd.f32 %v3884_v31, %v3883_v38 }
 0x338   : > { %2936 = vst [vmem:[%s5358_s13 + $0xe0] sm:$0xff] %v2894_v47  ;;  %v2897_v25 = vadd.f32 %v3885_v48, %v5353_v51 }
 0x33a   : > { %2937 = vst [vmem:[%s5358_s13 + $0xe8] sm:$0xff] %v2897_v25  ;;  %v3886_v32 = vpop.f32.mrb[92].mxu1 }
 0x33b   : > { %v3887_v0 = vpop.f32.mrb[93].mxu1 }
 0x33c   : > { %v3888_v46 = vadd.f32 %v3887_v0, %v3886_v32  ;;  %v3889_v39 = vpop.f32.mrb[94].mxu1 }
 0x33d   : > { %v3890_v50 = vpop.f32.mrb[95].mxu1 }
 0x33e   : > { %v2902_v54 = vadd.f32 %v3888_v46, %v5353_v51  ;;  %v3891_v55 = vadd.f32 %v3890_v50, %v3889_v39 }
 0x340   : > { %2938 = vst [vmem:[%s5358_s13 + $0xf0] sm:$0xff] %v2902_v54  ;;  %v2905_v60 = vadd.f32 %v3891_v55, %v5353_v51 }
 0x342   : > { %2939 = vst [vmem:[%s5358_s13 + $0xf8] sm:$0xff] %v2905_v60  ;;  %v3178_v10 = vpop.f32.mrb[96].mxu1 }
 0x343   : > { %v3179_v11 = vadd.f32 %v3178_v10, %v5436_v59  ;;  %v3180_v7 = vpop.f32.mrb[97].mxu1 }
 0x344   : > { %v3181_v51 = vadd.f32 %v3180_v7, %v5442_v16  ;;  %v3182_v8 = vpop.f32.mrb[98].mxu1 }
 0x345   : > { %3337 = vst [vmem:[%s5448_s20] sm:$0xff] %v3179_v11  ;;  %v3183_v6 = vadd.f32 %v3182_v8, %v5436_v59  ;;  %v3184_v9 = vpop.f32.mrb[99].mxu1 }
 0x346   : > { %3338 = vst [vmem:[%s5448_s20 + $0x8] sm:$0xff] %v3181_v51  ;;  %v3185_v56 = vadd.f32 %v3184_v9, %v5442_v16 }
 0x347   : > { %3339 = vst [vmem:[%s5448_s20 + $0x10] sm:$0xff] %v3183_v6 }
 0x348   : > { %3340 = vst [vmem:[%s5448_s20 + $0x18] sm:$0xff] %v3185_v56 }
 0x34a   : > { %v3188_v57 = vpop.f32.mrb[100].mxu1 }
 0x34b   : > { %v3189_v61 = vadd.f32 %v3188_v57, %v5436_v59  ;;  %v3190_v20 = vpop.f32.mrb[101].mxu1 }
 0x34c   : > { %v3191_v13 = vadd.f32 %v3190_v20, %v5442_v16  ;;  %v3192_v52 = vpop.f32.mrb[102].mxu1 }
 0x34d   : > { %3341 = vst [vmem:[%s5448_s20 + $0x20] sm:$0xff] %v3189_v61  ;;  %v3193_v18 = vadd.f32 %v3192_v52, %v5436_v59  ;;  %v3194_v14 = vpop.f32.mrb[103].mxu1 }
 0x34e   : > { %3342 = vst [vmem:[%s5448_s20 + $0x28] sm:$0xff] %v3191_v13  ;;  %v3195_v26 = vadd.f32 %v3194_v14, %v5442_v16 }
 0x34f   : > { %3343 = vst [vmem:[%s5448_s20 + $0x30] sm:$0xff] %v3193_v18 }
 0x350   : > { %3344 = vst [vmem:[%s5448_s20 + $0x38] sm:$0xff] %v3195_v26 }
 0x352   : > { %v3198_v17 = vpop.f32.mrb[104].mxu1 }
 0x353   : > { %v3199_v62 = vadd.f32 %v3198_v17, %v5436_v59  ;;  %v3200_v30 = vpop.f32.mrb[105].mxu1 }
 0x354   : > { %v3201_v21 = vadd.f32 %v3200_v30, %v5442_v16  ;;  %v3202_v40 = vpop.f32.mrb[106].mxu1 }
 0x355   : > { %3345 = vst [vmem:[%s5448_s20 + $0x40] sm:$0xff] %v3199_v62  ;;  %v3203_v27 = vadd.f32 %v3202_v40, %v5436_v59  ;;  %v3204_v2 = vpop.f32.mrb[107].mxu1 }
 0x356   : > { %3346 = vst [vmem:[%s5448_s20 + $0x48] sm:$0xff] %v3201_v21  ;;  %v3205_v33 = vadd.f32 %v3204_v2, %v5442_v16 }
 0x357   : > { %3347 = vst [vmem:[%s5448_s20 + $0x50] sm:$0xff] %v3203_v27 }
 0x358   : > { %3348 = vst [vmem:[%s5448_s20 + $0x58] sm:$0xff] %v3205_v33 }
 0x35a   : > { %v3208_v34 = vpop.f32.mrb[108].mxu1 }
 0x35b   : > { %v3209_v22 = vadd.f32 %v3208_v34, %v5436_v59  ;;  %v3210_v28 = vpop.f32.mrb[109].mxu1 }
 0x35c   : > { %v3211_v3 = vadd.f32 %v3210_v28, %v5442_v16  ;;  %v3212_v58 = vpop.f32.mrb[110].mxu1 }
 0x35d   : > { %3349 = vst [vmem:[%s5448_s20 + $0x60] sm:$0xff] %v3209_v22  ;;  %v3213_v41 = vadd.f32 %v3212_v58, %v5436_v59  ;;  %v3214_v42 = vpop.f32.mrb[111].mxu1 }
 0x35e   : > { %3350 = vst [vmem:[%s5448_s20 + $0x68] sm:$0xff] %v3211_v3  ;;  %v3215_v23 = vadd.f32 %v3214_v42, %v5442_v16 }
 0x35f   : > { %3351 = vst [vmem:[%s5448_s20 + $0x70] sm:$0xff] %v3213_v41 }
 0x360   : > { %3352 = vst [vmem:[%s5448_s20 + $0x78] sm:$0xff] %v3215_v23 }
 0x362   : > { %v3218_v19 = vpop.f32.mrb[112].mxu1 }
 0x363   : > { %v3219_v35 = vadd.f32 %v3218_v19, %v5436_v59  ;;  %v3220_v24 = vpop.f32.mrb[113].mxu1 }
 0x364   : > { %v3221_v36 = vadd.f32 %v3220_v24, %v5442_v16  ;;  %v3222_v43 = vpop.f32.mrb[114].mxu1 }
 0x365   : > { %3353 = vst [vmem:[%s5448_s20 + $0x80] sm:$0xff] %v3219_v35  ;;  %v3223_v29 = vadd.f32 %v3222_v43, %v5436_v59  ;;  %v3224_v63 = vpop.f32.mrb[115].mxu1 }
 0x366   : > { %3354 = vst [vmem:[%s5448_s20 + $0x88] sm:$0xff] %v3221_v36  ;;  %v3225_v44 = vadd.f32 %v3224_v63, %v5442_v16 }
 0x367   : > { %3355 = vst [vmem:[%s5448_s20 + $0x90] sm:$0xff] %v3223_v29 }
 0x368   : > { %3356 = vst [vmem:[%s5448_s20 + $0x98] sm:$0xff] %v3225_v44 }
 0x36a   : > { %v3228_v12 = vpop.f32.mrb[116].mxu1 }
 0x36b   : > { %v3229_v1 = vadd.f32 %v3228_v12, %v5436_v59  ;;  %v3230_v45 = vpop.f32.mrb[117].mxu1 }
 0x36c   : > { %v3231_v53 = vadd.f32 %v3230_v45, %v5442_v16  ;;  %v3232_v37 = vpop.f32.mrb[118].mxu1 }
 0x36d   : > { %3357 = vst [vmem:[%s5448_s20 + $0xa0] sm:$0xff] %v3229_v1  ;;  %v3233_v38 = vadd.f32 %v3232_v37, %v5436_v59  ;;  %v3234_v31 = vpop.f32.mrb[119].mxu1 }
 0x36e   : > { %3358 = vst [vmem:[%s5448_s20 + $0xa8] sm:$0xff] %v3231_v53  ;;  %v3235_v47 = vadd.f32 %v3234_v31, %v5442_v16 }
 0x36f   : > { %3359 = vst [vmem:[%s5448_s20 + $0xb0] sm:$0xff] %v3233_v38 }
 0x370   : > { %3360 = vst [vmem:[%s5448_s20 + $0xb8] sm:$0xff] %v3235_v47 }
 0x372   : > { %v3238_v48 = vpop.f32.mrb[120].mxu1 }
 0x373   : > { %v3239_v25 = vadd.f32 %v3238_v48, %v5436_v59  ;;  %v3240_v32 = vpop.f32.mrb[121].mxu1 }
 0x374   : > { %v3241_v0 = vadd.f32 %v3240_v32, %v5442_v16  ;;  %v3242_v46 = vpop.f32.mrb[122].mxu1 }
 0x375   : > { %3361 = vst [vmem:[%s5448_s20 + $0xc0] sm:$0xff] %v3239_v25  ;;  %v3243_v39 = vadd.f32 %v3242_v46, %v5436_v59  ;;  %v3244_v49 = vpop.f32.mrb[123].mxu1 }
 0x376   : > { %3362 = vst [vmem:[%s5448_s20 + $0xc8] sm:$0xff] %v3241_v0  ;;  %v3245_v50 = vadd.f32 %v3244_v49, %v5442_v16 }
 0x377   : > { %3363 = vst [vmem:[%s5448_s20 + $0xd0] sm:$0xff] %v3243_v39 }
 0x378   : > { %3364 = vst [vmem:[%s5448_s20 + $0xd8] sm:$0xff] %v3245_v50 }
 0x37a   : > { %v3248_v54 = vpop.f32.mrb[124].mxu1 }
 0x37b   : > { %v3249_v55 = vadd.f32 %v3248_v54, %v5436_v59  ;;  %v3250_v4 = vpop.f32.mrb[125].mxu1 }
 0x37c   : > { %v3251_v5 = vadd.f32 %v3250_v4, %v5442_v16  ;;  %v3252_v60 = vpop.f32.mrb[126].mxu1 }
 0x37d   : > { %3365 = vst [vmem:[%s5448_s20 + $0xe0] sm:$0xff] %v3249_v55  ;;  %v3253_v15 = vadd.f32 %v3252_v60, %v5436_v59  ;;  %v3254_v10 = vpop.f32.mrb[127].mxu1 }
 0x37e   : > { %3366 = vst [vmem:[%s5448_s20 + $0xe8] sm:$0xff] %v3251_v5  ;;  %v3255_v11 = vadd.f32 %v3254_v10, %v5442_v16 }
 0x37f   : > { %3367 = vst [vmem:[%s5448_s20 + $0xf0] sm:$0xff] %v3253_v15 }
 0x380   : > { %3368 = vst [vmem:[%s5448_s20 + $0xf8] sm:$0xff] %v3255_v11 }
 0x382   : > { %v3258_v7 = vpop.f32.mrb[128].mxu1 }
 0x383   : > { %v3259_v51 = vadd.f32 %v3258_v7, %v5436_v59  ;;  %v3260_v8 = vpop.f32.mrb[129].mxu1 }
 0x384   : > { %v3261_v6 = vadd.f32 %v3260_v8, %v5442_v16  ;;  %v3262_v9 = vpop.f32.mrb[130].mxu1 }
 0x385   : > { %3369 = vst [vmem:[%s5448_s20 + $0x100] sm:$0xff] %v3259_v51  ;;  %v3263_v56 = vadd.f32 %v3262_v9, %v5436_v59  ;;  %v3264_v57 = vpop.f32.mrb[131].mxu1 }
 0x386   : > { %3370 = vst [vmem:[%s5448_s20 + $0x108] sm:$0xff] %v3261_v6  ;;  %v3265_v61 = vadd.f32 %v3264_v57, %v5442_v16 }
 0x387   : > { %3371 = vst [vmem:[%s5448_s20 + $0x110] sm:$0xff] %v3263_v56 }
 0x388   : > { %3372 = vst [vmem:[%s5448_s20 + $0x118] sm:$0xff] %v3265_v61 }
 0x38a   : > { %v3268_v20 = vpop.f32.mrb[132].mxu1 }
 0x38b   : > { %v3269_v13 = vadd.f32 %v3268_v20, %v5436_v59  ;;  %v3270_v52 = vpop.f32.mrb[133].mxu1 }
 0x38c   : > { %v3271_v18 = vadd.f32 %v3270_v52, %v5442_v16  ;;  %v3272_v14 = vpop.f32.mrb[134].mxu1 }
 0x38d   : > { %3373 = vst [vmem:[%s5448_s20 + $0x120] sm:$0xff] %v3269_v13  ;;  %v3273_v26 = vadd.f32 %v3272_v14, %v5436_v59  ;;  %v3274_v17 = vpop.f32.mrb[135].mxu1 }
 0x38e   : > { %3374 = vst [vmem:[%s5448_s20 + $0x128] sm:$0xff] %v3271_v18  ;;  %v3275_v62 = vadd.f32 %v3274_v17, %v5442_v16 }
 0x38f   : > { %3375 = vst [vmem:[%s5448_s20 + $0x130] sm:$0xff] %v3273_v26 }
 0x390   : > { %3376 = vst [vmem:[%s5448_s20 + $0x138] sm:$0xff] %v3275_v62 }
 0x392   : > { %v3278_v30 = vpop.f32.mrb[136].mxu1 }
 0x393   : > { %v3279_v21 = vadd.f32 %v3278_v30, %v5436_v59  ;;  %v3280_v40 = vpop.f32.mrb[137].mxu1 }
 0x394   : > { %v3281_v27 = vadd.f32 %v3280_v40, %v5442_v16  ;;  %v3282_v2 = vpop.f32.mrb[138].mxu1 }
 0x395   : > { %3377 = vst [vmem:[%s5448_s20 + $0x140] sm:$0xff] %v3279_v21  ;;  %v3283_v33 = vadd.f32 %v3282_v2, %v5436_v59  ;;  %v3284_v34 = vpop.f32.mrb[139].mxu1 }
 0x396   : > { %3378 = vst [vmem:[%s5448_s20 + $0x148] sm:$0xff] %v3281_v27  ;;  %v3285_v22 = vadd.f32 %v3284_v34, %v5442_v16 }
 0x397   : > { %3379 = vst [vmem:[%s5448_s20 + $0x150] sm:$0xff] %v3283_v33 }
 0x398   : > { %3380 = vst [vmem:[%s5448_s20 + $0x158] sm:$0xff] %v3285_v22 }
 0x39a   : > { %v3288_v28 = vpop.f32.mrb[140].mxu1 }
 0x39b   : > { %v3289_v3 = vadd.f32 %v3288_v28, %v5436_v59  ;;  %v3290_v58 = vpop.f32.mrb[141].mxu1 }
 0x39c   : > { %v3291_v41 = vadd.f32 %v3290_v58, %v5442_v16  ;;  %v3292_v42 = vpop.f32.mrb[142].mxu1 }
 0x39d   : > { %3381 = vst [vmem:[%s5448_s20 + $0x160] sm:$0xff] %v3289_v3  ;;  %v3293_v23 = vadd.f32 %v3292_v42, %v5436_v59  ;;  %v3294_v19 = vpop.f32.mrb[143].mxu1 }
 0x39e   : > { %3382 = vst [vmem:[%s5448_s20 + $0x168] sm:$0xff] %v3291_v41  ;;  %v3295_v35 = vadd.f32 %v3294_v19, %v5442_v16 }
 0x39f   : > { %3383 = vst [vmem:[%s5448_s20 + $0x170] sm:$0xff] %v3293_v23 }
 0x3a0   : > { %3384 = vst [vmem:[%s5448_s20 + $0x178] sm:$0xff] %v3295_v35 }
 0x3a2   : > { %v3298_v24 = vpop.f32.mrb[144].mxu1 }
 0x3a3   : > { %v3299_v36 = vadd.f32 %v3298_v24, %v5436_v59  ;;  %v3300_v43 = vpop.f32.mrb[145].mxu1 }
 0x3a4   : > { %v3301_v29 = vadd.f32 %v3300_v43, %v5442_v16  ;;  %v3302_v63 = vpop.f32.mrb[146].mxu1 }
 0x3a5   : > { %3385 = vst [vmem:[%s5448_s20 + $0x180] sm:$0xff] %v3299_v36  ;;  %v3303_v44 = vadd.f32 %v3302_v63, %v5436_v59  ;;  %v3304_v12 = vpop.f32.mrb[147].mxu1 }
 0x3a6   : > { %3386 = vst [vmem:[%s5448_s20 + $0x188] sm:$0xff] %v3301_v29  ;;  %v3305_v1 = vadd.f32 %v3304_v12, %v5442_v16 }
 0x3a7   : > { %3387 = vst [vmem:[%s5448_s20 + $0x190] sm:$0xff] %v3303_v44 }
 0x3a8   : > { %3388 = vst [vmem:[%s5448_s20 + $0x198] sm:$0xff] %v3305_v1 }
 0x3aa   : > { %v3308_v45 = vpop.f32.mrb[148].mxu1 }
 0x3ab   : > { %v3309_v53 = vadd.f32 %v3308_v45, %v5436_v59  ;;  %v3310_v37 = vpop.f32.mrb[149].mxu1 }
 0x3ac   : > { %v3311_v38 = vadd.f32 %v3310_v37, %v5442_v16  ;;  %v3312_v31 = vpop.f32.mrb[150].mxu1 }
 0x3ad   : > { %3389 = vst [vmem:[%s5448_s20 + $0x1a0] sm:$0xff] %v3309_v53  ;;  %v3313_v47 = vadd.f32 %v3312_v31, %v5436_v59  ;;  %v3314_v48 = vpop.f32.mrb[151].mxu1 }
 0x3ae   : > { %3390 = vst [vmem:[%s5448_s20 + $0x1a8] sm:$0xff] %v3311_v38  ;;  %v3315_v25 = vadd.f32 %v3314_v48, %v5442_v16 }
 0x3af   : > { %3391 = vst [vmem:[%s5448_s20 + $0x1b0] sm:$0xff] %v3313_v47 }
 0x3b0   : > { %3392 = vst [vmem:[%s5448_s20 + $0x1b8] sm:$0xff] %v3315_v25 }
 0x3b2   : > { %v3318_v32 = vpop.f32.mrb[152].mxu1 }
 0x3b3   : > { %v3319_v0 = vadd.f32 %v3318_v32, %v5436_v59  ;;  %v3320_v46 = vpop.f32.mrb[153].mxu1 }
 0x3b4   : > { %v3321_v39 = vadd.f32 %v3320_v46, %v5442_v16  ;;  %v3322_v49 = vpop.f32.mrb[154].mxu1 }
 0x3b5   : > { %3393 = vst [vmem:[%s5448_s20 + $0x1c0] sm:$0xff] %v3319_v0  ;;  %v3323_v50 = vadd.f32 %v3322_v49, %v5436_v59  ;;  %v3324_v54 = vpop.f32.mrb[155].mxu1 }
 0x3b6   : > { %3394 = vst [vmem:[%s5448_s20 + $0x1c8] sm:$0xff] %v3321_v39  ;;  %v3325_v55 = vadd.f32 %v3324_v54, %v5442_v16 }
 0x3b7   : > { %3395 = vst [vmem:[%s5448_s20 + $0x1d0] sm:$0xff] %v3323_v50 }
 0x3b8   : > { %3396 = vst [vmem:[%s5448_s20 + $0x1d8] sm:$0xff] %v3325_v55 }
 0x3ba   : > { %v3328_v4 = vpop.f32.mrb[156].mxu1 }
 0x3bb   : > { %v3329_v5 = vadd.f32 %v3328_v4, %v5436_v59  ;;  %v3330_v60 = vpop.f32.mrb[157].mxu1 }
 0x3bc   : > { %v3331_v15 = vadd.f32 %v3330_v60, %v5442_v16  ;;  %v3332_v10 = vpop.f32.mrb[158].mxu1 }
 0x3bd   : > { %3397 = vst [vmem:[%s5448_s20 + $0x1e0] sm:$0xff] %v3329_v5  ;;  %v3333_v11 = vadd.f32 %v3332_v10, %v5436_v59  ;;  %v3334_v7 = vpop.f32.mrb[159].mxu1 }
 0x3be   : > { %3398 = vst [vmem:[%s5448_s20 + $0x1e8] sm:$0xff] %v3331_v15  ;;  %v3335_v51 = vadd.f32 %v3334_v7, %v5442_v16 }
 0x3bf   : > { %3399 = vst [vmem:[%s5448_s20 + $0x1f0] sm:$0xff] %v3333_v11 }
 0x3c0   : > { %3400 = vst [vmem:[%s5448_s20 + $0x1f8] sm:$0xff] %v3335_v51 }
 0x3c1 PF: > { %s19_s29 = sadd.s32 1, %s4451_s29   ;;  %s5607_s27 = smov %s4447_s28 }
 0x3c2   : > { %p16_p5 = scmp.ge.s32.totalorder %s19_s29, 4   ;;  %s5608_s28 = smov %s5610_s30 }
 0x3c4   :  { %18 = sbr.rel (!%p16_p5) target bundleno = 2 (0x2), region = 101 }

</bundles_post_ra>
